<compile_context>
chip_gen: v7x
topology: tpu7x:2x2x1
jax: 0.10.0
libtpu: 0.0.40
codegen_flags: <defaults>
</compile_context>

<pallas_src>
import jax
import jax.numpy as jnp
from jax.experimental import pallas as pl
from jax.experimental.pallas import tpu as pltpu


# ------------------------------ helpers -------------------------------------
_TILE_M = 512      # matmul rows per grid step (multiple of 8)
_TILE_K = 2048     # max contraction columns per grid step (multiple of 128)


def _cdiv(a, b):
    return (a + b - 1) // b


def _round_up(x, m):
    return _cdiv(x, m) * m


def _choose_tiles(M, K):
    """Pick (tm, Mp, tk, nk, Kp): tm divides Mp (no M pad at test shapes);
    K is split into nk tiles of tk (nk == 1 at test shapes)."""
    tm = None
    for t in (_TILE_M, 256, 128, 64, 32, 16, 8):
        if M % t == 0:
            tm = t
            break
    if tm is None:                      # ragged M: pad to one 8-aligned tile
        Mp = _round_up(M, 8)
        tm = Mp
    else:
        Mp = M
    Kp = _round_up(K, 128)
    nk = _cdiv(Kp, _TILE_K)
    tk = _round_up(_cdiv(Kp, nk), 128)
    Kp = tk * nk
    return tm, Mp, tk, nk, Kp


def _pad2d(a, rows, cols):
    r, c = a.shape
    if rows == r and cols == c:
        return a
    return jnp.pad(a, ((0, rows - r), (0, cols - c)))


def _cout_pad(cout):
    # Keep >=256-wide layers a multiple of 256 so the 2x256x256 MXU on
    # v6e/v7x sees full output tiles; 128 lanes are enough for small layers.
    return _round_up(cout, 256 if cout >= 256 else 128)


def _vmem_limit(nbytes):
    # Explicit scoped-VMEM limit: 2x working-set headroom, floor 20 MiB
    # (above v5e's 16 MiB default), cap 48 MiB (below v7x's 64 MiB physical).
    return int(min(max(2 * nbytes, 20 << 20), 48 << 20))


# ----------------------------- Pallas kernels --------------------------------
def _conv_bias_lrelu_kernel(x_ref, w_ref, b_ref, o_ref, acc_ref):
    """One (tm, tk) @ (tk, Cp) MXU step accumulated over the K grid axis;
    bias + LeakyReLU(0.2) + bf16 store at the last K step."""
    k = pl.program_id(1)

    @pl.when(k == 0)
    def _():
        acc_ref[...] = jnp.zeros_like(acc_ref)

    acc_ref[...] += jnp.dot(x_ref[...], w_ref[...],
                            preferred_element_type=jnp.float32)

    @pl.when(k == pl.num_programs(1) - 1)
    def _():
        y = acc_ref[...] + b_ref[...]
        o_ref[...] = jnp.where(y > 0, y, 0.2 * y).astype(o_ref.dtype)


def _conv_stats_kernel(x_ref, w_ref, y_ref, stats_ref, acc_ref):
    """BN pass 1: conv matmul (f32 accumulate over the K grid axis).  At the
    last K step store y (bf16) and this M-tile's own (2, Cp) partial stats
    block (row 0 = sum, row 1 = sum of squares), so the M axis stays
    "parallel" (v7x dual-TensorCore friendly)."""
    k = pl.program_id(1)

    @pl.when(k == 0)
    def _():
        acc_ref[...] = jnp.zeros_like(acc_ref)

    acc_ref[...] += jnp.dot(x_ref[...], w_ref[...],
                            preferred_element_type=jnp.float32)

    @pl.when(k == pl.num_programs(1) - 1)
    def _():
        y = acc_ref[...]
        y_ref[...] = y.astype(y_ref.dtype)
        # two row-wise stores; no concatenate / read-modify-write
        stats_ref[0:1, :] = jnp.sum(y, axis=0, keepdims=True)
        stats_ref[1:2, :] = jnp.sum(y * y, axis=0, keepdims=True)


# ------------------------------ layer wrappers -------------------------------
def conv_lrelu_layer(patches, w, b):
    """Conv (as im2col matmul) + bias + LeakyReLU(0.2). Returns (M, Cout) bf16."""
    M, K = patches.shape
    Cout = w.shape[1]
    Cp = _cout_pad(Cout)
    tm, Mp, tk, nk, Kp = _choose_tiles(M, K)

    xp = _pad2d(patches, Mp, Kp).astype(jnp.bfloat16)
    wp = _pad2d(w, Kp, Cp).astype(jnp.bfloat16)
    bp = jnp.pad(b, (0, Cp - Cout)).reshape(1, Cp).astype(jnp.float32)

    # Grid-invariant operands are single-buffered (saves a full weight copy).
    w_kwargs = {"pipeline_mode": pl.Buffered(1)} if nk == 1 else {}
    need = (2 * tm * tk * 2 + (1 if nk == 1 else 2) * tk * Cp * 2
            + Cp * 4 + 2 * tm * Cp * 2 + tm * Cp * 4)

    out = pl.pallas_call(
        _conv_bias_lrelu_kernel,
        out_shape=jax.ShapeDtypeStruct((Mp, Cp), jnp.bfloat16),
        grid=(Mp // tm, nk),
        in_specs=[
            pl.BlockSpec((tm, tk), lambda i, k: (i, k)),
            pl.BlockSpec((tk, Cp), lambda i, k: (k, 0), **w_kwargs),
            pl.BlockSpec((1, Cp), lambda i, k: (0, 0),
                         pipeline_mode=pl.Buffered(1)),
        ],
        out_specs=pl.BlockSpec((tm, Cp), lambda i, k: (i, 0)),
        scratch_shapes=[pltpu.VMEM((tm, Cp), jnp.float32)],
        compiler_params=pltpu.CompilerParams(
            dimension_semantics=("parallel", "arbitrary"),
            vmem_limit_bytes=_vmem_limit(need)),
    )(xp, wp, bp)
    return out[:M, :Cout]


def conv_bn_stats_layer(patches, w):
    """Conv (no bias: exactly cancelled by BN mean subtraction) + per-tile BN
    partial statistics.  Returns (y bf16 (M, Cout), stats f32 (2, Cout))."""
    M, K = patches.shape
    Cout = w.shape[1]
    Cp = _cout_pad(Cout)
    tm, Mp, tk, nk, Kp = _choose_tiles(M, K)
    nm = Mp // tm

    xp = _pad2d(patches, Mp, Kp).astype(jnp.bfloat16)
    wp = _pad2d(w, Kp, Cp).astype(jnp.bfloat16)

    w_kwargs = {"pipeline_mode": pl.Buffered(1)} if nk == 1 else {}
    need = (2 * tm * tk * 2 + (1 if nk == 1 else 2) * tk * Cp * 2
            + 2 * tm * Cp * 2 + tm * Cp * 4 + 2 * 2 * Cp * 4)

    y, stats = pl.pallas_call(
        _conv_stats_kernel,
        out_shape=(jax.ShapeDtypeStruct((Mp, Cp), jnp.bfloat16),
                   jax.ShapeDtypeStruct((nm, 2, Cp), jnp.float32)),
        grid=(nm, nk),
        in_specs=[
            pl.BlockSpec((tm, tk), lambda i, k: (i, k)),
            pl.BlockSpec((tk, Cp), lambda i, k: (k, 0), **w_kwargs),
        ],
        out_specs=(
            pl.BlockSpec((tm, Cp), lambda i, k: (i, 0)),
            pl.BlockSpec((None, 2, Cp), lambda i, k: (i, 0, 0)),
        ),
        scratch_shapes=[pltpu.VMEM((tm, Cp), jnp.float32)],
        compiler_params=pltpu.CompilerParams(
            dimension_semantics=("parallel", "arbitrary"),
            vmem_limit_bytes=_vmem_limit(need)),
    )(xp, wp)

    stats = jnp.sum(stats, axis=0)                     # tiny (nm,2,Cp) -> (2,Cp)
    # Padded (zero) output channels are sliced off BEFORE the rsqrt finalize,
    # so var=0 padding columns never reach the normalization math.
    return y[:M, :Cout], stats[:, :Cout]


def batchnorm_lrelu(y, stats, gamma, beta, eps=1e-5):
    """BN (batch statistics, training mode) + LeakyReLU(0.2) as a tiny jnp
    epilogue; XLA fuses it into the next layer's im2col gather, so there is no
    extra kernel launch or activation HBM round-trip.  f32 math, bf16 result."""
    m = jnp.float32(y.shape[0])
    mean = stats[0] / m
    # TODO(synk): E[x^2]-E[x]^2 is fine at these scales; switch to a shifted /
    # Welford-style accumulation if M or activation magnitudes grow.
    var = stats[1] / m - mean * mean
    rstd = jax.lax.rsqrt(var + eps)
    scale = gamma * rstd
    shift = beta - mean * scale
    z = y.astype(jnp.float32) * scale + shift
    return jnp.where(z > 0, z, 0.2 * z).astype(jnp.bfloat16)


# ------------------------------ JAX glue -------------------------------------
def im2col(x_nhwc, k, stride, pad):
    """Extract (kh, kw, cin)-ordered patches. Returns (N*Ho*Wo, k*k*Cin)."""
    # TODO(synk): fuse this gather into the conv kernel (stride-phase split +
    # per-tap shifted sub-matmuls from a VMEM-resident window) to remove the
    # remaining ~k*k HBM write/read amplification of the patch matrix.
    N, H, W, C = x_nhwc.shape
    xp = jnp.pad(x_nhwc, ((0, 0), (pad, pad), (pad, pad), (0, 0)))
    Ho = (H + 2 * pad - k) // stride + 1
    Wo = (W + 2 * pad - k) // stride + 1
    cols = []
    for kh in range(k):
        for kw in range(k):
            cols.append(
                xp[:, kh:kh + stride * Ho:stride, kw:kw + stride * Wo:stride, :])
    patches = jnp.stack(cols, axis=3)            # (N, Ho, Wo, k*k, C)
    return patches.reshape(N * Ho * Wo, k * k * C), Ho, Wo


def init_params(key, in_dim=3, dim=8):
    """Synthetic init mirroring weights_init():
       conv weight ~ N(0, 0.02), BN gamma ~ N(1, 0.02), BN beta = 0,
       conv bias = 0 (untouched by weights_init -> synthetic zero)."""
    dims = [(in_dim, dim, 5), (dim, dim * 2, 5), (dim * 2, dim * 4, 5),
            (dim * 4, dim * 8, 5), (dim * 8, 1, 4)]
    params = []
    for (cin, cout, k) in dims:
        key, kw_key, kg_key = jax.random.split(key, 3)
        w = 0.02 * jax.random.normal(kw_key, (k, k, cin, cout), jnp.float32)
        b = jnp.zeros((cout,), jnp.float32)
        gamma = 1.0 + 0.02 * jax.random.normal(kg_key, (cout,), jnp.float32)
        beta = jnp.zeros((cout,), jnp.float32)
        params.append(dict(w=w.reshape(k * k * cin, cout), b=b,
                           gamma=gamma, beta=beta))
    return params


def discriminator_forward(x_nchw, params):
    """Forward pass. Input NCHW (PyTorch convention), output shape (N,)."""
    x = jnp.transpose(x_nchw, (0, 2, 3, 1)).astype(jnp.bfloat16)   # NHWC bf16
    N = x.shape[0]

    # Layer 1: Conv(in_dim -> dim, 5, 2, 2) + LeakyReLU(0.2)
    p = params[0]
    patches, Ho, Wo = im2col(x, 5, 2, 2)
    y = conv_lrelu_layer(patches, p["w"], p["b"])
    x = y.reshape(N, Ho, Wo, -1)

    # Layers 2-4: Conv(5, 2, 2) + BatchNorm (batch stats) + LeakyReLU(0.2)
    for li in (1, 2, 3):
        p = params[li]
        patches, Ho, Wo = im2col(x, 5, 2, 2)
        y, stats = conv_bn_stats_layer(patches, p["w"])
        y = batchnorm_lrelu(y, stats, p["gamma"], p["beta"])
        x = y.reshape(N, Ho, Wo, -1)

    # Layer 5: Conv(dim*8 -> 1, kernel 4, stride 1, valid) + Sigmoid.
    # Cout=1, M=N: plain jnp dot (a 128-padded MXU kernel would waste 127/128
    # lanes and the launch overhead exceeds the work).
    p = params[4]
    patches, _, _ = im2col(x, 4, 1, 0)           # (N, 4*4*Cin)
    logits = jnp.dot(patches.astype(jnp.float32), p["w"]) + p["b"]
    return jax.nn.sigmoid(logits).reshape(-1)    # (N,)


if __name__ == "__main__":
    key = jax.random.PRNGKey(0)
    key, xkey = jax.random.split(key)

    N, in_dim, dim = 2, 3, 8                     # small test configuration
    x = jax.random.normal(xkey, (N, in_dim, 64, 64), jnp.float32)  # NCHW

    params = init_params(key, in_dim=in_dim, dim=dim)

    fwd = jax.jit(discriminator_forward)
    out = jax.block_until_ready(fwd(x, params))

    assert out.shape == (N,), out.shape
    assert bool(jnp.all(jnp.isfinite(out)))
    assert bool(jnp.all((out >= 0.0) & (out <= 1.0)))
    print("KERNEL_OK")
</pallas_src>

<mosaic_0001>
module attributes {stable_mosaic.version = 11 : i64} {
  func.func @_conv_bias_lrelu_kernel(%arg0: i32, %arg1: i32, %arg2: memref<512x128xbf16, #tpu.memory_space<vmem>>, %arg3: memref<128x128xbf16, #tpu.memory_space<vmem>>, %arg4: memref<1x128xf32, #tpu.memory_space<vmem>>, %arg5: memref<512x128xbf16, #tpu.memory_space<vmem>>, %arg6: memref<512x128xf32, #tpu.memory_space<vmem>>) attributes {dimension_semantics = [#tpu.dimension_semantics<parallel>, #tpu.dimension_semantics<arbitrary>], iteration_bounds = array<i64: 4, 1>, scalar_prefetch = 0 : i64, scratch_operands = 1 : i64, tpu.core_type = #tpu.core_type<tc>, window_params = [{transform_indices = @transform_0, window_bounds = array<i64: 512, 128>}, {pipeline_mode = #tpu.pipeline_mode<synchronous>, transform_indices = @transform_1, window_bounds = array<i64: 128, 128>}, {pipeline_mode = #tpu.pipeline_mode<synchronous>, transform_indices = @transform_2, window_bounds = array<i64: 1, 128>}, {transform_indices = @transform_3, window_bounds = array<i64: 512, 128>}]} {
    %c0_i32 = arith.constant 0 : i32
    %0 = arith.cmpi eq, %arg1, %c0_i32 : i32
    %1 = arith.extui %0 : i1 to i32
    %c0_i32_0 = arith.constant 0 : i32
    %2 = arith.cmpi ne, %1, %c0_i32_0 : i32
    scf.if %2 {
      %cst_10 = arith.constant 0.000000e+00 : f32
      %12 = vector.broadcast %cst_10 : f32 to vector<512x128xf32>
      %c0_11 = arith.constant 0 : index
      %c0_12 = arith.constant 0 : index
      %13 = vector.load %arg6[%c0_11, %c0_12] : memref<512x128xf32, #tpu.memory_space<vmem>>, vector<512x128xf32>
      tpu.vector_store %arg6[%c0_11, %c0_12], %12 {strides = array<i32>} : memref<512x128xf32, #tpu.memory_space<vmem>>, vector<512x128xf32>,
    } else {
    }
    %c0 = arith.constant 0 : index
    %c0_1 = arith.constant 0 : index
    %3 = vector.load %arg6[%c0, %c0_1] : memref<512x128xf32, #tpu.memory_space<vmem>>, vector<512x128xf32>
    %c0_2 = arith.constant 0 : index
    %c0_3 = arith.constant 0 : index
    %4 = vector.load %arg2[%c0_2, %c0_3] : memref<512x128xbf16, #tpu.memory_space<vmem>>, vector<512x128xbf16>
    %c0_4 = arith.constant 0 : index
    %c0_5 = arith.constant 0 : index
    %5 = vector.load %arg3[%c0_4, %c0_5] : memref<128x128xbf16, #tpu.memory_space<vmem>>, vector<128x128xbf16>
    %cst = arith.constant dense<0.000000e+00> : vector<512x128xf32>
    %6 = tpu.matmul %4, %5, %cst {dimension_numbers = #tpu.dot_dimension_numbers<[1], [0], [0], [1], [0, 0, 1, 1], [], []>} : vector<512x128xbf16>, vector<128x128xbf16>, vector<512x128xf32> -> vector<512x128xf32>
    %7 = arith.addf %3, %6 : vector<512x128xf32>
    %c0_6 = arith.constant 0 : index
    %c0_7 = arith.constant 0 : index
    %8 = vector.load %arg6[%c0_6, %c0_7] : memref<512x128xf32, #tpu.memory_space<vmem>>, vector<512x128xf32>
    tpu.vector_store %arg6[%c0_6, %c0_7], %7 {strides = array<i32>} : memref<512x128xf32, #tpu.memory_space<vmem>>, vector<512x128xf32>,
    %c0_i32_8 = arith.constant 0 : i32
    %9 = arith.cmpi eq, %arg1, %c0_i32_8 : i32
    %10 = arith.extui %9 : i1 to i32
    %c0_i32_9 = arith.constant 0 : i32
    %11 = arith.cmpi ne, %10, %c0_i32_9 : i32
    scf.if %11 {
      %c0_10 = arith.constant 0 : index
      %c0_11 = arith.constant 0 : index
      %12 = vector.load %arg6[%c0_10, %c0_11] : memref<512x128xf32, #tpu.memory_space<vmem>>, vector<512x128xf32>
      %c0_12 = arith.constant 0 : index
      %c0_13 = arith.constant 0 : index
      %13 = vector.load %arg4[%c0_12, %c0_13] : memref<1x128xf32, #tpu.memory_space<vmem>>, vector<1x128xf32>
      %14 = vector.broadcast %13 : vector<1x128xf32> to vector<512x128xf32>
      %15 = arith.addf %12, %14 : vector<512x128xf32>
      %cst_14 = arith.constant 0.000000e+00 : f32
      %16 = vector.broadcast %cst_14 : f32 to vector<512x128xf32>
      %17 = arith.cmpf ogt, %15, %16 : vector<512x128xf32>
      %cst_15 = arith.constant 2.000000e-01 : f32
      %18 = vector.broadcast %cst_15 : f32 to vector<512x128xf32>
      %19 = arith.mulf %18, %15 : vector<512x128xf32>
      %20 = arith.select %17, %15, %19 : vector<512x128xi1>, vector<512x128xf32>
      %21 = arith.truncf %20 : vector<512x128xf32> to vector<512x128xbf16>
      %c0_16 = arith.constant 0 : index
      %c0_17 = arith.constant 0 : index
      %22 = vector.load %arg5[%c0_16, %c0_17] : memref<512x128xbf16, #tpu.memory_space<vmem>>, vector<512x128xbf16>
      tpu.vector_store %arg5[%c0_16, %c0_17], %21 {strides = array<i32>} : memref<512x128xbf16, #tpu.memory_space<vmem>>, vector<512x128xbf16>,
    } else {
    }
    return
  }
  func.func @transform_0(%arg0: i32, %arg1: i32) -> (i32, i32) {
    %c0_i32 = arith.constant 0 : i32
    return %arg0, %arg1 : i32, i32
  }
  func.func @transform_1(%arg0: i32, %arg1: i32) -> (i32, i32) {
    %c0_i32 = arith.constant 0 : i32
    %c0_i32_0 = arith.constant 0 : i32
    return %arg1, %c0_i32 : i32, i32
  }
  func.func @transform_2(%arg0: i32, %arg1: i32) -> (i32, i32) {
    %c0_i32 = arith.constant 0 : i32
    %c0_i32_0 = arith.constant 0 : i32
    %c0_i32_1 = arith.constant 0 : i32
    return %c0_i32, %c0_i32_0 : i32, i32
  }
  func.func @transform_3(%arg0: i32, %arg1: i32) -> (i32, i32) {
    %c0_i32 = arith.constant 0 : i32
    %c0_i32_0 = arith.constant 0 : i32
    return %arg0, %c0_i32 : i32, i32
  }
}

module attributes {stable_mosaic.version = 11 : i64} {
  func.func @_conv_stats_kernel(%arg0: i32, %arg1: i32, %arg2: memref<512x256xbf16, #tpu.memory_space<vmem>>, %arg3: memref<256x128xbf16, #tpu.memory_space<vmem>>, %arg4: memref<512x128xbf16, #tpu.memory_space<vmem>>, %arg5: memref<1x2x128xf32, #tpu.memory_space<vmem>>, %arg6: memref<512x128xf32, #tpu.memory_space<vmem>>) attributes {dimension_semantics = [#tpu.dimension_semantics<parallel>, #tpu.dimension_semantics<arbitrary>], iteration_bounds = array<i64: 1, 1>, scalar_prefetch = 0 : i64, scratch_operands = 1 : i64, tpu.core_type = #tpu.core_type<tc>, window_params = [{transform_indices = @transform_0, window_bounds = array<i64: 512, 256>}, {pipeline_mode = #tpu.pipeline_mode<synchronous>, transform_indices = @transform_1, window_bounds = array<i64: 256, 128>}, {transform_indices = @transform_2, window_bounds = array<i64: 512, 128>}, {transform_indices = @transform_3, window_bounds = array<i64: 1, 2, 128>}]} {
    %c0_i32 = arith.constant 0 : i32
    %0 = arith.cmpi eq, %arg1, %c0_i32 : i32
    %1 = arith.extui %0 : i1 to i32
    %c0_i32_0 = arith.constant 0 : i32
    %2 = arith.cmpi ne, %1, %c0_i32_0 : i32
    scf.if %2 {
      %cst_10 = arith.constant 0.000000e+00 : f32
      %12 = vector.broadcast %cst_10 : f32 to vector<512x128xf32>
      %c0_11 = arith.constant 0 : index
      %c0_12 = arith.constant 0 : index
      %13 = vector.load %arg6[%c0_11, %c0_12] : memref<512x128xf32, #tpu.memory_space<vmem>>, vector<512x128xf32>
      tpu.vector_store %arg6[%c0_11, %c0_12], %12 {strides = array<i32>} : memref<512x128xf32, #tpu.memory_space<vmem>>, vector<512x128xf32>,
    } else {
    }
    %c0 = arith.constant 0 : index
    %c0_1 = arith.constant 0 : index
    %3 = vector.load %arg6[%c0, %c0_1] : memref<512x128xf32, #tpu.memory_space<vmem>>, vector<512x128xf32>
    %c0_2 = arith.constant 0 : index
    %c0_3 = arith.constant 0 : index
    %4 = vector.load %arg2[%c0_2, %c0_3] : memref<512x256xbf16, #tpu.memory_space<vmem>>, vector<512x256xbf16>
    %c0_4 = arith.constant 0 : index
    %c0_5 = arith.constant 0 : index
    %5 = vector.load %arg3[%c0_4, %c0_5] : memref<256x128xbf16, #tpu.memory_space<vmem>>, vector<256x128xbf16>
    %cst = arith.constant dense<0.000000e+00> : vector<512x128xf32>
    %6 = tpu.matmul %4, %5, %cst {dimension_numbers = #tpu.dot_dimension_numbers<[1], [0], [0], [1], [0, 0, 1, 1], [], []>} : vector<512x256xbf16>, vector<256x128xbf16>, vector<512x128xf32> -> vector<512x128xf32>
    %7 = arith.addf %3, %6 : vector<512x128xf32>
    %c0_6 = arith.constant 0 : index
    %c0_7 = arith.constant 0 : index
    %8 = vector.load %arg6[%c0_6, %c0_7] : memref<512x128xf32, #tpu.memory_space<vmem>>, vector<512x128xf32>
    tpu.vector_store %arg6[%c0_6, %c0_7], %7 {strides = array<i32>} : memref<512x128xf32, #tpu.memory_space<vmem>>, vector<512x128xf32>,
    %c0_i32_8 = arith.constant 0 : i32
    %9 = arith.cmpi eq, %arg1, %c0_i32_8 : i32
    %10 = arith.extui %9 : i1 to i32
    %c0_i32_9 = arith.constant 0 : i32
    %11 = arith.cmpi ne, %10, %c0_i32_9 : i32
    scf.if %11 {
      %c0_10 = arith.constant 0 : index
      %c0_11 = arith.constant 0 : index
      %12 = vector.load %arg6[%c0_10, %c0_11] : memref<512x128xf32, #tpu.memory_space<vmem>>, vector<512x128xf32>
      %13 = arith.truncf %12 : vector<512x128xf32> to vector<512x128xbf16>
      %c0_12 = arith.constant 0 : index
      %c0_13 = arith.constant 0 : index
      %14 = vector.load %arg4[%c0_12, %c0_13] : memref<512x128xbf16, #tpu.memory_space<vmem>>, vector<512x128xbf16>
      tpu.vector_store %arg4[%c0_12, %c0_13], %13 {strides = array<i32>} : memref<512x128xbf16, #tpu.memory_space<vmem>>, vector<512x128xbf16>,
      %cst_14 = arith.constant dense<0.000000e+00> : vector<128xf32>
      %15 = vector.multi_reduction <add>, %12, %cst_14 [0] : vector<512x128xf32> to vector<128xf32>
      %16 = vector.shape_cast %15 : vector<128xf32> to vector<1x128xf32>
      %c0_15 = arith.constant 0 : index
      %c0_16 = arith.constant 0 : index
      %c0_17 = arith.constant 0 : index
      %17 = vector.load %arg5[%c0_15, %c0_16, %c0_17] : memref<1x2x128xf32, #tpu.memory_space<vmem>>, vector<1x1x128xf32>
      %18 = vector.shape_cast %17 : vector<1x1x128xf32> to vector<1x128xf32>
      %19 = vector.shape_cast %16 : vector<1x128xf32> to vector<1x1x128xf32>
      tpu.vector_store %arg5[%c0_15, %c0_16, %c0_17], %19 {strides = array<i32>} : memref<1x2x128xf32, #tpu.memory_space<vmem>>, vector<1x1x128xf32>,
      %20 = arith.mulf %12, %12 : vector<512x128xf32>
      %cst_18 = arith.constant dense<0.000000e+00> : vector<128xf32>
      %21 = vector.multi_reduction <add>, %20, %cst_18 [0] : vector<512x128xf32> to vector<128xf32>
      %22 = vector.shape_cast %21 : vector<128xf32> to vector<1x128xf32>
      %c0_19 = arith.constant 0 : index
      %c1 = arith.constant 1 : index
      %c0_20 = arith.constant 0 : index
      %23 = vector.load %arg5[%c0_19, %c1, %c0_20] : memref<1x2x128xf32, #tpu.memory_space<vmem>>, vector<1x1x128xf32>
      %24 = vector.shape_cast %23 : vector<1x1x128xf32> to vector<1x128xf32>
      %25 = vector.shape_cast %22 : vector<1x128xf32> to vector<1x1x128xf32>
      tpu.vector_store %arg5[%c0_19, %c1, %c0_20], %25 {strides = array<i32>} : memref<1x2x128xf32, #tpu.memory_space<vmem>>, vector<1x1x128xf32>,
    } else {
    }
    return
  }
  func.func @transform_0(%arg0: i32, %arg1: i32) -> (i32, i32) {
    %c0_i32 = arith.constant 0 : i32
    return %arg0, %arg1 : i32, i32
  }
  func.func @transform_1(%arg0: i32, %arg1: i32) -> (i32, i32) {
    %c0_i32 = arith.constant 0 : i32
    %c0_i32_0 = arith.constant 0 : i32
    return %arg1, %c0_i32 : i32, i32
  }
  func.func @transform_2(%arg0: i32, %arg1: i32) -> (i32, i32) {
    %c0_i32 = arith.constant 0 : i32
    %c0_i32_0 = arith.constant 0 : i32
    return %arg0, %c0_i32 : i32, i32
  }
  func.func @transform_3(%arg0: i32, %arg1: i32) -> (i32, i32, i32) {
    %c0_i32 = arith.constant 0 : i32
    %c0_i32_0 = arith.constant 0 : i32
    %c0_i32_1 = arith.constant 0 : i32
    return %arg0, %c0_i32, %c0_i32_0 : i32, i32, i32
  }
}

module attributes {stable_mosaic.version = 11 : i64} {
  func.func @_conv_stats_kernel(%arg0: i32, %arg1: i32, %arg2: memref<128x512xbf16, #tpu.memory_space<vmem>>, %arg3: memref<512x128xbf16, #tpu.memory_space<vmem>>, %arg4: memref<128x128xbf16, #tpu.memory_space<vmem>>, %arg5: memref<1x2x128xf32, #tpu.memory_space<vmem>>, %arg6: memref<128x128xf32, #tpu.memory_space<vmem>>) attributes {dimension_semantics = [#tpu.dimension_semantics<parallel>, #tpu.dimension_semantics<arbitrary>], iteration_bounds = array<i64: 1, 1>, scalar_prefetch = 0 : i64, scratch_operands = 1 : i64, tpu.core_type = #tpu.core_type<tc>, window_params = [{transform_indices = @transform_0, window_bounds = array<i64: 128, 512>}, {pipeline_mode = #tpu.pipeline_mode<synchronous>, transform_indices = @transform_1, window_bounds = array<i64: 512, 128>}, {transform_indices = @transform_2, window_bounds = array<i64: 128, 128>}, {transform_indices = @transform_3, window_bounds = array<i64: 1, 2, 128>}]} {
    %c0_i32 = arith.constant 0 : i32
    %0 = arith.cmpi eq, %arg1, %c0_i32 : i32
    %1 = arith.extui %0 : i1 to i32
    %c0_i32_0 = arith.constant 0 : i32
    %2 = arith.cmpi ne, %1, %c0_i32_0 : i32
    scf.if %2 {
      %cst_10 = arith.constant 0.000000e+00 : f32
      %12 = vector.broadcast %cst_10 : f32 to vector<128x128xf32>
      %c0_11 = arith.constant 0 : index
      %c0_12 = arith.constant 0 : index
      %13 = vector.load %arg6[%c0_11, %c0_12] : memref<128x128xf32, #tpu.memory_space<vmem>>, vector<128x128xf32>
      tpu.vector_store %arg6[%c0_11, %c0_12], %12 {strides = array<i32>} : memref<128x128xf32, #tpu.memory_space<vmem>>, vector<128x128xf32>,
    } else {
    }
    %c0 = arith.constant 0 : index
    %c0_1 = arith.constant 0 : index
    %3 = vector.load %arg6[%c0, %c0_1] : memref<128x128xf32, #tpu.memory_space<vmem>>, vector<128x128xf32>
    %c0_2 = arith.constant 0 : index
    %c0_3 = arith.constant 0 : index
    %4 = vector.load %arg2[%c0_2, %c0_3] : memref<128x512xbf16, #tpu.memory_space<vmem>>, vector<128x512xbf16>
    %c0_4 = arith.constant 0 : index
    %c0_5 = arith.constant 0 : index
    %5 = vector.load %arg3[%c0_4, %c0_5] : memref<512x128xbf16, #tpu.memory_space<vmem>>, vector<512x128xbf16>
    %cst = arith.constant dense<0.000000e+00> : vector<128x128xf32>
    %6 = tpu.matmul %4, %5, %cst {dimension_numbers = #tpu.dot_dimension_numbers<[1], [0], [0], [1], [0, 0, 1, 1], [], []>} : vector<128x512xbf16>, vector<512x128xbf16>, vector<128x128xf32> -> vector<128x128xf32>
    %7 = arith.addf %3, %6 : vector<128x128xf32>
    %c0_6 = arith.constant 0 : index
    %c0_7 = arith.constant 0 : index
    %8 = vector.load %arg6[%c0_6, %c0_7] : memref<128x128xf32, #tpu.memory_space<vmem>>, vector<128x128xf32>
    tpu.vector_store %arg6[%c0_6, %c0_7], %7 {strides = array<i32>} : memref<128x128xf32, #tpu.memory_space<vmem>>, vector<128x128xf32>,
    %c0_i32_8 = arith.constant 0 : i32
    %9 = arith.cmpi eq, %arg1, %c0_i32_8 : i32
    %10 = arith.extui %9 : i1 to i32
    %c0_i32_9 = arith.constant 0 : i32
    %11 = arith.cmpi ne, %10, %c0_i32_9 : i32
    scf.if %11 {
      %c0_10 = arith.constant 0 : index
      %c0_11 = arith.constant 0 : index
      %12 = vector.load %arg6[%c0_10, %c0_11] : memref<128x128xf32, #tpu.memory_space<vmem>>, vector<128x128xf32>
      %13 = arith.truncf %12 : vector<128x128xf32> to vector<128x128xbf16>
      %c0_12 = arith.constant 0 : index
      %c0_13 = arith.constant 0 : index
      %14 = vector.load %arg4[%c0_12, %c0_13] : memref<128x128xbf16, #tpu.memory_space<vmem>>, vector<128x128xbf16>
      tpu.vector_store %arg4[%c0_12, %c0_13], %13 {strides = array<i32>} : memref<128x128xbf16, #tpu.memory_space<vmem>>, vector<128x128xbf16>,
      %cst_14 = arith.constant dense<0.000000e+00> : vector<128xf32>
      %15 = vector.multi_reduction <add>, %12, %cst_14 [0] : vector<128x128xf32> to vector<128xf32>
      %16 = vector.shape_cast %15 : vector<128xf32> to vector<1x128xf32>
      %c0_15 = arith.constant 0 : index
      %c0_16 = arith.constant 0 : index
      %c0_17 = arith.constant 0 : index
      %17 = vector.load %arg5[%c0_15, %c0_16, %c0_17] : memref<1x2x128xf32, #tpu.memory_space<vmem>>, vector<1x1x128xf32>
      %18 = vector.shape_cast %17 : vector<1x1x128xf32> to vector<1x128xf32>
      %19 = vector.shape_cast %16 : vector<1x128xf32> to vector<1x1x128xf32>
      tpu.vector_store %arg5[%c0_15, %c0_16, %c0_17], %19 {strides = array<i32>} : memref<1x2x128xf32, #tpu.memory_space<vmem>>, vector<1x1x128xf32>,
      %20 = arith.mulf %12, %12 : vector<128x128xf32>
      %cst_18 = arith.constant dense<0.000000e+00> : vector<128xf32>
      %21 = vector.multi_reduction <add>, %20, %cst_18 [0] : vector<128x128xf32> to vector<128xf32>
      %22 = vector.shape_cast %21 : vector<128xf32> to vector<1x128xf32>
      %c0_19 = arith.constant 0 : index
      %c1 = arith.constant 1 : index
      %c0_20 = arith.constant 0 : index
      %23 = vector.load %arg5[%c0_19, %c1, %c0_20] : memref<1x2x128xf32, #tpu.memory_space<vmem>>, vector<1x1x128xf32>
      %24 = vector.shape_cast %23 : vector<1x1x128xf32> to vector<1x128xf32>
      %25 = vector.shape_cast %22 : vector<1x128xf32> to vector<1x1x128xf32>
      tpu.vector_store %arg5[%c0_19, %c1, %c0_20], %25 {strides = array<i32>} : memref<1x2x128xf32, #tpu.memory_space<vmem>>, vector<1x1x128xf32>,
    } else {
    }
    return
  }
  func.func @transform_0(%arg0: i32, %arg1: i32) -> (i32, i32) {
    %c0_i32 = arith.constant 0 : i32
    return %arg0, %arg1 : i32, i32
  }
  func.func @transform_1(%arg0: i32, %arg1: i32) -> (i32, i32) {
    %c0_i32 = arith.constant 0 : i32
    %c0_i32_0 = arith.constant 0 : i32
    return %arg1, %c0_i32 : i32, i32
  }
  func.func @transform_2(%arg0: i32, %arg1: i32) -> (i32, i32) {
    %c0_i32 = arith.constant 0 : i32
    %c0_i32_0 = arith.constant 0 : i32
    return %arg0, %c0_i32 : i32, i32
  }
  func.func @transform_3(%arg0: i32, %arg1: i32) -> (i32, i32, i32) {
    %c0_i32 = arith.constant 0 : i32
    %c0_i32_0 = arith.constant 0 : i32
    %c0_i32_1 = arith.constant 0 : i32
    return %arg0, %c0_i32, %c0_i32_0 : i32, i32, i32
  }
}

module attributes {stable_mosaic.version = 11 : i64} {
  func.func @_conv_stats_kernel(%arg0: i32, %arg1: i32, %arg2: memref<32x896xbf16, #tpu.memory_space<vmem>>, %arg3: memref<896x128xbf16, #tpu.memory_space<vmem>>, %arg4: memref<32x128xbf16, #tpu.memory_space<vmem>>, %arg5: memref<1x2x128xf32, #tpu.memory_space<vmem>>, %arg6: memref<32x128xf32, #tpu.memory_space<vmem>>) attributes {dimension_semantics = [#tpu.dimension_semantics<parallel>, #tpu.dimension_semantics<arbitrary>], iteration_bounds = array<i64: 1, 1>, scalar_prefetch = 0 : i64, scratch_operands = 1 : i64, tpu.core_type = #tpu.core_type<tc>, window_params = [{transform_indices = @transform_0, window_bounds = array<i64: 32, 896>}, {pipeline_mode = #tpu.pipeline_mode<synchronous>, transform_indices = @transform_1, window_bounds = array<i64: 896, 128>}, {transform_indices = @transform_2, window_bounds = array<i64: 32, 128>}, {transform_indices = @transform_3, window_bounds = array<i64: 1, 2, 128>}]} {
    %c0_i32 = arith.constant 0 : i32
    %0 = arith.cmpi eq, %arg1, %c0_i32 : i32
    %1 = arith.extui %0 : i1 to i32
    %c0_i32_0 = arith.constant 0 : i32
    %2 = arith.cmpi ne, %1, %c0_i32_0 : i32
    scf.if %2 {
      %cst_10 = arith.constant 0.000000e+00 : f32
      %12 = vector.broadcast %cst_10 : f32 to vector<32x128xf32>
      %c0_11 = arith.constant 0 : index
      %c0_12 = arith.constant 0 : index
      %13 = vector.load %arg6[%c0_11, %c0_12] : memref<32x128xf32, #tpu.memory_space<vmem>>, vector<32x128xf32>
      tpu.vector_store %arg6[%c0_11, %c0_12], %12 {strides = array<i32>} : memref<32x128xf32, #tpu.memory_space<vmem>>, vector<32x128xf32>,
    } else {
    }
    %c0 = arith.constant 0 : index
    %c0_1 = arith.constant 0 : index
    %3 = vector.load %arg6[%c0, %c0_1] : memref<32x128xf32, #tpu.memory_space<vmem>>, vector<32x128xf32>
    %c0_2 = arith.constant 0 : index
    %c0_3 = arith.constant 0 : index
    %4 = vector.load %arg2[%c0_2, %c0_3] : memref<32x896xbf16, #tpu.memory_space<vmem>>, vector<32x896xbf16>
    %c0_4 = arith.constant 0 : index
    %c0_5 = arith.constant 0 : index
    %5 = vector.load %arg3[%c0_4, %c0_5] : memref<896x128xbf16, #tpu.memory_space<vmem>>, vector<896x128xbf16>
    %cst = arith.constant dense<0.000000e+00> : vector<32x128xf32>
    %6 = tpu.matmul %4, %5, %cst {dimension_numbers = #tpu.dot_dimension_numbers<[1], [0], [0], [1], [0, 0, 1, 1], [], []>} : vector<32x896xbf16>, vector<896x128xbf16>, vector<32x128xf32> -> vector<32x128xf32>
    %7 = arith.addf %3, %6 : vector<32x128xf32>
    %c0_6 = arith.constant 0 : index
    %c0_7 = arith.constant 0 : index
    %8 = vector.load %arg6[%c0_6, %c0_7] : memref<32x128xf32, #tpu.memory_space<vmem>>, vector<32x128xf32>
    tpu.vector_store %arg6[%c0_6, %c0_7], %7 {strides = array<i32>} : memref<32x128xf32, #tpu.memory_space<vmem>>, vector<32x128xf32>,
    %c0_i32_8 = arith.constant 0 : i32
    %9 = arith.cmpi eq, %arg1, %c0_i32_8 : i32
    %10 = arith.extui %9 : i1 to i32
    %c0_i32_9 = arith.constant 0 : i32
    %11 = arith.cmpi ne, %10, %c0_i32_9 : i32
    scf.if %11 {
      %c0_10 = arith.constant 0 : index
      %c0_11 = arith.constant 0 : index
      %12 = vector.load %arg6[%c0_10, %c0_11] : memref<32x128xf32, #tpu.memory_space<vmem>>, vector<32x128xf32>
      %13 = arith.truncf %12 : vector<32x128xf32> to vector<32x128xbf16>
      %c0_12 = arith.constant 0 : index
      %c0_13 = arith.constant 0 : index
      %14 = vector.load %arg4[%c0_12, %c0_13] : memref<32x128xbf16, #tpu.memory_space<vmem>>, vector<32x128xbf16>
      tpu.vector_store %arg4[%c0_12, %c0_13], %13 {strides = array<i32>} : memref<32x128xbf16, #tpu.memory_space<vmem>>, vector<32x128xbf16>,
      %cst_14 = arith.constant dense<0.000000e+00> : vector<128xf32>
      %15 = vector.multi_reduction <add>, %12, %cst_14 [0] : vector<32x128xf32> to vector<128xf32>
      %16 = vector.shape_cast %15 : vector<128xf32> to vector<1x128xf32>
      %c0_15 = arith.constant 0 : index
      %c0_16 = arith.constant 0 : index
      %c0_17 = arith.constant 0 : index
      %17 = vector.load %arg5[%c0_15, %c0_16, %c0_17] : memref<1x2x128xf32, #tpu.memory_space<vmem>>, vector<1x1x128xf32>
      %18 = vector.shape_cast %17 : vector<1x1x128xf32> to vector<1x128xf32>
      %19 = vector.shape_cast %16 : vector<1x128xf32> to vector<1x1x128xf32>
      tpu.vector_store %arg5[%c0_15, %c0_16, %c0_17], %19 {strides = array<i32>} : memref<1x2x128xf32, #tpu.memory_space<vmem>>, vector<1x1x128xf32>,
      %20 = arith.mulf %12, %12 : vector<32x128xf32>
      %cst_18 = arith.constant dense<0.000000e+00> : vector<128xf32>
      %21 = vector.multi_reduction <add>, %20, %cst_18 [0] : vector<32x128xf32> to vector<128xf32>
      %22 = vector.shape_cast %21 : vector<128xf32> to vector<1x128xf32>
      %c0_19 = arith.constant 0 : index
      %c1 = arith.constant 1 : index
      %c0_20 = arith.constant 0 : index
      %23 = vector.load %arg5[%c0_19, %c1, %c0_20] : memref<1x2x128xf32, #tpu.memory_space<vmem>>, vector<1x1x128xf32>
      %24 = vector.shape_cast %23 : vector<1x1x128xf32> to vector<1x128xf32>
      %25 = vector.shape_cast %22 : vector<1x128xf32> to vector<1x1x128xf32>
      tpu.vector_store %arg5[%c0_19, %c1, %c0_20], %25 {strides = array<i32>} : memref<1x2x128xf32, #tpu.memory_space<vmem>>, vector<1x1x128xf32>,
    } else {
    }
    return
  }
  func.func @transform_0(%arg0: i32, %arg1: i32) -> (i32, i32) {
    %c0_i32 = arith.constant 0 : i32
    return %arg0, %arg1 : i32, i32
  }
  func.func @transform_1(%arg0: i32, %arg1: i32) -> (i32, i32) {
    %c0_i32 = arith.constant 0 : i32
    %c0_i32_0 = arith.constant 0 : i32
    return %arg1, %c0_i32 : i32, i32
  }
  func.func @transform_2(%arg0: i32, %arg1: i32) -> (i32, i32) {
    %c0_i32 = arith.constant 0 : i32
    %c0_i32_0 = arith.constant 0 : i32
    return %arg0, %c0_i32 : i32, i32
  }
  func.func @transform_3(%arg0: i32, %arg1: i32) -> (i32, i32, i32) {
    %c0_i32 = arith.constant 0 : i32
    %c0_i32_0 = arith.constant 0 : i32
    %c0_i32_1 = arith.constant 0 : i32
    return %arg0, %c0_i32, %c0_i32_0 : i32, i32, i32
  }
}

</mosaic_0001>

<bundles_post_ra>
// kernel: discriminator_forward.4
= control target key start
LH: loop header
LB: loop body
LE: loop exit
PB: predicated region body
PF: predicated region fallthrough
CT: control target
= control target key end

     0   :  { %s2438_s12 = smov 0   ;;  %s2440_s13 = smov 0   ;;  %s2648_s0 = inlined_call_operand.vmem [shape: bf16[2048,128], index: 0, kind: input, shape index: {}]   ;;  %s2649_s1 = inlined_call_operand.vmem [shape: bf16[128,128], index: 1, kind: input, shape index: {}]   ;;  %s2650_s2 = inlined_call_operand.vmem [shape: f32[1,128], index: 2, kind: input, shape index: {}]   ;;  %s2651_s3 = inlined_call_operand.vmem [shape: bf16[2048,128], index: 3, kind: output, shape index: {}]  }
   0x1   :  { %s2442_s14 = smov 0  }
   0x2 LB: > { %s25_s15 = sadd.s32 1, %s2412_s13  ;;  %p1827_p0 = scmp.ge.s32.totalorder %s2416_s14, 1  ;;  %s2416_s14 = sphi %s2442_s14, %s13_s14   ;;  %s2412_s13 = sphi %s2440_s13, %s2653_s13   ;;  %s2408_s12 = sphi %s2438_s12, %s2652_s12  }
   0x3   : > { %p27_p1 = scmp.ge.s32.totalorder %s25_s15, 4  ;;  %p166_p2 = scmp.lt.s32.totalorder %s2416_s14, 5 }
   0x5   : > { %s2655_s15 = smov (%p27_p1, %s25_s15), 0  ;;  %p167_p3 = pnand %p1827_p0, %p166_p2 }
   0x6   : > { %v2354_v0 = vld [vmem:[%s2649_s1] sm:$0xff] (!%p167_p3)   ;;  %s1828_s18 = sshll.u32 (!%p167_p3), %s2408_s12, 6  ;;  %v2355_v1 = vld [vmem:[%s2649_s1 + $0x8] sm:$0xff] (!%p167_p3)   ;;  %v2356_v2 = vld [vmem:[%s2649_s1 + $0x10] sm:$0xff] (!%p167_p3)  }
   0x7   : > { %170 = sbr.rel (%p167_p3) target bundleno = 328 (0x148), region = 32  ;;  %p199_p4 = scmp.lt.s32.totalorder (!%p167_p3), %s1828_s18, 255  ;;  %2234 = vmatprep.subr.bf16.mxu0 (!%p167_p3), %v2354_v0  ;;  %2314 = vmatprep.subr.bf16.mxu1 (!%p167_p3), %v2354_v0  ;;  %v2357_v3 = vld [vmem:[%s2649_s1 + $0x18] sm:$0xff] (!%p167_p3)   ;;  %v2358_v6 = vld [vmem:[%s2649_s1 + $0x20] sm:$0xff] (!%p167_p3)   ;;  %v2359_v7 = vld [vmem:[%s2649_s1 + $0x28] sm:$0xff] (!%p167_p3)  }
   0x8   : > { %2235 = vmatpush3.bf16.msra.mxu0 (!%p167_p3), %v2354_v0  ;;  %2322 = vmatpush3.bf16.msra.mxu1 (!%p167_p3), %v2354_v0  ;;  %v2360_v8 = vld [vmem:[%s2649_s1 + $0x30] sm:$0xff] (!%p167_p3)   ;;  %v2361_v9 = vld [vmem:[%s2649_s1 + $0x38] sm:$0xff] (!%p167_p3)   ;;  %v2525_v40 = vld [vmem:[%s2650_s2] ss:$0 sm:$0xff] (!%p167_p3) }
   0x9   : > { %2236 = vmatprep.subr.bf16.mxu0 (!%p167_p3), %v2355_v1  ;;  %2315 = vmatprep.subr.bf16.mxu1 (!%p167_p3), %v2355_v1 }
   0xc   : > { %2237 = vmatpush3.bf16.msra.mxu0 (!%p167_p3), %v2355_v1  ;;  %2323 = vmatpush3.bf16.msra.mxu1 (!%p167_p3), %v2355_v1 }
   0xd   : > { %2238 = vmatprep.subr.bf16.mxu0 (!%p167_p3), %v2356_v2  ;;  %2316 = vmatprep.subr.bf16.mxu1 (!%p167_p3), %v2356_v2 }
   0xe   : > { %s2657_s18 = smov (!%p199_p4, %s1828_s18), 255 }
   0xf   : > { %s1829_s23 = sshll.u32 %s2657_s18, 2 }
  0x10   : > { %s2473_s26 = scalar_lea.vmem %s2648_s0, %s1829_s23  ;;  %2239 = vmatpush3.bf16.msra.mxu0 %v2356_v2  ;;  %2324 = vmatpush3.bf16.msra.mxu1 %v2356_v2  ;;  %s2542_s17 = scalar_lea.vmem %s2651_s3, %s1829_s23 }
  0x11   : > { %v2362_v4 = vld [vmem:[%s2473_s26] sm:$0xff]   ;;  %2240 = vmatprep.subr.bf16.mxu0 %v2357_v3  ;;  %2317 = vmatprep.subr.bf16.mxu1 %v2357_v3  ;;  %v2364_v10 = vld [vmem:[%s2473_s26 + $0x8] sm:$0xff]   ;;  %v2366_v12 = vld [vmem:[%s2473_s26 + $0x10] sm:$0xff]  }
  0x12   : > { %v2363_v5 = vld [vmem:[%s2473_s26 + $0x80] sm:$0xff]   ;;  %2250 = vmatprep.mubr.bf16.mxu0 %v2362_v4  ;;  %v2365_v11 = vld [vmem:[%s2473_s26 + $0x88] sm:$0xff]   ;;  %v2367_v13 = vld [vmem:[%s2473_s26 + $0x90] sm:$0xff]  }
  0x13   : > { %2282 = vmatprep.mubr.bf16.mxu1 %v2363_v5  ;;  %v2368_v14 = vld [vmem:[%s2473_s26 + $0x18] sm:$0xff]   ;;  %v2370_v16 = vld [vmem:[%s2473_s26 + $0x20] sm:$0xff]   ;;  %v2372_v18 = vld [vmem:[%s2473_s26 + $0x28] sm:$0xff]  }
  0x14   : > { %2241 = vmatpush3.bf16.msra.mxu0 %v2357_v3  ;;  %2325 = vmatpush3.bf16.msra.mxu1 %v2357_v3  ;;  %v2369_v15 = vld [vmem:[%s2473_s26 + $0x98] sm:$0xff]   ;;  %v2371_v17 = vld [vmem:[%s2473_s26 + $0xa0] sm:$0xff]   ;;  %v2373_v19 = vld [vmem:[%s2473_s26 + $0xa8] sm:$0xff]  }
  0x15   : > { %2242 = vmatprep.subr.bf16.mxu0 %v2358_v6  ;;  %2318 = vmatprep.subr.bf16.mxu1 %v2358_v6  ;;  %v2374_v20 = vld [vmem:[%s2473_s26 + $0x30] sm:$0xff]   ;;  %v2376_v22 = vld [vmem:[%s2473_s26 + $0x38] sm:$0xff]   ;;  %v2378_v24 = vld [vmem:[%s2473_s26 + $0x40] sm:$0xff]  }
  0x16   : > { %v2375_v21 = vld [vmem:[%s2473_s26 + $0xb0] sm:$0xff]   ;;  %v2377_v23 = vld [vmem:[%s2473_s26 + $0xb8] sm:$0xff]   ;;  %v2379_v25 = vld [vmem:[%s2473_s26 + $0xc0] sm:$0xff]  }
  0x17   : > { %v2380_v26 = vld [vmem:[%s2473_s26 + $0x48] sm:$0xff]   ;;  %v2382_v28 = vld [vmem:[%s2473_s26 + $0x50] sm:$0xff]   ;;  %v2384_v30 = vld [vmem:[%s2473_s26 + $0x58] sm:$0xff]  }
  0x18   : > { %2243 = vmatpush3.bf16.msra.mxu0 %v2358_v6  ;;  %2326 = vmatpush3.bf16.msra.mxu1 %v2358_v6  ;;  %v2381_v27 = vld [vmem:[%s2473_s26 + $0xc8] sm:$0xff]   ;;  %v2383_v29 = vld [vmem:[%s2473_s26 + $0xd0] sm:$0xff]   ;;  %v2385_v31 = vld [vmem:[%s2473_s26 + $0xd8] sm:$0xff]  }
  0x19   : > { %2244 = vmatprep.subr.bf16.mxu0 %v2359_v7  ;;  %2319 = vmatprep.subr.bf16.mxu1 %v2359_v7  ;;  %v2386_v32 = vld [vmem:[%s2473_s26 + $0x60] sm:$0xff]   ;;  %v2388_v34 = vld [vmem:[%s2473_s26 + $0x68] sm:$0xff]   ;;  %v2390_v36 = vld [vmem:[%s2473_s26 + $0x70] sm:$0xff]  }
  0x1a   : > { %v2387_v33 = vld [vmem:[%s2473_s26 + $0xe0] sm:$0xff]   ;;  %v2389_v35 = vld [vmem:[%s2473_s26 + $0xe8] sm:$0xff]   ;;  %v2391_v37 = vld [vmem:[%s2473_s26 + $0xf0] sm:$0xff]  }
  0x1b   : > { %v2392_v38 = vld [vmem:[%s2473_s26 + $0x78] sm:$0xff]  }
  0x1c   : > { %2245 = vmatpush3.bf16.msra.mxu0 %v2359_v7  ;;  %2327 = vmatpush3.bf16.msra.mxu1 %v2359_v7  ;;  %v2393_v39 = vld [vmem:[%s2473_s26 + $0xf8] sm:$0xff]  }
  0x1d   : > { %2246 = vmatprep.subr.bf16.mxu0 %v2360_v8  ;;  %2320 = vmatprep.subr.bf16.mxu1 %v2360_v8 }
  0x20   : > { %2247 = vmatpush3.bf16.msra.mxu0 %v2360_v8  ;;  %2328 = vmatpush3.bf16.msra.mxu1 %v2360_v8 }
  0x21   : > { %2248 = vmatprep.subr.bf16.mxu0 %v2361_v9  ;;  %2321 = vmatprep.subr.bf16.mxu1 %v2361_v9 }
  0x24   : > { %2249 = vmatpush3.bf16.msra.mxu0 %v2361_v9  ;;  %2329 = vmatpush3.bf16.msra.mxu1 %v2361_v9 }
  0x27   : > { %2251 = vmatmul.mubr.bf16.vlgmr.msra.gmra.mrb[0].mxu0 %v2364_v10  ;;  %2283 = vmatmul.mubr.bf16.vlgmr.msra.gmra.mrb[0].mxu1 %v2365_v11 }
  0x28   : > { %2254 = vmatprep.mubr.bf16.mxu0 %v2366_v12  ;;  %2286 = vmatprep.mubr.bf16.mxu1 %v2367_v13 }
  0x2f   : > { %2255 = vmatmul.mubr.bf16.gmra.mrb[4].mxu0 %v2368_v14  ;;  %2287 = vmatmul.mubr.bf16.gmra.mrb[4].mxu1 %v2369_v15 }
  0x30   : > { %2258 = vmatprep.mubr.bf16.mxu0 %v2370_v16  ;;  %2290 = vmatprep.mubr.bf16.mxu1 %v2371_v17 }
  0x37   : > { %2259 = vmatmul.mubr.bf16.gmra.mrb[8].mxu0 %v2372_v18  ;;  %2291 = vmatmul.mubr.bf16.gmra.mrb[8].mxu1 %v2373_v19 }
  0x38   : > { %2262 = vmatprep.mubr.bf16.mxu0 %v2374_v20  ;;  %2294 = vmatprep.mubr.bf16.mxu1 %v2375_v21 }
  0x3f   : > { %2263 = vmatmul.mubr.bf16.gmra.mrb[12].mxu0 %v2376_v22  ;;  %2295 = vmatmul.mubr.bf16.gmra.mrb[12].mxu1 %v2377_v23 }
  0x40   : > { %2266 = vmatprep.mubr.bf16.mxu0 %v2378_v24  ;;  %2298 = vmatprep.mubr.bf16.mxu1 %v2379_v25 }
  0x47   : > { %2267 = vmatmul.mubr.bf16.gmra.mrb[16].mxu0 %v2380_v26  ;;  %2299 = vmatmul.mubr.bf16.gmra.mrb[16].mxu1 %v2381_v27 }
  0x48   : > { %2270 = vmatprep.mubr.bf16.mxu0 %v2382_v28  ;;  %2302 = vmatprep.mubr.bf16.mxu1 %v2383_v29 }
  0x4f   : > { %2271 = vmatmul.mubr.bf16.gmra.mrb[20].mxu0 %v2384_v30  ;;  %2303 = vmatmul.mubr.bf16.gmra.mrb[20].mxu1 %v2385_v31 }
  0x50   : > { %2274 = vmatprep.mubr.bf16.mxu0 %v2386_v32  ;;  %2306 = vmatprep.mubr.bf16.mxu1 %v2387_v33 }
  0x57   : > { %2275 = vmatmul.mubr.bf16.gmra.mrb[24].mxu0 %v2388_v34  ;;  %2307 = vmatmul.mubr.bf16.gmra.mrb[24].mxu1 %v2389_v35 }
  0x58   : > { %2278 = vmatprep.mubr.bf16.mxu0 %v2390_v36  ;;  %2310 = vmatprep.mubr.bf16.mxu1 %v2391_v37 }
  0x5f   : > { %2279 = vmatmul.mubr.bf16.gmra.mrb[28].mxu0 %v2392_v38  ;;  %2311 = vmatmul.mubr.bf16.gmra.mrb[28].mxu1 %v2393_v39 }
  0xfa   : > { %v2252_v41 = vpop.f32.mrb[0].mxu0  ;;  %v2284_v42 = vpop.f32.mrb[0].mxu1 }
  0xfb   : > { %v1165_v43 = vadd.f32 %v2252_v41, %v2525_v40  ;;  %v1197_v44 = vadd.f32 %v2284_v42, %v2525_v40  ;;  %v706_v45 = vpop.f32.mrb[1].mxu0  ;;  %v834_v46 = vpop.f32.mrb[1].mxu1 }
  0xfc   : > { %v1163_v47 = vadd.f32 %v2525_v40, %v706_v45  ;;  %v1195_v48 = vadd.f32 %v2525_v40, %v834_v46  ;;  %v2253_v49 = vpop.f32.mrb[2].mxu0  ;;  %v2285_v50 = vpop.f32.mrb[2].mxu1 }
  0xfd   : > { %vm1229_vm0 = vcmp.gt.f32.partialorder %v1165_v43, 0.0  ;;  %v1293_v51 = vmul.f32 0.2, %v1165_v43  ;;  %vm1261_vm1 = vcmp.gt.f32.partialorder %v1197_v44, 0.0  ;;  %v1325_v52 = vmul.f32 0.2, %v1197_v44 }
  0xfe   : > { %vm1227_vm2 = vcmp.gt.f32.partialorder %v1163_v47, 0.0  ;;  %v1291_v53 = vmul.f32 0.2, %v1163_v47  ;;  %vm1259_vm3 = vcmp.gt.f32.partialorder %v1195_v48, 0.0  ;;  %v1323_v54 = vmul.f32 0.2, %v1195_v48 }
  0xff   : > { %v1166_v55 = vadd.f32 %v2253_v49, %v2525_v40  ;;  %v1198_v56 = vadd.f32 %v2285_v50, %v2525_v40  ;;  %v709_v57 = vpop.f32.mrb[3].mxu0  ;;  %v837_v58 = vpop.f32.mrb[3].mxu1  ;;  %v1357_v59 = vsel %vm1229_vm0, %v1165_v43, %v1293_v51  ;;  %v1389_v60 = vsel %vm1261_vm1, %v1197_v44, %v1325_v52 }
 0x100   : > { %v1164_v61 = vadd.f32 %v2525_v40, %v709_v57  ;;  %v1196_v62 = vadd.f32 %v2525_v40, %v837_v58  ;;  %v1355_v3 = vsel %vm1227_vm2, %v1163_v47, %v1291_v53  ;;  %v1387_v4 = vsel %vm1259_vm3, %v1195_v48, %v1323_v54 }
 0x101   : > { %vm1230_vm4 = vcmp.gt.f32.partialorder %v1166_v55, 0.0  ;;  %v1294_v63 = vmul.f32 0.2, %v1166_v55  ;;  %vm1262_vm5 = vcmp.gt.f32.partialorder %v1198_v56, 0.0  ;;  %v1326_v0 = vmul.f32 0.2, %v1198_v56 }
 0x102   : > { %vm1228_vm6 = vcmp.gt.f32.partialorder %v1164_v61, 0.0  ;;  %v1292_v1 = vmul.f32 0.2, %v1164_v61  ;;  %vm1260_vm7 = vcmp.gt.f32.partialorder %v1196_v62, 0.0  ;;  %v1324_v2 = vmul.f32 0.2, %v1196_v62 }
 0x103   : > { %v1358_v5 = vsel %vm1230_vm4, %v1166_v55, %v1294_v63  ;;  %v1390_v6 = vsel %vm1262_vm5, %v1198_v56, %v1326_v0  ;;  %v2256_v7 = vpop.f32.mrb[4].mxu0  ;;  %v2288_v8 = vpop.f32.mrb[4].mxu1 }
 0x104   : > { %v2011_v9 = vpack.c.bf16 %v1358_v5, %v1357_v59  ;;  %v2091_v10 = vpack.c.bf16 %v1390_v6, %v1389_v60  ;;  %v1356_v11 = vsel %vm1228_vm6, %v1164_v61, %v1292_v1  ;;  %v1388_v12 = vsel %vm1260_vm7, %v1196_v62, %v1324_v2  ;;  %v722_v13 = vpop.f32.mrb[5].mxu0  ;;  %v850_v14 = vpop.f32.mrb[5].mxu1 }
 0x105   : > { %v2006_v15 = vpack.c.bf16 %v1356_v11, %v1355_v3  ;;  %v2086_v16 = vpack.c.bf16 %v1388_v12, %v1387_v4  ;;  %v1169_v17 = vadd.f32 %v2256_v7, %v2525_v40  ;;  %v1201_v18 = vadd.f32 %v2288_v8, %v2525_v40  ;;  %v2257_v19 = vpop.f32.mrb[6].mxu0  ;;  %v2289_v20 = vpop.f32.mrb[6].mxu1 }
 0x106   : > { %2163 = vst [vmem:[%s2542_s17 + $0x8] sm:$0xff] %v2011_v9   ;;  %2179 = vst [vmem:[%s2542_s17 + $0x88] sm:$0xff] %v2091_v10   ;;  %v1167_v21 = vadd.f32 %v2525_v40, %v722_v13  ;;  %v1199_v22 = vadd.f32 %v2525_v40, %v850_v14  ;;  %v1170_v23 = vadd.f32 %v2257_v19, %v2525_v40  ;;  %v725_v25 = vpop.f32.mrb[7].mxu0  ;;  %v853_v26 = vpop.f32.mrb[7].mxu1 }
 0x107   : > { %v1202_v24 = vadd.f32 %v2289_v20, %v2525_v40  ;;  %2007 = vst [vmem:[%s2542_s17] sm:$0xff] %v2006_v15   ;;  %2178 = vst [vmem:[%s2542_s17 + $0x80] sm:$0xff] %v2086_v16   ;;  %vm1233_vm8 = vcmp.gt.f32.partialorder %v1169_v17, 0.0  ;;  %v1297_v27 = vmul.f32 0.2, %v1169_v17  ;;  %vm1265_vm9 = vcmp.gt.f32.partialorder %v1201_v18, 0.0 }
 0x108   : > { %v1329_v28 = vmul.f32 0.2, %v1201_v18  ;;  %vm1231_vm10 = vcmp.gt.f32.partialorder %v1167_v21, 0.0  ;;  %v1295_v29 = vmul.f32 0.2, %v1167_v21  ;;  %vm1263_vm11 = vcmp.gt.f32.partialorder %v1199_v22, 0.0 }
 0x109   : > { %v1327_v30 = vmul.f32 0.2, %v1199_v22  ;;  %v1361_v31 = vsel %vm1233_vm8, %v1169_v17, %v1297_v27  ;;  %vm1234_vm12 = vcmp.gt.f32.partialorder %v1170_v23, 0.0  ;;  %v1298_v33 = vmul.f32 0.2, %v1170_v23 }
 0x10a   : > { %v1393_v32 = vsel %vm1265_vm9, %v1201_v18, %v1329_v28  ;;  %v1359_v34 = vsel %vm1231_vm10, %v1167_v21, %v1295_v29  ;;  %vm1266_vm13 = vcmp.gt.f32.partialorder %v1202_v24, 0.0  ;;  %v1330_v36 = vmul.f32 0.2, %v1202_v24  ;;  %v2260_v37 = vpop.f32.mrb[8].mxu0  ;;  %v2292_v38 = vpop.f32.mrb[8].mxu1 }
 0x10b   : > { %v1391_v35 = vsel %vm1263_vm11, %v1199_v22, %v1327_v30  ;;  %v1362_v39 = vsel %vm1234_vm12, %v1170_v23, %v1298_v33  ;;  %v1168_v41 = vadd.f32 %v2525_v40, %v725_v25  ;;  %v1200_v42 = vadd.f32 %v2525_v40, %v853_v26  ;;  %v738_v44 = vpop.f32.mrb[9].mxu0  ;;  %v866_v45 = vpop.f32.mrb[9].mxu1 }
 0x10c   : > { %v1173_v43 = vadd.f32 %v2260_v37, %v2525_v40  ;;  %v2021_v46 = vpack.c.bf16 %v1362_v39, %v1361_v31  ;;  %v1394_v47 = vsel %vm1266_vm13, %v1202_v24, %v1330_v36  ;;  %v1205_v48 = vadd.f32 %v2292_v38, %v2525_v40  ;;  %v2261_v50 = vpop.f32.mrb[10].mxu0  ;;  %v2293_v51 = vpop.f32.mrb[10].mxu1 }
 0x10d   : > { %v1171_v49 = vadd.f32 %v2525_v40, %v738_v44  ;;  %v2101_v52 = vpack.c.bf16 %v1394_v47, %v1393_v32  ;;  %vm1232_vm14 = vcmp.gt.f32.partialorder %v1168_v41, 0.0  ;;  %v1296_v53 = vmul.f32 0.2, %v1168_v41  ;;  %v741_v54 = vpop.f32.mrb[11].mxu0  ;;  %v869_v55 = vpop.f32.mrb[11].mxu1 }
 0x10e   : > { %vm1264_vm15 = vcmp.gt.f32.partialorder %v1200_v42, 0.0  ;;  %2165 = vst [vmem:[%s2542_s17 + $0x18] sm:$0xff] %v2021_v46   ;;  %v1328_v56 = vmul.f32 0.2, %v1200_v42  ;;  %vm1237_vm0 = vcmp.gt.f32.partialorder %v1173_v43, 0.0  ;;  %vm1269_vm1 = vcmp.gt.f32.partialorder %v1205_v48, 0.0 }
 0x10f   : > { %v1301_v57 = vmul.f32 0.2, %v1173_v43  ;;  %2181 = vst [vmem:[%s2542_s17 + $0x98] sm:$0xff] %v2101_v52   ;;  %v1360_v58 = vsel %vm1232_vm14, %v1168_v41, %v1296_v53  ;;  %v1333_v59 = vmul.f32 0.2, %v1205_v48  ;;  %vm1235_vm2 = vcmp.gt.f32.partialorder %v1171_v49, 0.0 }
 0x110   : > { %v1299_v60 = vmul.f32 0.2, %v1171_v49  ;;  %v2016_v61 = vpack.c.bf16 %v1360_v58, %v1359_v34  ;;  %v1392_v62 = vsel %vm1264_vm15, %v1200_v42, %v1328_v56  ;;  %v1203_v0 = vadd.f32 %v2525_v40, %v866_v45 }
 0x111   : > { %v1365_v63 = vsel %vm1237_vm0, %v1173_v43, %v1301_v57  ;;  %v2096_v1 = vpack.c.bf16 %v1392_v62, %v1391_v35  ;;  %v1397_v2 = vsel %vm1269_vm1, %v1205_v48, %v1333_v59  ;;  %v1174_v4 = vadd.f32 %v2261_v50, %v2525_v40 }
 0x112   : > { %v1363_v3 = vsel %vm1235_vm2, %v1171_v49, %v1299_v60  ;;  %2164 = vst [vmem:[%s2542_s17 + $0x10] sm:$0xff] %v2016_v61   ;;  %vm1267_vm3 = vcmp.gt.f32.partialorder %v1203_v0, 0.0  ;;  %v1331_v5 = vmul.f32 0.2, %v1203_v0  ;;  %v1206_v6 = vadd.f32 %v2293_v51, %v2525_v40  ;;  %v2264_v8 = vpop.f32.mrb[12].mxu0  ;;  %v2296_v9 = vpop.f32.mrb[12].mxu1 }
 0x113   : > { %v1172_v7 = vadd.f32 %v2525_v40, %v741_v54  ;;  %2180 = vst [vmem:[%s2542_s17 + $0x90] sm:$0xff] %v2096_v1   ;;  %vm1238_vm4 = vcmp.gt.f32.partialorder %v1174_v4, 0.0  ;;  %v1302_v10 = vmul.f32 0.2, %v1174_v4  ;;  %v1204_v11 = vadd.f32 %v2525_v40, %v869_v55  ;;  %v754_v13 = vpop.f32.mrb[13].mxu0  ;;  %v882_v14 = vpop.f32.mrb[13].mxu1 }
 0x114   : > { %v1177_v12 = vadd.f32 %v2264_v8, %v2525_v40  ;;  %v1395_v15 = vsel %vm1267_vm3, %v1203_v0, %v1331_v5  ;;  %vm1270_vm5 = vcmp.gt.f32.partialorder %v1206_v6, 0.0  ;;  %v1334_v16 = vmul.f32 0.2, %v1206_v6  ;;  %v2265_v17 = vpop.f32.mrb[14].mxu0  ;;  %v2297_v18 = vpop.f32.mrb[14].mxu1 }
 0x115   : > { %vm1236_vm6 = vcmp.gt.f32.partialorder %v1172_v7, 0.0  ;;  %v1366_v19 = vsel %vm1238_vm4, %v1174_v4, %v1302_v10  ;;  %v1300_v20 = vmul.f32 0.2, %v1172_v7  ;;  %vm1268_vm7 = vcmp.gt.f32.partialorder %v1204_v11, 0.0  ;;  %v757_v22 = vpop.f32.mrb[15].mxu0  ;;  %v885_v26 = vpop.f32.mrb[15].mxu1 }
 0x116   : > { %v1332_v21 = vmul.f32 0.2, %v1204_v11  ;;  %v2031_v23 = vpack.c.bf16 %v1366_v19, %v1365_v63  ;;  %v1398_v24 = vsel %vm1270_vm5, %v1206_v6, %v1334_v16  ;;  %vm1241_vm8 = vcmp.gt.f32.partialorder %v1177_v12, 0.0 }
 0x117   : > { %v1305_v25 = vmul.f32 0.2, %v1177_v12  ;;  %v2111_v27 = vpack.c.bf16 %v1398_v24, %v1397_v2  ;;  %v1364_v28 = vsel %vm1236_vm6, %v1172_v7, %v1300_v20  ;;  %v1209_v30 = vadd.f32 %v2296_v9, %v2525_v40 }
 0x118   : > { %v1396_v29 = vsel %vm1268_vm7, %v1204_v11, %v1332_v21  ;;  %2167 = vst [vmem:[%s2542_s17 + $0x28] sm:$0xff] %v2031_v23   ;;  %v2026_v31 = vpack.c.bf16 %v1364_v28, %v1363_v3  ;;  %v1175_v34 = vadd.f32 %v2525_v40, %v754_v13  ;;  %v1207_v36 = vadd.f32 %v2525_v40, %v882_v14 }
 0x119   : > { %v2106_v32 = vpack.c.bf16 %v1396_v29, %v1395_v15  ;;  %v1369_v33 = vsel %vm1241_vm8, %v1177_v12, %v1305_v25  ;;  %2183 = vst [vmem:[%s2542_s17 + $0xa8] sm:$0xff] %v2111_v27   ;;  %vm1273_vm9 = vcmp.gt.f32.partialorder %v1209_v30, 0.0  ;;  %v1337_v35 = vmul.f32 0.2, %v1209_v30 }
 0x11a   : > { %v1178_v37 = vadd.f32 %v2265_v17, %v2525_v40  ;;  %2166 = vst [vmem:[%s2542_s17 + $0x20] sm:$0xff] %v2026_v31   ;;  %vm1239_vm10 = vcmp.gt.f32.partialorder %v1175_v34, 0.0  ;;  %v1303_v38 = vmul.f32 0.2, %v1175_v34  ;;  %v1210_v39 = vadd.f32 %v2297_v18, %v2525_v40  ;;  %v2268_v42 = vpop.f32.mrb[16].mxu0  ;;  %v2300_v43 = vpop.f32.mrb[16].mxu1 }
 0x11b   : > { %2182 = vst [vmem:[%s2542_s17 + $0xa0] sm:$0xff] %v2106_v32   ;;  %v1176_v41 = vadd.f32 %v2525_v40, %v757_v22  ;;  %v1401_v44 = vsel %vm1273_vm9, %v1209_v30, %v1337_v35  ;;  %vm1271_vm11 = vcmp.gt.f32.partialorder %v1207_v36, 0.0  ;;  %v1335_v45 = vmul.f32 0.2, %v1207_v36  ;;  %v770_v46 = vpop.f32.mrb[17].mxu0  ;;  %v898_v47 = vpop.f32.mrb[17].mxu1 }
 0x11c   : > { %vm1242_vm12 = vcmp.gt.f32.partialorder %v1178_v37, 0.0  ;;  %v1367_v48 = vsel %vm1239_vm10, %v1175_v34, %v1303_v38  ;;  %v1306_v49 = vmul.f32 0.2, %v1178_v37  ;;  %vm1274_vm13 = vcmp.gt.f32.partialorder %v1210_v39, 0.0  ;;  %v2269_v51 = vpop.f32.mrb[18].mxu0  ;;  %v2301_v55 = vpop.f32.mrb[18].mxu1 }
 0x11d   : > { %v1338_v50 = vmul.f32 0.2, %v1210_v39  ;;  %v1399_v52 = vsel %vm1271_vm11, %v1207_v36, %v1335_v45  ;;  %vm1240_vm14 = vcmp.gt.f32.partialorder %v1176_v41, 0.0  ;;  %v1304_v53 = vmul.f32 0.2, %v1176_v41  ;;  %v773_v56 = vpop.f32.mrb[19].mxu0 }
 0x11e   : > { %v1208_v54 = vadd.f32 %v2525_v40, %v885_v26  ;;  %v1370_v57 = vsel %vm1242_vm12, %v1178_v37, %v1306_v49  ;;  %v1181_v59 = vadd.f32 %v2268_v42, %v2525_v40  ;;  %v1213_v60 = vadd.f32 %v2300_v43, %v2525_v40  ;;  %v901_v61 = vpop.f32.mrb[19].mxu1 }
 0x11f   : > { %v1402_v58 = vsel %vm1274_vm13, %v1210_v39, %v1338_v50  ;;  %v2041_v62 = vpack.c.bf16 %v1370_v57, %v1369_v33  ;;  %v1368_v0 = vsel %vm1240_vm14, %v1176_v41, %v1304_v53  ;;  %v1179_v5 = vadd.f32 %v2525_v40, %v770_v46 }
 0x120   : > { %v2121_v63 = vpack.c.bf16 %v1402_v58, %v1401_v44  ;;  %vm1272_vm15 = vcmp.gt.f32.partialorder %v1208_v54, 0.0  ;;  %v2036_v1 = vpack.c.bf16 %v1368_v0, %v1367_v48  ;;  %v1336_v2 = vmul.f32 0.2, %v1208_v54 }
 0x121   : > { %vm1245_vm0 = vcmp.gt.f32.partialorder %v1181_v59, 0.0  ;;  %v1309_v3 = vmul.f32 0.2, %v1181_v59  ;;  %2169 = vst [vmem:[%s2542_s17 + $0x38] sm:$0xff] %v2041_v62   ;;  %vm1277_vm1 = vcmp.gt.f32.partialorder %v1213_v60, 0.0  ;;  %v1211_v6 = vadd.f32 %v2525_v40, %v898_v47 }
 0x122   : > { %2185 = vst [vmem:[%s2542_s17 + $0xb8] sm:$0xff] %v2121_v63   ;;  %v1341_v4 = vmul.f32 0.2, %v1213_v60  ;;  %2168 = vst [vmem:[%s2542_s17 + $0x30] sm:$0xff] %v2036_v1   ;;  %v1400_v7 = vsel %vm1272_vm15, %v1208_v54, %v1336_v2  ;;  %v1182_v9 = vadd.f32 %v2269_v51, %v2525_v40  ;;  %v1214_v10 = vadd.f32 %v2301_v55, %v2525_v40  ;;  %v2272_v11 = vpop.f32.mrb[20].mxu0  ;;  %v2304_v12 = vpop.f32.mrb[20].mxu1 }
 0x123   : > { %v1373_v8 = vsel %vm1245_vm0, %v1181_v59, %v1309_v3  ;;  %v2116_v13 = vpack.c.bf16 %v1400_v7, %v1399_v52  ;;  %vm1243_vm2 = vcmp.gt.f32.partialorder %v1179_v5, 0.0  ;;  %v1307_v15 = vmul.f32 0.2, %v1179_v5  ;;  %v786_v16 = vpop.f32.mrb[21].mxu0  ;;  %v914_v17 = vpop.f32.mrb[21].mxu1 }
 0x124   : > { %v1405_v14 = vsel %vm1277_vm1, %v1213_v60, %v1341_v4  ;;  %vm1275_vm3 = vcmp.gt.f32.partialorder %v1211_v6, 0.0  ;;  %v1339_v18 = vmul.f32 0.2, %v1211_v6  ;;  %vm1246_vm4 = vcmp.gt.f32.partialorder %v1182_v9, 0.0  ;;  %v2273_v23 = vpop.f32.mrb[22].mxu0  ;;  %v2305_v24 = vpop.f32.mrb[22].mxu1 }
 0x125   : > { %v1310_v19 = vmul.f32 0.2, %v1182_v9  ;;  %2184 = vst [vmem:[%s2542_s17 + $0xb0] sm:$0xff] %v2116_v13   ;;  %v1371_v20 = vsel %vm1243_vm2, %v1179_v5, %v1307_v15  ;;  %vm1278_vm5 = vcmp.gt.f32.partialorder %v1214_v10, 0.0  ;;  %v1342_v21 = vmul.f32 0.2, %v1214_v10 }
 0x126   : > { %v1180_v22 = vadd.f32 %v2525_v40, %v773_v56  ;;  %v1403_v25 = vsel %vm1275_vm3, %v1211_v6, %v1339_v18  ;;  %v1212_v27 = vadd.f32 %v2525_v40, %v901_v61  ;;  %v1185_v28 = vadd.f32 %v2272_v11, %v2525_v40  ;;  %v789_v29 = vpop.f32.mrb[23].mxu0  ;;  %v917_v30 = vpop.f32.mrb[23].mxu1 }
 0x127   : > { %v1374_v26 = vsel %vm1246_vm4, %v1182_v9, %v1310_v19  ;;  %v1406_v32 = vsel %vm1278_vm5, %v1214_v10, %v1342_v21  ;;  %v1217_v38 = vadd.f32 %v2304_v12, %v2525_v40  ;;  %v1183_v39 = vadd.f32 %v2525_v40, %v786_v16 }
 0x128   : > { %v2051_v31 = vpack.c.bf16 %v1374_v26, %v1373_v8  ;;  %vm1244_vm6 = vcmp.gt.f32.partialorder %v1180_v22, 0.0  ;;  %v1308_v33 = vmul.f32 0.2, %v1180_v22  ;;  %v2131_v34 = vpack.c.bf16 %v1406_v32, %v1405_v14 }
 0x129   : > { %vm1276_vm7 = vcmp.gt.f32.partialorder %v1212_v27, 0.0  ;;  %v1340_v35 = vmul.f32 0.2, %v1212_v27  ;;  %vm1249_vm8 = vcmp.gt.f32.partialorder %v1185_v28, 0.0  ;;  %v1313_v37 = vmul.f32 0.2, %v1185_v28 }
 0x12a   : > { %2171 = vst [vmem:[%s2542_s17 + $0x48] sm:$0xff] %v2051_v31   ;;  %v1372_v36 = vsel %vm1244_vm6, %v1180_v22, %v1308_v33  ;;  %2187 = vst [vmem:[%s2542_s17 + $0xc8] sm:$0xff] %v2131_v34   ;;  %v1215_v43 = vadd.f32 %v2525_v40, %v914_v17  ;;  %v1186_v44 = vadd.f32 %v2273_v23, %v2525_v40  ;;  %v2276_v45 = vpop.f32.mrb[24].mxu0  ;;  %v2308_v46 = vpop.f32.mrb[24].mxu1  ;;  %vm1281_vm9 = vcmp.gt.f32.partialorder %v1217_v38, 0.0 }
 0x12b   : > { %v2046_v41 = vpack.c.bf16 %v1372_v36, %v1371_v20  ;;  %v1404_v42 = vsel %vm1276_vm7, %v1212_v27, %v1340_v35  ;;  %v1345_v48 = vmul.f32 0.2, %v1217_v38  ;;  %v802_v49 = vpop.f32.mrb[25].mxu0  ;;  %v930_v50 = vpop.f32.mrb[25].mxu1  ;;  %v1377_v51 = vsel %vm1249_vm8, %v1185_v28, %v1313_v37 }
 0x12c   : > { %v2126_v47 = vpack.c.bf16 %v1404_v42, %v1403_v25  ;;  %vm1247_vm10 = vcmp.gt.f32.partialorder %v1183_v39, 0.0  ;;  %v1311_v52 = vmul.f32 0.2, %v1183_v39  ;;  %v1343_v53 = vmul.f32 0.2, %v1215_v43  ;;  %v2277_v56 = vpop.f32.mrb[26].mxu0 }
 0x12d   : > { %2170 = vst [vmem:[%s2542_s17 + $0x40] sm:$0xff] %v2046_v41   ;;  %vm1279_vm11 = vcmp.gt.f32.partialorder %v1215_v43, 0.0  ;;  %vm1250_vm12 = vcmp.gt.f32.partialorder %v1186_v44, 0.0  ;;  %v1314_v54 = vmul.f32 0.2, %v1186_v44  ;;  %v1218_v55 = vadd.f32 %v2305_v24, %v2525_v40  ;;  %v2309_v57 = vpop.f32.mrb[26].mxu1 }
 0x12e   : > { %2186 = vst [vmem:[%s2542_s17 + $0xc0] sm:$0xff] %v2126_v47   ;;  %v1409_v58 = vsel %vm1281_vm9, %v1217_v38, %v1345_v48  ;;  %v1375_v59 = vsel %vm1247_vm10, %v1183_v39, %v1311_v52  ;;  %v1184_v60 = vadd.f32 %v2525_v40, %v789_v29  ;;  %v1216_v61 = vadd.f32 %v2525_v40, %v917_v30  ;;  %v805_v62 = vpop.f32.mrb[27].mxu0  ;;  %v933_v63 = vpop.f32.mrb[27].mxu1 }
 0x12f   : > { %v1378_v0 = vsel %vm1250_vm12, %v1186_v44, %v1314_v54  ;;  %vm1282_vm13 = vcmp.gt.f32.partialorder %v1218_v55, 0.0  ;;  %v1346_v1 = vmul.f32 0.2, %v1218_v55  ;;  %v1189_v2 = vadd.f32 %v2276_v45, %v2525_v40 }
 0x130   : > { %v2061_v3 = vpack.c.bf16 %v1378_v0, %v1377_v51  ;;  %vm1248_vm14 = vcmp.gt.f32.partialorder %v1184_v60, 0.0  ;;  %v1312_v4 = vmul.f32 0.2, %v1184_v60  ;;  %vm1280_vm15 = vcmp.gt.f32.partialorder %v1216_v61, 0.0 }
 0x131   : > { %v1410_v5 = vsel %vm1282_vm13, %v1218_v55, %v1346_v1  ;;  %v1344_v6 = vmul.f32 0.2, %v1216_v61  ;;  %vm1253_vm0 = vcmp.gt.f32.partialorder %v1189_v2, 0.0  ;;  %v1317_v7 = vmul.f32 0.2, %v1189_v2 }
 0x132   : > { %2173 = vst [vmem:[%s2542_s17 + $0x58] sm:$0xff] %v2061_v3   ;;  %v2141_v8 = vpack.c.bf16 %v1410_v5, %v1409_v58  ;;  %v1376_v9 = vsel %vm1248_vm14, %v1184_v60, %v1312_v4  ;;  %v1221_v10 = vadd.f32 %v2308_v46, %v2525_v40  ;;  %v1187_v11 = vadd.f32 %v2525_v40, %v802_v49  ;;  %v2280_v12 = vpop.f32.mrb[28].mxu0  ;;  %v2312_v13 = vpop.f32.mrb[28].mxu1 }
 0x133   : > { %v1407_v14 = vsel %vm1279_vm11, %v1215_v43, %v1343_v53  ;;  %v2056_v15 = vpack.c.bf16 %v1376_v9, %v1375_v59  ;;  %v1408_v16 = vsel %vm1280_vm15, %v1216_v61, %v1344_v6  ;;  %v1219_v17 = vadd.f32 %v2525_v40, %v930_v50  ;;  %v818_v18 = vpop.f32.mrb[29].mxu0  ;;  %v946_v19 = vpop.f32.mrb[29].mxu1 }
 0x134   : > { %2189 = vst [vmem:[%s2542_s17 + $0xd8] sm:$0xff] %v2141_v8   ;;  %v2136_v20 = vpack.c.bf16 %v1408_v16, %v1407_v14  ;;  %vm1285_vm1 = vcmp.gt.f32.partialorder %v1221_v10, 0.0  ;;  %v1349_v21 = vmul.f32 0.2, %v1221_v10  ;;  %vm1251_vm2 = vcmp.gt.f32.partialorder %v1187_v11, 0.0  ;;  %v2281_v22 = vpop.f32.mrb[30].mxu0 }
 0x135   : > { %v2313_v23 = vpop.f32.mrb[30].mxu1  ;;  %2172 = vst [vmem:[%s2542_s17 + $0x50] sm:$0xff] %v2056_v15   ;;  %v1381_v24 = vsel %vm1253_vm0, %v1189_v2, %v1317_v7  ;;  %v1315_v25 = vmul.f32 0.2, %v1187_v11  ;;  %vm1283_vm3 = vcmp.gt.f32.partialorder %v1219_v17, 0.0  ;;  %v1190_v26 = vadd.f32 %v2277_v56, %v2525_v40  ;;  %v821_v27 = vpop.f32.mrb[31].mxu0 }
 0x136   : > { %2188 = vst [vmem:[%s2542_s17 + $0xd0] sm:$0xff] %v2136_v20   ;;  %v1347_v28 = vmul.f32 0.2, %v1219_v17  ;;  %v1222_v29 = vadd.f32 %v2309_v57, %v2525_v40  ;;  %v1188_v30 = vadd.f32 %v2525_v40, %v805_v62  ;;  %v1220_v31 = vadd.f32 %v2525_v40, %v933_v63  ;;  %v949_v32 = vpop.f32.mrb[31].mxu1 }
 0x137   : > { %v1413_v33 = vsel %vm1285_vm1, %v1221_v10, %v1349_v21  ;;  %v1379_v34 = vsel %vm1251_vm2, %v1187_v11, %v1315_v25  ;;  %vm1254_vm4 = vcmp.gt.f32.partialorder %v1190_v26, 0.0  ;;  %v1318_v35 = vmul.f32 0.2, %v1190_v26 }
 0x138   : > { %vm1286_vm5 = vcmp.gt.f32.partialorder %v1222_v29, 0.0  ;;  %v1350_v36 = vmul.f32 0.2, %v1222_v29  ;;  %vm1252_vm6 = vcmp.gt.f32.partialorder %v1188_v30, 0.0  ;;  %v1316_v37 = vmul.f32 0.2, %v1188_v30 }
 0x139   : > { %v1382_v38 = vsel %vm1254_vm4, %v1190_v26, %v1318_v35  ;;  %vm1284_vm7 = vcmp.gt.f32.partialorder %v1220_v31, 0.0  ;;  %v1348_v39 = vmul.f32 0.2, %v1220_v31  ;;  %v1193_v41 = vadd.f32 %v2280_v12, %v2525_v40 }
 0x13a   : > { %v2071_v42 = vpack.c.bf16 %v1382_v38, %v1381_v24  ;;  %v1414_v43 = vsel %vm1286_vm5, %v1222_v29, %v1350_v36  ;;  %v1380_v44 = vsel %vm1252_vm6, %v1188_v30, %v1316_v37  ;;  %v1225_v45 = vadd.f32 %v2312_v13, %v2525_v40 }
 0x13b   : > { %v1411_v46 = vsel %vm1283_vm3, %v1219_v17, %v1347_v28  ;;  %v2151_v47 = vpack.c.bf16 %v1414_v43, %v1413_v33  ;;  %v2066_v48 = vpack.c.bf16 %v1380_v44, %v1379_v34  ;;  %v1412_v49 = vsel %vm1284_vm7, %v1220_v31, %v1348_v39 }
 0x13c   : > { %2175 = vst [vmem:[%s2542_s17 + $0x68] sm:$0xff] %v2071_v42   ;;  %v2146_v50 = vpack.c.bf16 %v1412_v49, %v1411_v46  ;;  %vm1257_vm8 = vcmp.gt.f32.partialorder %v1193_v41, 0.0  ;;  %v1321_v51 = vmul.f32 0.2, %v1193_v41  ;;  %v1353_v52 = vmul.f32 0.2, %v1225_v45 }
 0x13d   : > { %2191 = vst [vmem:[%s2542_s17 + $0xe8] sm:$0xff] %v2151_v47   ;;  %2174 = vst [vmem:[%s2542_s17 + $0x60] sm:$0xff] %v2066_v48   ;;  %v1191_v53 = vadd.f32 %v2525_v40, %v818_v18  ;;  %v1223_v54 = vadd.f32 %v2525_v40, %v946_v19  ;;  %v1194_v55 = vadd.f32 %v2281_v22, %v2525_v40  ;;  %vm1289_vm9 = vcmp.gt.f32.partialorder %v1225_v45, 0.0 }
 0x13e   : > { %v1226_v56 = vadd.f32 %v2313_v23, %v2525_v40  ;;  %2190 = vst [vmem:[%s2542_s17 + $0xe0] sm:$0xff] %v2146_v50   ;;  %v1192_v57 = vadd.f32 %v2525_v40, %v821_v27  ;;  %v1224_v58 = vadd.f32 %v2525_v40, %v949_v32  ;;  %v1385_v59 = vsel %vm1257_vm8, %v1193_v41, %v1321_v51 }
 0x13f   : > { %vm1255_vm10 = vcmp.gt.f32.partialorder %v1191_v53, 0.0  ;;  %v1319_v60 = vmul.f32 0.2, %v1191_v53  ;;  %v1351_v61 = vmul.f32 0.2, %v1223_v54  ;;  %vm1258_vm11 = vcmp.gt.f32.partialorder %v1194_v55, 0.0 }
 0x140   : > { %v1322_v62 = vmul.f32 0.2, %v1194_v55  ;;  %vm1290_vm12 = vcmp.gt.f32.partialorder %v1226_v56, 0.0  ;;  %v1354_v63 = vmul.f32 0.2, %v1226_v56  ;;  %v1417_v0 = vsel %vm1289_vm9, %v1225_v45, %v1353_v52 }
 0x141   : > { %vm1287_vm13 = vcmp.gt.f32.partialorder %v1223_v54, 0.0  ;;  %vm1256_vm14 = vcmp.gt.f32.partialorder %v1192_v57, 0.0  ;;  %v1320_v1 = vmul.f32 0.2, %v1192_v57  ;;  %vm1288_vm15 = vcmp.gt.f32.partialorder %v1224_v58, 0.0 }
 0x142   : > { %v1386_v2 = vsel %vm1258_vm11, %v1194_v55, %v1322_v62  ;;  %v1418_v3 = vsel %vm1290_vm12, %v1226_v56, %v1354_v63  ;;  %v1352_v40 = vmul.f32 0.2, %v1224_v58  ;;  %v1383_v4 = vsel %vm1255_vm10, %v1191_v53, %v1319_v60 }
 0x143   : > { %v2081_v5 = vpack.c.bf16 %v1386_v2, %v1385_v59  ;;  %v2161_v6 = vpack.c.bf16 %v1418_v3, %v1417_v0  ;;  %v1384_v7 = vsel %vm1256_vm14, %v1192_v57, %v1320_v1  ;;  %v1415_v8 = vsel %vm1287_vm13, %v1223_v54, %v1351_v61 }
 0x144   : > { %v2076_v9 = vpack.c.bf16 %v1384_v7, %v1383_v4  ;;  %v1416_v10 = vsel %vm1288_vm15, %v1224_v58, %v1352_v40 }
 0x145   : > { %2177 = vst [vmem:[%s2542_s17 + $0x78] sm:$0xff] %v2081_v5   ;;  %2193 = vst [vmem:[%s2542_s17 + $0xf8] sm:$0xff] %v2161_v6   ;;  %v2156_v11 = vpack.c.bf16 %v1416_v10, %v1415_v8 }
 0x146   : > { %2176 = vst [vmem:[%s2542_s17 + $0x70] sm:$0xff] %v2076_v9  }
 0x147   : > { %2192 = vst [vmem:[%s2542_s17 + $0xf0] sm:$0xff] %v2156_v11  }
 0x148 PF: > { %s13_s14 = sadd.s32 1, %s2416_s14   ;;  %s2652_s12 = smov %s2412_s13 }
 0x149   : > { %p10_p5 = scmp.ge.s32.totalorder %s13_s14, 6   ;;  %s2653_s13 = smov %s2655_s15 }
 0x14b   :  { %12 = sbr.rel (!%p10_p5) target bundleno = 2 (0x2), region = 73 }

// kernel: discriminator_forward.5
= control target key start
LH: loop header
LB: loop body
LE: loop exit
PB: predicated region body
PF: predicated region fallthrough
CT: control target
= control target key end

     0   :  { %v2218_v0 = vmov 0   ;;  %s2805_s1 = inlined_call_operand.vmem [shape: bf16[256,128], index: 1, kind: input, shape index: {}]   ;;  %s2806_s0 = inlined_call_operand.vmem [shape: bf16[512,256], index: 0, kind: input, shape index: {}]   ;;  %s2807_s2 = inlined_call_operand.vmem [shape: bf16[512,128], index: 2, kind: output, shape index: {0}]   ;;  %s2808_s3 = inlined_call_operand.vmem [shape: f32[1,2,128], index: 3, kind: output, shape index: {1}]  }
   0x1   :  { %658 = vmatprep.subr.bf16.mxu0 %v2218_v0  ;;  %v2106_v1 = vld [vmem:[%s2805_s1] sm:$0xff]   ;;  %2073 = vmatprep.subr.bf16.mxu1 %v2218_v0  ;;  %v2107_v2 = vld [vmem:[%s2805_s1 + $0x8] sm:$0xff]   ;;  %v2108_v3 = vld [vmem:[%s2805_s1 + $0x10] sm:$0xff]  }
   0x2   :  { %659 = vmatpush1.bf16.msra.mxu0 %v2106_v1  ;;  %2089 = vmatpush1.bf16.msra.mxu1 %v2106_v1  ;;  %v2109_v4 = vld [vmem:[%s2805_s1 + $0x18] sm:$0xff]   ;;  %v2110_v5 = vld [vmem:[%s2805_s1 + $0x20] sm:$0xff]   ;;  %v2111_v7 = vld [vmem:[%s2805_s1 + $0x28] sm:$0xff]  }
   0x3   :  { %660 = vmatprep.subr.bf16.mxu0 %v2218_v0  ;;  %2074 = vmatprep.subr.bf16.mxu1 %v2218_v0  ;;  %v2124_v6 = vld [vmem:[%s2806_s0 + $0x4] ss:$8 sps:$4 sm:$0xff]   ;;  %v2112_v8 = vld [vmem:[%s2805_s1 + $0x30] sm:$0xff]   ;;  %v2113_v9 = vld [vmem:[%s2805_s1 + $0x38] sm:$0xff]  }
   0x4   :  { %690 = vmatprep.mubr.bf16.mxu0 %v2124_v6  ;;  %v2148_v10 = vld [vmem:[%s2806_s0 + $0x104] ss:$8 sps:$4 sm:$0xff]   ;;  %v2116_v13 = vld [vmem:[%s2805_s1 + $0x50] sm:$0xff]   ;;  %v2117_v14 = vld [vmem:[%s2805_s1 + $0x58] sm:$0xff]  }
   0x5   :  { %818 = vmatprep.mubr.bf16.mxu1 %v2148_v10  ;;  %v2114_v11 = vld [vmem:[%s2805_s1 + $0x40] sm:$0xff]   ;;  %v2115_v12 = vld [vmem:[%s2805_s1 + $0x48] sm:$0xff]   ;;  %v2120_v17 = vld [vmem:[%s2805_s1 + $0x70] sm:$0xff]  }
   0x6   :  { %661 = vmatpush1.bf16.msra.mxu0 %v2107_v2  ;;  %2090 = vmatpush1.bf16.msra.mxu1 %v2107_v2  ;;  %v2118_v15 = vld [vmem:[%s2805_s1 + $0x60] sm:$0xff]   ;;  %v2119_v16 = vld [vmem:[%s2805_s1 + $0x68] sm:$0xff]   ;;  %v2121_v18 = vld [vmem:[%s2805_s1 + $0x78] sm:$0xff]  }
   0x7   :  { %662 = vmatprep.subr.bf16.mxu0 %v2218_v0  ;;  %2075 = vmatprep.subr.bf16.mxu1 %v2218_v0  ;;  %v2122_v19 = vld [vmem:[%s2806_s0] ss:$8 sps:$4 sm:$0xff]   ;;  %v2125_v21 = vld [vmem:[%s2806_s0 + $0x14] ss:$8 sps:$4 sm:$0xff]   ;;  %v2127_v23 = vld [vmem:[%s2806_s0 + $0x10] ss:$8 sps:$4 sm:$0xff]  }
   0x8   :  { %v2146_v20 = vld [vmem:[%s2806_s0 + $0x100] ss:$8 sps:$4 sm:$0xff]   ;;  %v2152_v22 = vld [vmem:[%s2806_s0 + $0x114] ss:$8 sps:$4 sm:$0xff]   ;;  %v2154_v24 = vld [vmem:[%s2806_s0 + $0x110] ss:$8 sps:$4 sm:$0xff]  }
   0x9   :  { %v2128_v25 = vld [vmem:[%s2806_s0 + $0x24] ss:$8 sps:$4 sm:$0xff]   ;;  %v2130_v27 = vld [vmem:[%s2806_s0 + $0x20] ss:$8 sps:$4 sm:$0xff]   ;;  %v2131_v29 = vld [vmem:[%s2806_s0 + $0x34] ss:$8 sps:$4 sm:$0xff]  }
   0xa   :  { %663 = vmatpush1.bf16.msra.mxu0 %v2108_v3  ;;  %2091 = vmatpush1.bf16.msra.mxu1 %v2108_v3  ;;  %v2158_v26 = vld [vmem:[%s2806_s0 + $0x124] ss:$8 sps:$4 sm:$0xff]   ;;  %v2160_v28 = vld [vmem:[%s2806_s0 + $0x120] ss:$8 sps:$4 sm:$0xff]   ;;  %v2164_v30 = vld [vmem:[%s2806_s0 + $0x134] ss:$8 sps:$4 sm:$0xff]  }
   0xb   :  { %664 = vmatprep.subr.bf16.mxu0 %v2218_v0  ;;  %2076 = vmatprep.subr.bf16.mxu1 %v2218_v0  ;;  %v2133_v31 = vld [vmem:[%s2806_s0 + $0x30] ss:$8 sps:$4 sm:$0xff]   ;;  %v2134_v33 = vld [vmem:[%s2806_s0 + $0x44] ss:$8 sps:$4 sm:$0xff]   ;;  %v2136_v35 = vld [vmem:[%s2806_s0 + $0x40] ss:$8 sps:$4 sm:$0xff]  }
   0xc   :  { %v2166_v32 = vld [vmem:[%s2806_s0 + $0x130] ss:$8 sps:$4 sm:$0xff]   ;;  %v2170_v34 = vld [vmem:[%s2806_s0 + $0x144] ss:$8 sps:$4 sm:$0xff]   ;;  %v2172_v36 = vld [vmem:[%s2806_s0 + $0x140] ss:$8 sps:$4 sm:$0xff]  }
   0xd   :  { %v2137_v37 = vld [vmem:[%s2806_s0 + $0x54] ss:$8 sps:$4 sm:$0xff]   ;;  %v2139_v39 = vld [vmem:[%s2806_s0 + $0x50] ss:$8 sps:$4 sm:$0xff]   ;;  %v2140_v41 = vld [vmem:[%s2806_s0 + $0x64] ss:$8 sps:$4 sm:$0xff]  }
   0xe   :  { %665 = vmatpush1.bf16.msra.mxu0 %v2109_v4  ;;  %2092 = vmatpush1.bf16.msra.mxu1 %v2109_v4  ;;  %v2176_v38 = vld [vmem:[%s2806_s0 + $0x154] ss:$8 sps:$4 sm:$0xff]   ;;  %v2178_v40 = vld [vmem:[%s2806_s0 + $0x150] ss:$8 sps:$4 sm:$0xff]   ;;  %v2182_v42 = vld [vmem:[%s2806_s0 + $0x164] ss:$8 sps:$4 sm:$0xff]  }
   0xf   :  { %666 = vmatprep.subr.bf16.mxu0 %v2218_v0  ;;  %2077 = vmatprep.subr.bf16.mxu1 %v2218_v0  ;;  %v2142_v43 = vld [vmem:[%s2806_s0 + $0x60] ss:$8 sps:$4 sm:$0xff]   ;;  %v2143_v45 = vld [vmem:[%s2806_s0 + $0x74] ss:$8 sps:$4 sm:$0xff]   ;;  %v2145_v47 = vld [vmem:[%s2806_s0 + $0x70] ss:$8 sps:$4 sm:$0xff]  }
  0x10   :  { %v2184_v44 = vld [vmem:[%s2806_s0 + $0x160] ss:$8 sps:$4 sm:$0xff]   ;;  %v2188_v46 = vld [vmem:[%s2806_s0 + $0x174] ss:$8 sps:$4 sm:$0xff]   ;;  %v2190_v48 = vld [vmem:[%s2806_s0 + $0x170] ss:$8 sps:$4 sm:$0xff]  }
  0x11   :  { %v2149_v49 = vld [vmem:[%s2806_s0 + $0x84] ss:$8 sps:$4 sm:$0xff]   ;;  %v2151_v51 = vld [vmem:[%s2806_s0 + $0x80] ss:$8 sps:$4 sm:$0xff]   ;;  %v2155_v53 = vld [vmem:[%s2806_s0 + $0x94] ss:$8 sps:$4 sm:$0xff]  }
  0x12   :  { %667 = vmatpush1.bf16.msra.mxu0 %v2110_v5  ;;  %2093 = vmatpush1.bf16.msra.mxu1 %v2110_v5  ;;  %v2194_v50 = vld [vmem:[%s2806_s0 + $0x184] ss:$8 sps:$4 sm:$0xff]   ;;  %v2196_v52 = vld [vmem:[%s2806_s0 + $0x180] ss:$8 sps:$4 sm:$0xff]   ;;  %v2197_v54 = vld [vmem:[%s2806_s0 + $0x194] ss:$8 sps:$4 sm:$0xff]  }
  0x13   :  { %668 = vmatprep.subr.bf16.mxu0 %v2218_v0  ;;  %2078 = vmatprep.subr.bf16.mxu1 %v2218_v0  ;;  %v2157_v55 = vld [vmem:[%s2806_s0 + $0x90] ss:$8 sps:$4 sm:$0xff]   ;;  %v2161_v57 = vld [vmem:[%s2806_s0 + $0xa4] ss:$8 sps:$4 sm:$0xff]   ;;  %v2163_v59 = vld [vmem:[%s2806_s0 + $0xa0] ss:$8 sps:$4 sm:$0xff]  }
  0x14   :  { %v2199_v56 = vld [vmem:[%s2806_s0 + $0x190] ss:$8 sps:$4 sm:$0xff]   ;;  %v2200_v58 = vld [vmem:[%s2806_s0 + $0x1a4] ss:$8 sps:$4 sm:$0xff]   ;;  %v2202_v60 = vld [vmem:[%s2806_s0 + $0x1a0] ss:$8 sps:$4 sm:$0xff]  }
  0x15   :  { %v2167_v61 = vld [vmem:[%s2806_s0 + $0xb4] ss:$8 sps:$4 sm:$0xff]   ;;  %v2169_v63 = vld [vmem:[%s2806_s0 + $0xb0] ss:$8 sps:$4 sm:$0xff]   ;;  %v2173_v1 = vld [vmem:[%s2806_s0 + $0xc4] ss:$8 sps:$4 sm:$0xff]  }
  0x16   :  { %669 = vmatpush1.bf16.msra.mxu0 %v2111_v7  ;;  %2094 = vmatpush1.bf16.msra.mxu1 %v2111_v7  ;;  %v2203_v62 = vld [vmem:[%s2806_s0 + $0x1b4] ss:$8 sps:$4 sm:$0xff]   ;;  %v2206_v2 = vld [vmem:[%s2806_s0 + $0x1c4] ss:$8 sps:$4 sm:$0xff]   ;;  %v2175_v3 = vld [vmem:[%s2806_s0 + $0xc0] ss:$8 sps:$4 sm:$0xff]  }
  0x17   :  { %670 = vmatprep.subr.bf16.mxu0 %v2218_v0  ;;  %2079 = vmatprep.subr.bf16.mxu1 %v2218_v0  ;;  %v2208_v4 = vld [vmem:[%s2806_s0 + $0x1c0] ss:$8 sps:$4 sm:$0xff]   ;;  %v2179_v5 = vld [vmem:[%s2806_s0 + $0xd4] ss:$8 sps:$4 sm:$0xff]   ;;  %v2181_v7 = vld [vmem:[%s2806_s0 + $0xd0] ss:$8 sps:$4 sm:$0xff]  }
  0x18   :  { %v2209_v6 = vld [vmem:[%s2806_s0 + $0x1d4] ss:$8 sps:$4 sm:$0xff]   ;;  %v2212_v10 = vld [vmem:[%s2806_s0 + $0x1e4] ss:$8 sps:$4 sm:$0xff]  }
  0x1a   :  { %671 = vmatpush1.bf16.msra.mxu0 %v2112_v8  ;;  %2095 = vmatpush1.bf16.msra.mxu1 %v2112_v8  ;;  %v2211_v8 = vld [vmem:[%s2806_s0 + $0x1d0] ss:$8 sps:$4 sm:$0xff]  }
  0x1b   :  { %672 = vmatprep.subr.bf16.mxu0 %v2218_v0  ;;  %2080 = vmatprep.subr.bf16.mxu1 %v2218_v0 }
  0x1e   :  { %673 = vmatpush1.bf16.msra.mxu0 %v2113_v9  ;;  %2096 = vmatpush1.bf16.msra.mxu1 %v2113_v9  ;;  %v2185_v9 = vld [vmem:[%s2806_s0 + $0xe4] ss:$8 sps:$4 sm:$0xff]  }
  0x1f   :  { %674 = vmatprep.subr.bf16.mxu0 %v2218_v0  ;;  %2081 = vmatprep.subr.bf16.mxu1 %v2218_v0 }
  0x22   :  { %675 = vmatpush1.bf16.msra.mxu0 %v2114_v11  ;;  %2097 = vmatpush1.bf16.msra.mxu1 %v2114_v11  ;;  %v2187_v11 = vld [vmem:[%s2806_s0 + $0xe0] ss:$8 sps:$4 sm:$0xff]  }
  0x23   :  { %676 = vmatprep.subr.bf16.mxu0 %v2218_v0  ;;  %2082 = vmatprep.subr.bf16.mxu1 %v2218_v0 }
  0x26   :  { %677 = vmatpush1.bf16.msra.mxu0 %v2115_v12  ;;  %2098 = vmatpush1.bf16.msra.mxu1 %v2115_v12  ;;  %v2214_v12 = vld [vmem:[%s2806_s0 + $0x1e0] ss:$8 sps:$4 sm:$0xff]  }
  0x27   :  { %678 = vmatprep.subr.bf16.mxu0 %v2218_v0  ;;  %2083 = vmatprep.subr.bf16.mxu1 %v2218_v0 }
  0x2a   :  { %679 = vmatpush1.bf16.msra.mxu0 %v2116_v13  ;;  %2099 = vmatpush1.bf16.msra.mxu1 %v2116_v13  ;;  %v2191_v13 = vld [vmem:[%s2806_s0 + $0xf4] ss:$8 sps:$4 sm:$0xff]  }
  0x2b   :  { %680 = vmatprep.subr.bf16.mxu0 %v2218_v0  ;;  %2084 = vmatprep.subr.bf16.mxu1 %v2218_v0 }
  0x2e   :  { %681 = vmatpush1.bf16.msra.mxu0 %v2117_v14  ;;  %2100 = vmatpush1.bf16.msra.mxu1 %v2117_v14  ;;  %v2215_v14 = vld [vmem:[%s2806_s0 + $0x1f4] ss:$8 sps:$4 sm:$0xff]  }
  0x2f   :  { %682 = vmatprep.subr.bf16.mxu0 %v2218_v0  ;;  %2085 = vmatprep.subr.bf16.mxu1 %v2218_v0 }
  0x32   :  { %683 = vmatpush1.bf16.msra.mxu0 %v2118_v15  ;;  %2101 = vmatpush1.bf16.msra.mxu1 %v2118_v15  ;;  %v2193_v15 = vld [vmem:[%s2806_s0 + $0xf0] ss:$8 sps:$4 sm:$0xff]  }
  0x33   :  { %684 = vmatprep.subr.bf16.mxu0 %v2218_v0  ;;  %2086 = vmatprep.subr.bf16.mxu1 %v2218_v0 }
  0x36   :  { %685 = vmatpush1.bf16.msra.mxu0 %v2119_v16  ;;  %2102 = vmatpush1.bf16.msra.mxu1 %v2119_v16  ;;  %v2217_v16 = vld [vmem:[%s2806_s0 + $0x1f0] ss:$8 sps:$4 sm:$0xff]  }
  0x37   :  { %686 = vmatprep.subr.bf16.mxu0 %v2218_v0  ;;  %2087 = vmatprep.subr.bf16.mxu1 %v2218_v0 }
  0x3a   :  { %687 = vmatpush1.bf16.msra.mxu0 %v2120_v17  ;;  %2103 = vmatpush1.bf16.msra.mxu1 %v2120_v17 }
  0x3b   :  { %688 = vmatprep.subr.bf16.mxu0 %v2218_v0  ;;  %2088 = vmatprep.subr.bf16.mxu1 %v2218_v0  ;;  %v2205_v0 = vld [vmem:[%s2806_s0 + $0x1b0] ss:$8 sps:$4 sm:$0xff]  }
  0x3e   :  { %689 = vmatpush1.bf16.msra.mxu0 %v2121_v18  ;;  %2104 = vmatpush1.bf16.msra.mxu1 %v2121_v18 }
  0x41   :  { %691 = vmatmul.mubr.bf16.vlgmr.msra.gmra.mrb[0].mxu0 %v2122_v19  ;;  %819 = vmatmul.mubr.bf16.vlgmr.msra.gmra.mrb[0].mxu1 %v2146_v20 }
  0x42   :  { %698 = vmatprep.mubr.bf16.mxu0 %v2125_v21  ;;  %826 = vmatprep.mubr.bf16.mxu1 %v2152_v22 }
  0x49   :  { %699 = vmatmul.mubr.bf16.gmra.mrb[4].mxu0 %v2127_v23  ;;  %827 = vmatmul.mubr.bf16.gmra.mrb[4].mxu1 %v2154_v24 }
  0x4a   :  { %706 = vmatprep.mubr.bf16.mxu0 %v2128_v25  ;;  %834 = vmatprep.mubr.bf16.mxu1 %v2158_v26 }
  0x51   :  { %707 = vmatmul.mubr.bf16.gmra.mrb[8].mxu0 %v2130_v27  ;;  %835 = vmatmul.mubr.bf16.gmra.mrb[8].mxu1 %v2160_v28 }
  0x52   :  { %714 = vmatprep.mubr.bf16.mxu0 %v2131_v29  ;;  %842 = vmatprep.mubr.bf16.mxu1 %v2164_v30 }
  0x59   :  { %715 = vmatmul.mubr.bf16.gmra.mrb[12].mxu0 %v2133_v31  ;;  %843 = vmatmul.mubr.bf16.gmra.mrb[12].mxu1 %v2166_v32 }
  0x5a   :  { %722 = vmatprep.mubr.bf16.mxu0 %v2134_v33  ;;  %850 = vmatprep.mubr.bf16.mxu1 %v2170_v34 }
  0x61   :  { %723 = vmatmul.mubr.bf16.gmra.mrb[16].mxu0 %v2136_v35  ;;  %851 = vmatmul.mubr.bf16.gmra.mrb[16].mxu1 %v2172_v36 }
  0x62   :  { %730 = vmatprep.mubr.bf16.mxu0 %v2137_v37  ;;  %858 = vmatprep.mubr.bf16.mxu1 %v2176_v38 }
  0x69   :  { %731 = vmatmul.mubr.bf16.gmra.mrb[20].mxu0 %v2139_v39  ;;  %859 = vmatmul.mubr.bf16.gmra.mrb[20].mxu1 %v2178_v40 }
  0x6a   :  { %738 = vmatprep.mubr.bf16.mxu0 %v2140_v41  ;;  %866 = vmatprep.mubr.bf16.mxu1 %v2182_v42 }
  0x71   :  { %739 = vmatmul.mubr.bf16.gmra.mrb[24].mxu0 %v2142_v43  ;;  %867 = vmatmul.mubr.bf16.gmra.mrb[24].mxu1 %v2184_v44 }
  0x72   :  { %746 = vmatprep.mubr.bf16.mxu0 %v2143_v45  ;;  %874 = vmatprep.mubr.bf16.mxu1 %v2188_v46 }
  0x79   :  { %747 = vmatmul.mubr.bf16.gmra.mrb[28].mxu0 %v2145_v47  ;;  %875 = vmatmul.mubr.bf16.gmra.mrb[28].mxu1 %v2190_v48 }
  0x7a   :  { %754 = vmatprep.mubr.bf16.mxu0 %v2149_v49  ;;  %882 = vmatprep.mubr.bf16.mxu1 %v2194_v50 }
  0x81   :  { %755 = vmatmul.mubr.bf16.gmra.mrb[32].mxu0 %v2151_v51  ;;  %883 = vmatmul.mubr.bf16.gmra.mrb[32].mxu1 %v2196_v52 }
  0x82   :  { %762 = vmatprep.mubr.bf16.mxu0 %v2155_v53  ;;  %890 = vmatprep.mubr.bf16.mxu1 %v2197_v54 }
  0x89   :  { %763 = vmatmul.mubr.bf16.gmra.mrb[36].mxu0 %v2157_v55  ;;  %891 = vmatmul.mubr.bf16.gmra.mrb[36].mxu1 %v2199_v56 }
  0x8a   :  { %770 = vmatprep.mubr.bf16.mxu0 %v2161_v57  ;;  %898 = vmatprep.mubr.bf16.mxu1 %v2200_v58 }
  0x91   :  { %771 = vmatmul.mubr.bf16.gmra.mrb[40].mxu0 %v2163_v59  ;;  %899 = vmatmul.mubr.bf16.gmra.mrb[40].mxu1 %v2202_v60 }
  0x92   :  { %778 = vmatprep.mubr.bf16.mxu0 %v2167_v61  ;;  %906 = vmatprep.mubr.bf16.mxu1 %v2203_v62 }
  0x99   :  { %779 = vmatmul.mubr.bf16.gmra.mrb[44].mxu0 %v2169_v63  ;;  %907 = vmatmul.mubr.bf16.gmra.mrb[44].mxu1 %v2205_v0 }
  0x9a   :  { %786 = vmatprep.mubr.bf16.mxu0 %v2173_v1  ;;  %914 = vmatprep.mubr.bf16.mxu1 %v2206_v2 }
  0xa1   :  { %787 = vmatmul.mubr.bf16.gmra.mrb[48].mxu0 %v2175_v3  ;;  %915 = vmatmul.mubr.bf16.gmra.mrb[48].mxu1 %v2208_v4 }
  0xa2   :  { %794 = vmatprep.mubr.bf16.mxu0 %v2179_v5  ;;  %922 = vmatprep.mubr.bf16.mxu1 %v2209_v6 }
  0xa9   :  { %795 = vmatmul.mubr.bf16.gmra.mrb[52].mxu0 %v2181_v7  ;;  %923 = vmatmul.mubr.bf16.gmra.mrb[52].mxu1 %v2211_v8 }
  0xaa   :  { %802 = vmatprep.mubr.bf16.mxu0 %v2185_v9  ;;  %930 = vmatprep.mubr.bf16.mxu1 %v2212_v10 }
  0xb1   :  { %803 = vmatmul.mubr.bf16.gmra.mrb[56].mxu0 %v2187_v11  ;;  %931 = vmatmul.mubr.bf16.gmra.mrb[56].mxu1 %v2214_v12 }
  0xb2   :  { %810 = vmatprep.mubr.bf16.mxu0 %v2191_v13  ;;  %938 = vmatprep.mubr.bf16.mxu1 %v2215_v14 }
  0xb9   :  { %811 = vmatmul.mubr.bf16.gmra.mrb[60].mxu0 %v2193_v15  ;;  %939 = vmatmul.mubr.bf16.gmra.mrb[60].mxu1 %v2217_v16 }
 0x114   :  { %v692_v17 = vpop.f32.mrb[0].mxu0  ;;  %v2511_v18 = vpop.f32.mrb[0].mxu1 }
 0x115   :  { %v694_v19 = vpop.f32.mrb[1].mxu0  ;;  %v822_v20 = vpop.f32.mrb[1].mxu1  ;;  %v1532_v21 = vmul.f32 %v692_v17, %v692_v17 }
 0x116   :  { %v695_v22 = vpop.f32.mrb[2].mxu0  ;;  %v2513_v23 = vpop.f32.mrb[2].mxu1 }
 0x117   :  { %v1885_v24 = vpack.c.bf16 %v695_v22, %v692_v17  ;;  %v1462_v25 = vadd.f32 %v695_v22, %v692_v17  ;;  %v1533_v26 = vmul.f32 %v695_v22, %v695_v22  ;;  %v697_v27 = vpop.f32.mrb[3].mxu0  ;;  %v1965_v28 = vpack.c.bf16 %v2513_v23, %v2511_v18  ;;  %v825_v29 = vpop.f32.mrb[3].mxu1 }
 0x119   :  { %1886 = vst [vmem:[%s2807_s2] sm:$0xff] %v1885_v24   ;;  %v1596_v30 = vadd.f32 %v1533_v26, %v1532_v21  ;;  %2057 = vst [vmem:[%s2807_s2 + $0x80] sm:$0xff] %v1965_v28  }
 0x11c   :  { %v700_v31 = vpop.f32.mrb[4].mxu0  ;;  %v2523_v32 = vpop.f32.mrb[4].mxu1 }
 0x11d   :  { %v1463_v33 = vadd.f32 %v1462_v25, %v700_v31  ;;  %v1534_v34 = vmul.f32 %v700_v31, %v700_v31  ;;  %v702_v35 = vpop.f32.mrb[5].mxu0  ;;  %v830_v36 = vpop.f32.mrb[5].mxu1 }
 0x11e   :  { %v703_v37 = vpop.f32.mrb[6].mxu0  ;;  %v2525_v38 = vpop.f32.mrb[6].mxu1 }
 0x11f   :  { %v1597_v39 = vadd.f32 %v1596_v30, %v1534_v34  ;;  %v1890_v40 = vpack.c.bf16 %v703_v37, %v700_v31  ;;  %v1464_v41 = vadd.f32 %v1463_v33, %v703_v37  ;;  %v1535_v42 = vmul.f32 %v703_v37, %v703_v37  ;;  %v705_v43 = vpop.f32.mrb[7].mxu0  ;;  %v833_v44 = vpop.f32.mrb[7].mxu1 }
 0x120   :  { %v1970_v45 = vpack.c.bf16 %v2525_v38, %v2523_v32 }
 0x121   :  { %2042 = vst [vmem:[%s2807_s2 + $0x8] sm:$0xff] %v1890_v40   ;;  %v1598_v46 = vadd.f32 %v1597_v39, %v1535_v42 }
 0x122   :  { %2058 = vst [vmem:[%s2807_s2 + $0x88] sm:$0xff] %v1970_v45  }
 0x124   :  { %v708_v47 = vpop.f32.mrb[8].mxu0  ;;  %v2535_v48 = vpop.f32.mrb[8].mxu1 }
 0x125   :  { %v1465_v49 = vadd.f32 %v1464_v41, %v708_v47  ;;  %v1536_v50 = vmul.f32 %v708_v47, %v708_v47  ;;  %v710_v51 = vpop.f32.mrb[9].mxu0  ;;  %v838_v52 = vpop.f32.mrb[9].mxu1 }
 0x126   :  { %v711_v53 = vpop.f32.mrb[10].mxu0  ;;  %v2537_v54 = vpop.f32.mrb[10].mxu1 }
 0x127   :  { %v1599_v55 = vadd.f32 %v1598_v46, %v1536_v50  ;;  %v1895_v56 = vpack.c.bf16 %v711_v53, %v708_v47  ;;  %v1466_v57 = vadd.f32 %v1465_v49, %v711_v53  ;;  %v1537_v58 = vmul.f32 %v711_v53, %v711_v53  ;;  %v713_v59 = vpop.f32.mrb[11].mxu0  ;;  %v841_v60 = vpop.f32.mrb[11].mxu1 }
 0x128   :  { %v1975_v61 = vpack.c.bf16 %v2537_v54, %v2535_v48 }
 0x129   :  { %2043 = vst [vmem:[%s2807_s2 + $0x10] sm:$0xff] %v1895_v56   ;;  %v1600_v62 = vadd.f32 %v1599_v55, %v1537_v58 }
 0x12a   :  { %2059 = vst [vmem:[%s2807_s2 + $0x90] sm:$0xff] %v1975_v61  }
 0x12c   :  { %v716_v63 = vpop.f32.mrb[12].mxu0  ;;  %v2547_v0 = vpop.f32.mrb[12].mxu1 }
 0x12d   :  { %v1467_v1 = vadd.f32 %v1466_v57, %v716_v63  ;;  %v1538_v2 = vmul.f32 %v716_v63, %v716_v63  ;;  %v718_v3 = vpop.f32.mrb[13].mxu0  ;;  %v846_v4 = vpop.f32.mrb[13].mxu1 }
 0x12e   :  { %v719_v5 = vpop.f32.mrb[14].mxu0  ;;  %v2549_v6 = vpop.f32.mrb[14].mxu1 }
 0x12f   :  { %v1601_v7 = vadd.f32 %v1600_v62, %v1538_v2  ;;  %v1900_v8 = vpack.c.bf16 %v719_v5, %v716_v63  ;;  %v1468_v9 = vadd.f32 %v1467_v1, %v719_v5  ;;  %v1539_v10 = vmul.f32 %v719_v5, %v719_v5  ;;  %v721_v11 = vpop.f32.mrb[15].mxu0  ;;  %v849_v12 = vpop.f32.mrb[15].mxu1 }
 0x130   :  { %v1980_v13 = vpack.c.bf16 %v2549_v6, %v2547_v0 }
 0x131   :  { %2044 = vst [vmem:[%s2807_s2 + $0x18] sm:$0xff] %v1900_v8   ;;  %v1602_v14 = vadd.f32 %v1601_v7, %v1539_v10 }
 0x132   :  { %2060 = vst [vmem:[%s2807_s2 + $0x98] sm:$0xff] %v1980_v13  }
 0x134   :  { %v724_v15 = vpop.f32.mrb[16].mxu0  ;;  %v2559_v16 = vpop.f32.mrb[16].mxu1 }
 0x135   :  { %v1469_v17 = vadd.f32 %v1468_v9, %v724_v15  ;;  %v1540_v19 = vmul.f32 %v724_v15, %v724_v15  ;;  %v726_v20 = vpop.f32.mrb[17].mxu0  ;;  %v854_v21 = vpop.f32.mrb[17].mxu1 }
 0x136   :  { %v727_v22 = vpop.f32.mrb[18].mxu0  ;;  %v2561_v24 = vpop.f32.mrb[18].mxu1 }
 0x137   :  { %v1603_v25 = vadd.f32 %v1602_v14, %v1540_v19  ;;  %v1905_v26 = vpack.c.bf16 %v727_v22, %v724_v15  ;;  %v1470_v27 = vadd.f32 %v1469_v17, %v727_v22  ;;  %v1541_v28 = vmul.f32 %v727_v22, %v727_v22  ;;  %v729_v29 = vpop.f32.mrb[19].mxu0  ;;  %v857_v30 = vpop.f32.mrb[19].mxu1 }
 0x138   :  { %v1985_v31 = vpack.c.bf16 %v2561_v24, %v2559_v16 }
 0x139   :  { %2045 = vst [vmem:[%s2807_s2 + $0x20] sm:$0xff] %v1905_v26   ;;  %v1604_v33 = vadd.f32 %v1603_v25, %v1541_v28 }
 0x13a   :  { %2061 = vst [vmem:[%s2807_s2 + $0xa0] sm:$0xff] %v1985_v31  }
 0x13c   :  { %v732_v34 = vpop.f32.mrb[20].mxu0  ;;  %v2571_v35 = vpop.f32.mrb[20].mxu1 }
 0x13d   :  { %v1471_v36 = vadd.f32 %v1470_v27, %v732_v34  ;;  %v1542_v37 = vmul.f32 %v732_v34, %v732_v34  ;;  %v734_v39 = vpop.f32.mrb[21].mxu0  ;;  %v862_v40 = vpop.f32.mrb[21].mxu1 }
 0x13e   :  { %v735_v41 = vpop.f32.mrb[22].mxu0  ;;  %v2573_v42 = vpop.f32.mrb[22].mxu1 }
 0x13f   :  { %v1605_v43 = vadd.f32 %v1604_v33, %v1542_v37  ;;  %v1910_v44 = vpack.c.bf16 %v735_v41, %v732_v34  ;;  %v1472_v45 = vadd.f32 %v1471_v36, %v735_v41  ;;  %v1543_v46 = vmul.f32 %v735_v41, %v735_v41  ;;  %v737_v47 = vpop.f32.mrb[23].mxu0  ;;  %v865_v49 = vpop.f32.mrb[23].mxu1 }
 0x140   :  { %v1990_v50 = vpack.c.bf16 %v2573_v42, %v2571_v35 }
 0x141   :  { %2046 = vst [vmem:[%s2807_s2 + $0x28] sm:$0xff] %v1910_v44   ;;  %v1606_v51 = vadd.f32 %v1605_v43, %v1543_v46 }
 0x142   :  { %2062 = vst [vmem:[%s2807_s2 + $0xa8] sm:$0xff] %v1990_v50  }
 0x144   :  { %v740_v52 = vpop.f32.mrb[24].mxu0  ;;  %v2583_v53 = vpop.f32.mrb[24].mxu1 }
 0x145   :  { %v1473_v55 = vadd.f32 %v1472_v45, %v740_v52  ;;  %v1544_v56 = vmul.f32 %v740_v52, %v740_v52  ;;  %v742_v57 = vpop.f32.mrb[25].mxu0  ;;  %v870_v58 = vpop.f32.mrb[25].mxu1 }
 0x146   :  { %v743_v59 = vpop.f32.mrb[26].mxu0  ;;  %v2585_v60 = vpop.f32.mrb[26].mxu1 }
 0x147   :  { %v1607_v61 = vadd.f32 %v1606_v51, %v1544_v56  ;;  %v1915_v62 = vpack.c.bf16 %v743_v59, %v740_v52  ;;  %v1474_v63 = vadd.f32 %v1473_v55, %v743_v59  ;;  %v1545_v1 = vmul.f32 %v743_v59, %v743_v59  ;;  %v745_v2 = vpop.f32.mrb[27].mxu0  ;;  %v873_v3 = vpop.f32.mrb[27].mxu1 }
 0x148   :  { %v1995_v4 = vpack.c.bf16 %v2585_v60, %v2583_v53 }
 0x149   :  { %2047 = vst [vmem:[%s2807_s2 + $0x30] sm:$0xff] %v1915_v62   ;;  %v1608_v5 = vadd.f32 %v1607_v61, %v1545_v1 }
 0x14a   :  { %2063 = vst [vmem:[%s2807_s2 + $0xb0] sm:$0xff] %v1995_v4  }
 0x14c   :  { %v748_v7 = vpop.f32.mrb[28].mxu0  ;;  %v2595_v8 = vpop.f32.mrb[28].mxu1 }
 0x14d   :  { %v1475_v9 = vadd.f32 %v1474_v63, %v748_v7  ;;  %v1546_v10 = vmul.f32 %v748_v7, %v748_v7  ;;  %v750_v11 = vpop.f32.mrb[29].mxu0  ;;  %v878_v12 = vpop.f32.mrb[29].mxu1 }
 0x14e   :  { %v751_v13 = vpop.f32.mrb[30].mxu0  ;;  %v2597_v14 = vpop.f32.mrb[30].mxu1 }
 0x14f   :  { %v1609_v15 = vadd.f32 %v1608_v5, %v1546_v10  ;;  %v1920_v17 = vpack.c.bf16 %v751_v13, %v748_v7  ;;  %v1476_v19 = vadd.f32 %v1475_v9, %v751_v13  ;;  %v1547_v20 = vmul.f32 %v751_v13, %v751_v13  ;;  %v753_v21 = vpop.f32.mrb[31].mxu0  ;;  %v881_v22 = vpop.f32.mrb[31].mxu1 }
 0x150   :  { %v2000_v25 = vpack.c.bf16 %v2597_v14, %v2595_v8 }
 0x151   :  { %2048 = vst [vmem:[%s2807_s2 + $0x38] sm:$0xff] %v1920_v17   ;;  %v1610_v26 = vadd.f32 %v1609_v15, %v1547_v20 }
 0x152   :  { %2064 = vst [vmem:[%s2807_s2 + $0xb8] sm:$0xff] %v2000_v25  }
 0x154   :  { %v756_v27 = vpop.f32.mrb[32].mxu0  ;;  %v2607_v28 = vpop.f32.mrb[32].mxu1 }
 0x155   :  { %v1477_v29 = vadd.f32 %v1476_v19, %v756_v27  ;;  %v1548_v30 = vmul.f32 %v756_v27, %v756_v27  ;;  %v758_v31 = vpop.f32.mrb[33].mxu0  ;;  %v886_v33 = vpop.f32.mrb[33].mxu1 }
 0x156   :  { %v759_v34 = vpop.f32.mrb[34].mxu0  ;;  %v2609_v36 = vpop.f32.mrb[34].mxu1 }
 0x157   :  { %v1611_v37 = vadd.f32 %v1610_v26, %v1548_v30  ;;  %v1925_v39 = vpack.c.bf16 %v759_v34, %v756_v27  ;;  %v1478_v40 = vadd.f32 %v1477_v29, %v759_v34  ;;  %v1549_v41 = vmul.f32 %v759_v34, %v759_v34  ;;  %v761_v43 = vpop.f32.mrb[35].mxu0  ;;  %v889_v44 = vpop.f32.mrb[35].mxu1 }
 0x158   :  { %v2005_v45 = vpack.c.bf16 %v2609_v36, %v2607_v28 }
 0x159   :  { %2049 = vst [vmem:[%s2807_s2 + $0x40] sm:$0xff] %v1925_v39   ;;  %v1612_v46 = vadd.f32 %v1611_v37, %v1549_v41 }
 0x15a   :  { %2065 = vst [vmem:[%s2807_s2 + $0xc0] sm:$0xff] %v2005_v45  }
 0x15c   :  { %v764_v47 = vpop.f32.mrb[36].mxu0  ;;  %v2619_v49 = vpop.f32.mrb[36].mxu1 }
 0x15d   :  { %v1479_v50 = vadd.f32 %v1478_v40, %v764_v47  ;;  %v1550_v51 = vmul.f32 %v764_v47, %v764_v47  ;;  %v766_v52 = vpop.f32.mrb[37].mxu0  ;;  %v894_v55 = vpop.f32.mrb[37].mxu1 }
 0x15e   :  { %v767_v56 = vpop.f32.mrb[38].mxu0  ;;  %v2621_v57 = vpop.f32.mrb[38].mxu1 }
 0x15f   :  { %v1613_v58 = vadd.f32 %v1612_v46, %v1550_v51  ;;  %v1930_v59 = vpack.c.bf16 %v767_v56, %v764_v47  ;;  %v1480_v61 = vadd.f32 %v1479_v50, %v767_v56  ;;  %v1551_v62 = vmul.f32 %v767_v56, %v767_v56  ;;  %v769_v63 = vpop.f32.mrb[39].mxu0  ;;  %v897_v1 = vpop.f32.mrb[39].mxu1 }
 0x160   :  { %v2010_v2 = vpack.c.bf16 %v2621_v57, %v2619_v49 }
 0x161   :  { %2050 = vst [vmem:[%s2807_s2 + $0x48] sm:$0xff] %v1930_v59   ;;  %v1614_v3 = vadd.f32 %v1613_v58, %v1551_v62 }
 0x162   :  { %2066 = vst [vmem:[%s2807_s2 + $0xc8] sm:$0xff] %v2010_v2  }
 0x164   :  { %v772_v4 = vpop.f32.mrb[40].mxu0  ;;  %v2631_v5 = vpop.f32.mrb[40].mxu1 }
 0x165   :  { %v1481_v7 = vadd.f32 %v1480_v61, %v772_v4  ;;  %v1552_v9 = vmul.f32 %v772_v4, %v772_v4  ;;  %v774_v10 = vpop.f32.mrb[41].mxu0  ;;  %v902_v11 = vpop.f32.mrb[41].mxu1 }
 0x166   :  { %v775_v12 = vpop.f32.mrb[42].mxu0  ;;  %v2633_v13 = vpop.f32.mrb[42].mxu1 }
 0x167   :  { %v1615_v15 = vadd.f32 %v1614_v3, %v1552_v9  ;;  %v1935_v17 = vpack.c.bf16 %v775_v12, %v772_v4  ;;  %v1482_v19 = vadd.f32 %v1481_v7, %v775_v12  ;;  %v1553_v20 = vmul.f32 %v775_v12, %v775_v12  ;;  %v777_v21 = vpop.f32.mrb[43].mxu0  ;;  %v905_v22 = vpop.f32.mrb[43].mxu1 }
 0x168   :  { %v2015_v25 = vpack.c.bf16 %v2633_v13, %v2631_v5 }
 0x169   :  { %2051 = vst [vmem:[%s2807_s2 + $0x50] sm:$0xff] %v1935_v17   ;;  %v1616_v26 = vadd.f32 %v1615_v15, %v1553_v20 }
 0x16a   :  { %2067 = vst [vmem:[%s2807_s2 + $0xd0] sm:$0xff] %v2015_v25  }
 0x16c   :  { %v780_v27 = vpop.f32.mrb[44].mxu0  ;;  %v2643_v29 = vpop.f32.mrb[44].mxu1 }
 0x16d   :  { %v1483_v30 = vadd.f32 %v1482_v19, %v780_v27  ;;  %v1554_v31 = vmul.f32 %v780_v27, %v780_v27  ;;  %v782_v33 = vpop.f32.mrb[45].mxu0  ;;  %v910_v34 = vpop.f32.mrb[45].mxu1 }
 0x16e   :  { %v783_v37 = vpop.f32.mrb[46].mxu0  ;;  %v2645_v39 = vpop.f32.mrb[46].mxu1 }
 0x16f   :  { %v1617_v40 = vadd.f32 %v1616_v26, %v1554_v31  ;;  %v1940_v41 = vpack.c.bf16 %v783_v37, %v780_v27  ;;  %v1484_v43 = vadd.f32 %v1483_v30, %v783_v37  ;;  %v1555_v44 = vmul.f32 %v783_v37, %v783_v37  ;;  %v785_v45 = vpop.f32.mrb[47].mxu0  ;;  %v913_v46 = vpop.f32.mrb[47].mxu1 }
 0x170   :  { %v2020_v47 = vpack.c.bf16 %v2645_v39, %v2643_v29 }
 0x171   :  { %2052 = vst [vmem:[%s2807_s2 + $0x58] sm:$0xff] %v1940_v41   ;;  %v1618_v50 = vadd.f32 %v1617_v40, %v1555_v44 }
 0x172   :  { %2068 = vst [vmem:[%s2807_s2 + $0xd8] sm:$0xff] %v2020_v47  }
 0x174   :  { %v788_v51 = vpop.f32.mrb[48].mxu0  ;;  %v2655_v52 = vpop.f32.mrb[48].mxu1 }
 0x175   :  { %v1485_v55 = vadd.f32 %v1484_v43, %v788_v51  ;;  %v1556_v56 = vmul.f32 %v788_v51, %v788_v51  ;;  %v790_v58 = vpop.f32.mrb[49].mxu0  ;;  %v918_v59 = vpop.f32.mrb[49].mxu1 }
 0x176   :  { %v791_v61 = vpop.f32.mrb[50].mxu0  ;;  %v2657_v62 = vpop.f32.mrb[50].mxu1 }
 0x177   :  { %v1619_v63 = vadd.f32 %v1618_v50, %v1556_v56  ;;  %v1945_v1 = vpack.c.bf16 %v791_v61, %v788_v51  ;;  %v1486_v2 = vadd.f32 %v1485_v55, %v791_v61  ;;  %v1557_v3 = vmul.f32 %v791_v61, %v791_v61  ;;  %v793_v4 = vpop.f32.mrb[51].mxu0  ;;  %v921_v7 = vpop.f32.mrb[51].mxu1 }
 0x178   :  { %v2025_v9 = vpack.c.bf16 %v2657_v62, %v2655_v52 }
 0x179   :  { %2053 = vst [vmem:[%s2807_s2 + $0x60] sm:$0xff] %v1945_v1   ;;  %v1620_v10 = vadd.f32 %v1619_v63, %v1557_v3 }
 0x17a   :  { %2069 = vst [vmem:[%s2807_s2 + $0xe0] sm:$0xff] %v2025_v9  }
 0x17c   :  { %v796_v11 = vpop.f32.mrb[52].mxu0  ;;  %v2667_v12 = vpop.f32.mrb[52].mxu1 }
 0x17d   :  { %v1487_v15 = vadd.f32 %v1486_v2, %v796_v11  ;;  %v1558_v17 = vmul.f32 %v796_v11, %v796_v11  ;;  %v798_v19 = vpop.f32.mrb[53].mxu0  ;;  %v926_v20 = vpop.f32.mrb[53].mxu1 }
 0x17e   :  { %v799_v21 = vpop.f32.mrb[54].mxu0  ;;  %v2669_v22 = vpop.f32.mrb[54].mxu1 }
 0x17f   :  { %v1621_v25 = vadd.f32 %v1620_v10, %v1558_v17  ;;  %v1950_v26 = vpack.c.bf16 %v799_v21, %v796_v11  ;;  %v1488_v27 = vadd.f32 %v1487_v15, %v799_v21  ;;  %v1559_v30 = vmul.f32 %v799_v21, %v799_v21  ;;  %v801_v31 = vpop.f32.mrb[55].mxu0  ;;  %v929_v33 = vpop.f32.mrb[55].mxu1 }
 0x180   :  { %v2030_v34 = vpack.c.bf16 %v2669_v22, %v2667_v12 }
 0x181   :  { %2054 = vst [vmem:[%s2807_s2 + $0x68] sm:$0xff] %v1950_v26   ;;  %v1622_v37 = vadd.f32 %v1621_v25, %v1559_v30  ;;  %v1564_v30 = vmul.f32 %v2511_v18, %v2511_v18 }
 0x182   :  { %2070 = vst [vmem:[%s2807_s2 + $0xe8] sm:$0xff] %v2030_v34   ;;  %v1565_v34 = vmul.f32 %v2513_v23, %v2513_v23 }
 0x184   :  { %v804_v40 = vpop.f32.mrb[56].mxu0  ;;  %v2679_v41 = vpop.f32.mrb[56].mxu1 }
 0x185   :  { %v1489_v43 = vadd.f32 %v1488_v27, %v804_v40  ;;  %v1560_v44 = vmul.f32 %v804_v40, %v804_v40  ;;  %v806_v45 = vpop.f32.mrb[57].mxu0  ;;  %v934_v46 = vpop.f32.mrb[57].mxu1 }
 0x186   :  { %v807_v47 = vpop.f32.mrb[58].mxu0  ;;  %v2681_v50 = vpop.f32.mrb[58].mxu1 }
 0x187   :  { %v1623_v51 = vadd.f32 %v1622_v37, %v1560_v44  ;;  %v1955_v55 = vpack.c.bf16 %v807_v47, %v804_v40  ;;  %v1490_v56 = vadd.f32 %v1489_v43, %v807_v47  ;;  %v1561_v58 = vmul.f32 %v807_v47, %v807_v47  ;;  %v809_v59 = vpop.f32.mrb[59].mxu0  ;;  %v937_v61 = vpop.f32.mrb[59].mxu1 }
 0x188   :  { %v2035_v63 = vpack.c.bf16 %v2681_v50, %v2679_v41  ;;  %v1566_v43 = vmul.f32 %v2523_v32, %v2523_v32 }
 0x189   :  { %2055 = vst [vmem:[%s2807_s2 + $0x70] sm:$0xff] %v1955_v55   ;;  %v1624_v1 = vadd.f32 %v1623_v51, %v1561_v58  ;;  %v1568_v51 = vmul.f32 %v2535_v48, %v2535_v48 }
 0x18a   :  { %2071 = vst [vmem:[%s2807_s2 + $0xf0] sm:$0xff] %v2035_v63  }
 0x18c   :  { %v812_v2 = vpop.f32.mrb[60].mxu0  ;;  %v2691_v3 = vpop.f32.mrb[60].mxu1 }
 0x18d   :  { %v1491_v4 = vadd.f32 %v1490_v56, %v812_v2  ;;  %v1562_v7 = vmul.f32 %v812_v2, %v812_v2  ;;  %v814_v9 = vpop.f32.mrb[61].mxu0  ;;  %v942_v10 = vpop.f32.mrb[61].mxu1 }
 0x18e   :  { %v815_v11 = vpop.f32.mrb[62].mxu0  ;;  %v2693_v15 = vpop.f32.mrb[62].mxu1 }
 0x18f   :  { %v1625_v17 = vadd.f32 %v1624_v1, %v1562_v7  ;;  %v1960_v19 = vpack.c.bf16 %v815_v11, %v812_v2  ;;  %v1492_v20 = vadd.f32 %v1491_v4, %v815_v11  ;;  %v1563_v21 = vmul.f32 %v815_v11, %v815_v11  ;;  %v817_v25 = vpop.f32.mrb[63].mxu0  ;;  %v945_v26 = vpop.f32.mrb[63].mxu1 }
 0x190   :  { %v2040_v27 = vpack.c.bf16 %v2693_v15, %v2691_v3 }
 0x191   :  { %2056 = vst [vmem:[%s2807_s2 + $0x78] sm:$0xff] %v1960_v19   ;;  %v1493_v31 = vadd.f32 %v1492_v20, %v2511_v18  ;;  %v1626_v33 = vadd.f32 %v1625_v17, %v1563_v21  ;;  %v1567_v18 = vmul.f32 %v2525_v38, %v2525_v38 }
 0x192   :  { %2072 = vst [vmem:[%s2807_s2 + $0xf8] sm:$0xff] %v2040_v27  }
 0x193   :  { %v1494_v37 = vadd.f32 %v1493_v31, %v2513_v23  ;;  %v1627_v40 = vadd.f32 %v1626_v33, %v1564_v30  ;;  %v1569_v23 = vmul.f32 %v2537_v54, %v2537_v54 }
 0x195   :  { %v1495_v44 = vadd.f32 %v1494_v37, %v2523_v32  ;;  %v1628_v45 = vadd.f32 %v1627_v40, %v1565_v34  ;;  %v1570_v32 = vmul.f32 %v2547_v0, %v2547_v0  ;;  %v1580_v37 = vmul.f32 %v2607_v28, %v2607_v28 }
 0x197   :  { %v1496_v46 = vadd.f32 %v1495_v44, %v2525_v38  ;;  %v1629_v47 = vadd.f32 %v1628_v45, %v1566_v43  ;;  %v1571_v38 = vmul.f32 %v2549_v6, %v2549_v6  ;;  %v1581_v44 = vmul.f32 %v2609_v36, %v2609_v36 }
 0x199   :  { %v1497_v55 = vadd.f32 %v1496_v46, %v2535_v48  ;;  %v1630_v56 = vadd.f32 %v1629_v47, %v1567_v18  ;;  %v1572_v48 = vmul.f32 %v2559_v16, %v2559_v16  ;;  %v1582_v18 = vmul.f32 %v2619_v49, %v2619_v49 }
 0x19a   :  { %v1583_v47 = vmul.f32 %v2621_v57, %v2621_v57 }
 0x19b   :  { %v1498_v58 = vadd.f32 %v1497_v55, %v2537_v54  ;;  %v1631_v59 = vadd.f32 %v1630_v56, %v1568_v51  ;;  %v1573_v54 = vmul.f32 %v2561_v24, %v2561_v24  ;;  %v1584_v55 = vmul.f32 %v2631_v5, %v2631_v5 }
 0x19d   :  { %v1499_v61 = vadd.f32 %v1498_v58, %v2547_v0  ;;  %v1632_v63 = vadd.f32 %v1631_v59, %v1569_v23  ;;  %v1574_v0 = vmul.f32 %v2571_v35, %v2571_v35  ;;  %v1585_v23 = vmul.f32 %v2633_v13, %v2633_v13 }
 0x19e   :  { %v1586_v59 = vmul.f32 %v2643_v29, %v2643_v29 }
 0x19f   :  { %v1500_v1 = vadd.f32 %v1499_v61, %v2549_v6  ;;  %v1633_v2 = vadd.f32 %v1632_v63, %v1570_v32  ;;  %v1575_v6 = vmul.f32 %v2573_v42, %v2573_v42  ;;  %v1587_v61 = vmul.f32 %v2645_v39, %v2645_v39 }
 0x1a1   :  { %v1634_v4 = vadd.f32 %v1633_v2, %v1571_v38  ;;  %v1501_v7 = vadd.f32 %v1500_v1, %v2559_v16  ;;  %v1576_v16 = vmul.f32 %v2583_v53, %v2583_v53  ;;  %v1588_v38 = vmul.f32 %v2655_v52, %v2655_v52 }
 0x1a2   :  { %v1589_v2 = vmul.f32 %v2657_v62, %v2657_v62 }
 0x1a3   :  { %v1502_v9 = vadd.f32 %v1501_v7, %v2561_v24  ;;  %v1635_v10 = vadd.f32 %v1634_v4, %v1572_v48  ;;  %v1577_v24 = vmul.f32 %v2585_v60, %v2585_v60  ;;  %v1590_v4 = vmul.f32 %v2667_v12, %v2667_v12 }
 0x1a5   :  { %v1503_v11 = vadd.f32 %v1502_v9, %v2571_v35  ;;  %v1636_v17 = vadd.f32 %v1635_v10, %v1573_v54  ;;  %v1578_v35 = vmul.f32 %v2595_v8, %v2595_v8  ;;  %v1591_v54 = vmul.f32 %v2669_v22, %v2669_v22 }
 0x1a6   :  { %v1592_v10 = vmul.f32 %v2679_v41, %v2679_v41 }
 0x1a7   :  { %v1504_v19 = vadd.f32 %v1503_v11, %v2573_v42  ;;  %v1637_v20 = vadd.f32 %v1636_v17, %v1574_v0  ;;  %v1579_v42 = vmul.f32 %v2597_v14, %v2597_v14  ;;  %v1593_v11 = vmul.f32 %v2681_v50, %v2681_v50 }
 0x1a9   :  { %v1505_v21 = vadd.f32 %v1504_v19, %v2583_v53  ;;  %v1638_v25 = vadd.f32 %v1637_v20, %v1575_v6  ;;  %v1595_v20 = vmul.f32 %v2693_v15, %v2693_v15 }
 0x1ab   :  { %v1506_v26 = vadd.f32 %v1505_v21, %v2585_v60  ;;  %v1639_v27 = vadd.f32 %v1638_v25, %v1576_v16 }
 0x1ad   :  { %v1507_v30 = vadd.f32 %v1506_v26, %v2595_v8  ;;  %v1640_v31 = vadd.f32 %v1639_v27, %v1577_v24 }
 0x1af   :  { %v1508_v33 = vadd.f32 %v1507_v30, %v2597_v14  ;;  %v1641_v34 = vadd.f32 %v1640_v31, %v1578_v35 }
 0x1b1   :  { %v1509_v53 = vadd.f32 %v1508_v33, %v2607_v28  ;;  %v1642_v40 = vadd.f32 %v1641_v34, %v1579_v42 }
 0x1b3   :  { %v1643_v60 = vadd.f32 %v1642_v40, %v1580_v37  ;;  %v1510_v43 = vadd.f32 %v1509_v53, %v2609_v36 }
 0x1b5   :  { %v1644_v8 = vadd.f32 %v1643_v60, %v1581_v44  ;;  %v1511_v45 = vadd.f32 %v1510_v43, %v2619_v49 }
 0x1b7   :  { %v1645_v14 = vadd.f32 %v1644_v8, %v1582_v18  ;;  %v1512_v46 = vadd.f32 %v1511_v45, %v2621_v57 }
 0x1b9   :  { %v1646_v28 = vadd.f32 %v1645_v14, %v1583_v47  ;;  %v1513_v51 = vadd.f32 %v1512_v46, %v2631_v5 }
 0x1bb   :  { %v1647_v56 = vadd.f32 %v1646_v28, %v1584_v55  ;;  %v1514_v36 = vadd.f32 %v1513_v51, %v2633_v13 }
 0x1bd   :  { %v1648_v58 = vadd.f32 %v1647_v56, %v1585_v23  ;;  %v1515_v49 = vadd.f32 %v1514_v36, %v2643_v29 }
 0x1bf   :  { %v1649_v32 = vadd.f32 %v1648_v58, %v1586_v59  ;;  %v1516_v57 = vadd.f32 %v1515_v49, %v2645_v39 }
 0x1c1   :  { %v1650_v63 = vadd.f32 %v1649_v32, %v1587_v61  ;;  %v1517_v5 = vadd.f32 %v1516_v57, %v2655_v52 }
 0x1c3   :  { %v1651_v1 = vadd.f32 %v1650_v63, %v1588_v38  ;;  %v1518_v13 = vadd.f32 %v1517_v5, %v2657_v62 }
 0x1c5   :  { %v1652_v48 = vadd.f32 %v1651_v1, %v1589_v2  ;;  %v1519_v29 = vadd.f32 %v1518_v13, %v2667_v12  ;;  %v1594_v12 = vmul.f32 %v2691_v3, %v2691_v3 }
 0x1c7   :  { %v1653_v7 = vadd.f32 %v1652_v48, %v1590_v4  ;;  %v1520_v39 = vadd.f32 %v1519_v29, %v2669_v22 }
 0x1c9   :  { %v1654_v9 = vadd.f32 %v1653_v7, %v1591_v54  ;;  %v1521_v52 = vadd.f32 %v1520_v39, %v2679_v41 }
 0x1cb   :  { %v1655_v0 = vadd.f32 %v1654_v9, %v1592_v10  ;;  %v1522_v62 = vadd.f32 %v1521_v52, %v2681_v50 }
 0x1cd   :  { %v1656_v17 = vadd.f32 %v1655_v0, %v1593_v11  ;;  %v1523_v6 = vadd.f32 %v1522_v62, %v2691_v3 }
 0x1cf   :  { %v1657_v19 = vadd.f32 %v1656_v17, %v1594_v12  ;;  %v1524_v22 = vadd.f32 %v1523_v6, %v2693_v15 }
 0x1d1   :  { %v1525_v16 = vrot.slane %v1524_v22, 4  ;;  %v1658_v41 = vadd.f32 %v1657_v19, %v1595_v20 }
 0x1d3   :  { %v1526_v21 = vadd.f32 %v1525_v16, %v1524_v22  ;;  %v1659_v25 = vrot.slane %v1658_v41, 4 }
 0x1d5   :  { %v1527_v24 = vrot.slane %v1526_v21, 2  ;;  %v1660_v26 = vadd.f32 %v1659_v25, %v1658_v41 }
 0x1d7   :  { %v1528_v27 = vadd.f32 %v1527_v24, %v1526_v21  ;;  %v1661_v50 = vrot.slane %v1660_v26, 2 }
 0x1d9   :  { %v1529_v35 = vrot.slane %v1528_v27, 1  ;;  %v1662_v30 = vadd.f32 %v1661_v50, %v1660_v26 }
 0x1db   :  { %v1530_v31 = vadd.f32 %v1529_v35, %v1528_v27  ;;  %v1663_v42 = vrot.slane %v1662_v30, 1 }
 0x1dd   :  { %1531 = vst [vmem:[%s2808_s3] sm:$0x1] %v1530_v31  ;;  %v1664_v3 = vadd.f32 %v1663_v42, %v1662_v30 }
 0x1df   :  { %1665 = vst [vmem:[%s2808_s3 + $0x1] sm:$0x1] %v1664_v3 }

// kernel: discriminator_forward.6
= control target key start
LH: loop header
LB: loop body
LE: loop exit
PB: predicated region body
PF: predicated region fallthrough
CT: control target
= control target key end

     0   :  { %s1484_s1 = inlined_call_operand.vmem [shape: bf16[512,128], index: 1, kind: input, shape index: {}]   ;;  %s1485_s0 = inlined_call_operand.vmem [shape: bf16[128,512], index: 0, kind: input, shape index: {}]   ;;  %s1486_s2 = inlined_call_operand.vmem [shape: bf16[128,128], index: 2, kind: output, shape index: {0}]   ;;  %s1487_s3 = inlined_call_operand.vmem [shape: f32[1,2,128], index: 3, kind: output, shape index: {1}]  }
   0x1   :  { %v1162_v0 = vld [vmem:[%s1484_s1 + $0x40] sm:$0xff]   ;;  %v1166_v4 = vld [vmem:[%s1484_s1 + $0x48] sm:$0xff]   ;;  %v1170_v8 = vld [vmem:[%s1484_s1 + $0x50] sm:$0xff]  }
   0x2   :  { %v1163_v1 = vld [vmem:[%s1484_s1 + $0xc0] sm:$0xff]   ;;  %1034 = vmatprep.subr.bf16.mxu0 %v1162_v0  ;;  %v1167_v5 = vld [vmem:[%s1484_s1 + $0xc8] sm:$0xff]   ;;  %v1171_v9 = vld [vmem:[%s1484_s1 + $0xd0] sm:$0xff]  }
   0x3   :  { %v1164_v2 = vld [vmem:[%s1484_s1] sm:$0xff]   ;;  %1098 = vmatprep.subr.bf16.mxu1 %v1163_v1  ;;  %v1168_v6 = vld [vmem:[%s1484_s1 + $0x8] sm:$0xff]   ;;  %v1172_v10 = vld [vmem:[%s1484_s1 + $0x10] sm:$0xff]  }
   0x4   :  { %v1165_v3 = vld [vmem:[%s1484_s1 + $0x80] sm:$0xff]   ;;  %1035 = vmatpush3.bf16.msra.mxu0 %v1164_v2  ;;  %v1169_v7 = vld [vmem:[%s1484_s1 + $0x88] sm:$0xff]   ;;  %v1173_v11 = vld [vmem:[%s1484_s1 + $0x90] sm:$0xff]  }
   0x5   :  { %1099 = vmatpush3.bf16.msra.mxu1 %v1165_v3  ;;  %1036 = vmatprep.subr.bf16.mxu0 %v1166_v4  ;;  %v1174_v12 = vld [vmem:[%s1484_s1 + $0x58] sm:$0xff]   ;;  %v1178_v16 = vld [vmem:[%s1484_s1 + $0x60] sm:$0xff]   ;;  %v1182_v20 = vld [vmem:[%s1484_s1 + $0x68] sm:$0xff]  }
   0x6   :  { %1100 = vmatprep.subr.bf16.mxu1 %v1167_v5  ;;  %v1175_v13 = vld [vmem:[%s1484_s1 + $0xd8] sm:$0xff]   ;;  %v1179_v17 = vld [vmem:[%s1484_s1 + $0xe0] sm:$0xff]   ;;  %v1183_v21 = vld [vmem:[%s1484_s1 + $0xe8] sm:$0xff]  }
   0x7   :  { %v1176_v14 = vld [vmem:[%s1484_s1 + $0x18] sm:$0xff]   ;;  %v1180_v18 = vld [vmem:[%s1484_s1 + $0x20] sm:$0xff]   ;;  %v1184_v22 = vld [vmem:[%s1484_s1 + $0x28] sm:$0xff]  }
   0x8   :  { %1037 = vmatpush3.bf16.msra.mxu0 %v1168_v6  ;;  %v1177_v15 = vld [vmem:[%s1484_s1 + $0x98] sm:$0xff]   ;;  %v1181_v19 = vld [vmem:[%s1484_s1 + $0xa0] sm:$0xff]   ;;  %v1185_v23 = vld [vmem:[%s1484_s1 + $0xa8] sm:$0xff]  }
   0x9   :  { %1101 = vmatpush3.bf16.msra.mxu1 %v1169_v7  ;;  %1038 = vmatprep.subr.bf16.mxu0 %v1170_v8  ;;  %v1186_v24 = vld [vmem:[%s1484_s1 + $0x70] sm:$0xff]   ;;  %v1190_v28 = vld [vmem:[%s1484_s1 + $0x78] sm:$0xff]  }
   0xa   :  { %1102 = vmatprep.subr.bf16.mxu1 %v1171_v9  ;;  %v1187_v25 = vld [vmem:[%s1484_s1 + $0xf0] sm:$0xff]   ;;  %v1191_v29 = vld [vmem:[%s1484_s1 + $0xf8] sm:$0xff]  }
   0xb   :  { %v1188_v26 = vld [vmem:[%s1484_s1 + $0x30] sm:$0xff]   ;;  %v1192_v30 = vld [vmem:[%s1484_s1 + $0x38] sm:$0xff]  }
   0xc   :  { %1039 = vmatpush3.bf16.msra.mxu0 %v1172_v10  ;;  %v1189_v27 = vld [vmem:[%s1484_s1 + $0xb0] sm:$0xff]   ;;  %v1193_v31 = vld [vmem:[%s1484_s1 + $0xb8] sm:$0xff]  }
   0xd   :  { %1103 = vmatpush3.bf16.msra.mxu1 %v1173_v11  ;;  %1040 = vmatprep.subr.bf16.mxu0 %v1174_v12  ;;  %v1194_v32 = vld [vmem:[%s1485_s0] ss:$16 sps:$4 sm:$0xff]   ;;  %v1196_v33 = vld [vmem:[%s1485_s0 + $0x4] ss:$16 sps:$4 sm:$0xff]   ;;  %v1197_v34 = vld [vmem:[%s1485_s0 + $0x8] ss:$16 sps:$4 sm:$0xff]  }
   0xe   :  { %1104 = vmatprep.subr.bf16.mxu1 %v1175_v13  ;;  %v1199_v35 = vld [vmem:[%s1485_s0 + $0xc] ss:$16 sps:$4 sm:$0xff]   ;;  %530 = vmatprep.mubr.bf16.mxu0 %v1196_v33  ;;  %v1200_v36 = vld [vmem:[%s1485_s0 + $0x24] ss:$16 sps:$4 sm:$0xff]   ;;  %v1204_v38 = vld [vmem:[%s1485_s0 + $0x20] ss:$16 sps:$4 sm:$0xff]  }
   0xf   :  { %627 = vmatprep.mubr.bf16.mxu1 %v1199_v35  ;;  %v1202_v37 = vld [vmem:[%s1485_s0 + $0x2c] ss:$16 sps:$4 sm:$0xff]   ;;  %v1205_v39 = vld [vmem:[%s1485_s0 + $0x28] ss:$16 sps:$4 sm:$0xff]   ;;  %v1206_v40 = vld [vmem:[%s1485_s0 + $0x44] ss:$16 sps:$4 sm:$0xff]  }
  0x10   :  { %1041 = vmatpush3.bf16.msra.mxu0 %v1176_v14  ;;  %v1208_v41 = vld [vmem:[%s1485_s0 + $0x4c] ss:$16 sps:$4 sm:$0xff]   ;;  %v1210_v42 = vld [vmem:[%s1485_s0 + $0x40] ss:$16 sps:$4 sm:$0xff]   ;;  %v1211_v43 = vld [vmem:[%s1485_s0 + $0x48] ss:$16 sps:$4 sm:$0xff]  }
  0x11   :  { %1105 = vmatpush3.bf16.msra.mxu1 %v1177_v15  ;;  %1042 = vmatprep.subr.bf16.mxu0 %v1178_v16  ;;  %v1212_v44 = vld [vmem:[%s1485_s0 + $0x64] ss:$16 sps:$4 sm:$0xff]   ;;  %v1214_v45 = vld [vmem:[%s1485_s0 + $0x6c] ss:$16 sps:$4 sm:$0xff]   ;;  %v1216_v46 = vld [vmem:[%s1485_s0 + $0x60] ss:$16 sps:$4 sm:$0xff]  }
  0x12   :  { %1106 = vmatprep.subr.bf16.mxu1 %v1179_v17  ;;  %v1217_v47 = vld [vmem:[%s1485_s0 + $0x68] ss:$16 sps:$4 sm:$0xff]   ;;  %v1218_v48 = vld [vmem:[%s1485_s0 + $0x84] ss:$16 sps:$4 sm:$0xff]   ;;  %v1220_v49 = vld [vmem:[%s1485_s0 + $0x8c] ss:$16 sps:$4 sm:$0xff]  }
  0x13   :  { %v1222_v50 = vld [vmem:[%s1485_s0 + $0x80] ss:$16 sps:$4 sm:$0xff]   ;;  %v1223_v51 = vld [vmem:[%s1485_s0 + $0x88] ss:$16 sps:$4 sm:$0xff]   ;;  %v1224_v52 = vld [vmem:[%s1485_s0 + $0xa4] ss:$16 sps:$4 sm:$0xff]  }
  0x14   :  { %1043 = vmatpush3.bf16.msra.mxu0 %v1180_v18  ;;  %v1226_v53 = vld [vmem:[%s1485_s0 + $0xac] ss:$16 sps:$4 sm:$0xff]   ;;  %v1228_v54 = vld [vmem:[%s1485_s0 + $0xa0] ss:$16 sps:$4 sm:$0xff]   ;;  %v1229_v55 = vld [vmem:[%s1485_s0 + $0xa8] ss:$16 sps:$4 sm:$0xff]  }
  0x15   :  { %1107 = vmatpush3.bf16.msra.mxu1 %v1181_v19  ;;  %1044 = vmatprep.subr.bf16.mxu0 %v1182_v20  ;;  %v1230_v56 = vld [vmem:[%s1485_s0 + $0xc4] ss:$16 sps:$4 sm:$0xff]   ;;  %v1232_v57 = vld [vmem:[%s1485_s0 + $0xcc] ss:$16 sps:$4 sm:$0xff]   ;;  %v1234_v58 = vld [vmem:[%s1485_s0 + $0xc0] ss:$16 sps:$4 sm:$0xff]  }
  0x16   :  { %1108 = vmatprep.subr.bf16.mxu1 %v1183_v21  ;;  %v1235_v59 = vld [vmem:[%s1485_s0 + $0xc8] ss:$16 sps:$4 sm:$0xff]   ;;  %v1236_v60 = vld [vmem:[%s1485_s0 + $0xe4] ss:$16 sps:$4 sm:$0xff]   ;;  %v1238_v61 = vld [vmem:[%s1485_s0 + $0xec] ss:$16 sps:$4 sm:$0xff]  }
  0x17   :  { %v1240_v62 = vld [vmem:[%s1485_s0 + $0xe0] ss:$16 sps:$4 sm:$0xff]   ;;  %v1241_v63 = vld [vmem:[%s1485_s0 + $0xe8] ss:$16 sps:$4 sm:$0xff]  }
  0x18   :  { %1045 = vmatpush3.bf16.msra.mxu0 %v1184_v22 }
  0x19   :  { %1109 = vmatpush3.bf16.msra.mxu1 %v1185_v23  ;;  %1046 = vmatprep.subr.bf16.mxu0 %v1186_v24 }
  0x1a   :  { %1110 = vmatprep.subr.bf16.mxu1 %v1187_v25 }
  0x1c   :  { %1047 = vmatpush3.bf16.msra.mxu0 %v1188_v26 }
  0x1d   :  { %1111 = vmatpush3.bf16.msra.mxu1 %v1189_v27  ;;  %1048 = vmatprep.subr.bf16.mxu0 %v1190_v28 }
  0x1e   :  { %1112 = vmatprep.subr.bf16.mxu1 %v1191_v29 }
  0x20   :  { %1049 = vmatpush3.bf16.msra.mxu0 %v1192_v30 }
  0x21   :  { %1113 = vmatpush3.bf16.msra.mxu1 %v1193_v31 }
  0x23   :  { %531 = vmatmul.mubr.bf16.vlgmr.msra.gmra.mrb[0].mxu0 %v1194_v32 }
  0x24   :  { %628 = vmatmul.mubr.bf16.vlgmr.msra.gmra.mrb[0].mxu1 %v1197_v34  ;;  %538 = vmatprep.mubr.bf16.mxu0 %v1200_v36 }
  0x25   :  { %635 = vmatprep.mubr.bf16.mxu1 %v1202_v37 }
  0x2b   :  { %539 = vmatmul.mubr.bf16.gmra.mrb[4].mxu0 %v1204_v38 }
  0x2c   :  { %636 = vmatmul.mubr.bf16.gmra.mrb[4].mxu1 %v1205_v39  ;;  %546 = vmatprep.mubr.bf16.mxu0 %v1206_v40 }
  0x2d   :  { %643 = vmatprep.mubr.bf16.mxu1 %v1208_v41 }
  0x33   :  { %547 = vmatmul.mubr.bf16.gmra.mrb[8].mxu0 %v1210_v42 }
  0x34   :  { %644 = vmatmul.mubr.bf16.gmra.mrb[8].mxu1 %v1211_v43  ;;  %554 = vmatprep.mubr.bf16.mxu0 %v1212_v44 }
  0x35   :  { %651 = vmatprep.mubr.bf16.mxu1 %v1214_v45 }
  0x3b   :  { %555 = vmatmul.mubr.bf16.gmra.mrb[12].mxu0 %v1216_v46 }
  0x3c   :  { %652 = vmatmul.mubr.bf16.gmra.mrb[12].mxu1 %v1217_v47  ;;  %562 = vmatprep.mubr.bf16.mxu0 %v1218_v48 }
  0x3d   :  { %659 = vmatprep.mubr.bf16.mxu1 %v1220_v49 }
  0x43   :  { %563 = vmatmul.mubr.bf16.gmra.mrb[16].mxu0 %v1222_v50 }
  0x44   :  { %660 = vmatmul.mubr.bf16.gmra.mrb[16].mxu1 %v1223_v51  ;;  %570 = vmatprep.mubr.bf16.mxu0 %v1224_v52 }
  0x45   :  { %667 = vmatprep.mubr.bf16.mxu1 %v1226_v53 }
  0x4b   :  { %571 = vmatmul.mubr.bf16.gmra.mrb[20].mxu0 %v1228_v54 }
  0x4c   :  { %668 = vmatmul.mubr.bf16.gmra.mrb[20].mxu1 %v1229_v55  ;;  %578 = vmatprep.mubr.bf16.mxu0 %v1230_v56 }
  0x4d   :  { %675 = vmatprep.mubr.bf16.mxu1 %v1232_v57 }
  0x53   :  { %579 = vmatmul.mubr.bf16.gmra.mrb[24].mxu0 %v1234_v58 }
  0x54   :  { %676 = vmatmul.mubr.bf16.gmra.mrb[24].mxu1 %v1235_v59  ;;  %586 = vmatprep.mubr.bf16.mxu0 %v1236_v60 }
  0x55   :  { %683 = vmatprep.mubr.bf16.mxu1 %v1238_v61 }
  0x5b   :  { %587 = vmatmul.mubr.bf16.gmra.mrb[28].mxu0 %v1240_v62 }
  0x5c   :  { %684 = vmatmul.mubr.bf16.gmra.mrb[28].mxu1 %v1241_v63 }
  0xf6   :  { %v1050_v0 = vpop.f32.mrb[0].mxu0 }
  0xf7   :  { %v1114_v1 = vpop.f32.mrb[0].mxu1  ;;  %v1051_v2 = vpop.f32.mrb[1].mxu0 }
  0xf8   :  { %v1052_v3 = vadd.f32 %v1051_v2, %v1050_v0  ;;  %v1115_v4 = vpop.f32.mrb[1].mxu1  ;;  %v1053_v5 = vpop.f32.mrb[2].mxu0 }
  0xf9   :  { %v1116_v6 = vadd.f32 %v1115_v4, %v1114_v1  ;;  %v1117_v7 = vpop.f32.mrb[2].mxu1  ;;  %v1054_v8 = vpop.f32.mrb[3].mxu0 }
  0xfa   :  { %v1055_v9 = vadd.f32 %v1054_v8, %v1053_v5  ;;  %v1118_v10 = vpop.f32.mrb[3].mxu1 }
  0xfb   :  { %v630_v11 = vadd.f32 %v1116_v6, %v1052_v3  ;;  %v1119_v12 = vadd.f32 %v1118_v10, %v1117_v7 }
  0xfd   :  { %v633_v13 = vadd.f32 %v1119_v12, %v1055_v9  ;;  %v845_v15 = vmul.f32 %v630_v11, %v630_v11 }
  0xfe   :  { %v1056_v14 = vpop.f32.mrb[4].mxu0 }
  0xff   :  { %v990_v16 = vpack.c.bf16 %v633_v13, %v630_v11  ;;  %v823_v17 = vadd.f32 %v633_v13, %v630_v11  ;;  %v846_v18 = vmul.f32 %v633_v13, %v633_v13  ;;  %v1120_v19 = vpop.f32.mrb[4].mxu1  ;;  %v1057_v20 = vpop.f32.mrb[5].mxu0 }
 0x100   :  { %v1058_v21 = vadd.f32 %v1057_v20, %v1056_v14  ;;  %v1121_v22 = vpop.f32.mrb[5].mxu1  ;;  %v1059_v23 = vpop.f32.mrb[6].mxu0 }
 0x101   :  { %991 = vst [vmem:[%s1486_s2] sm:$0xff] %v990_v16   ;;  %v861_v24 = vadd.f32 %v846_v18, %v845_v15  ;;  %v1122_v25 = vadd.f32 %v1121_v22, %v1120_v19  ;;  %v1123_v26 = vpop.f32.mrb[6].mxu1  ;;  %v1060_v27 = vpop.f32.mrb[7].mxu0 }
 0x102   :  { %v1061_v28 = vadd.f32 %v1060_v27, %v1059_v23  ;;  %v1124_v29 = vpop.f32.mrb[7].mxu1 }
 0x103   :  { %v638_v30 = vadd.f32 %v1122_v25, %v1058_v21  ;;  %v1125_v31 = vadd.f32 %v1124_v29, %v1123_v26 }
 0x105   :  { %v824_v32 = vadd.f32 %v823_v17, %v638_v30  ;;  %v847_v33 = vmul.f32 %v638_v30, %v638_v30  ;;  %v641_v34 = vadd.f32 %v1125_v31, %v1061_v28 }
 0x106   :  { %v1062_v35 = vpop.f32.mrb[8].mxu0 }
 0x107   :  { %v862_v36 = vadd.f32 %v861_v24, %v847_v33  ;;  %v995_v37 = vpack.c.bf16 %v641_v34, %v638_v30  ;;  %v825_v38 = vadd.f32 %v824_v32, %v641_v34  ;;  %v848_v39 = vmul.f32 %v641_v34, %v641_v34  ;;  %v1126_v40 = vpop.f32.mrb[8].mxu1  ;;  %v1063_v41 = vpop.f32.mrb[9].mxu0 }
 0x108   :  { %v1064_v42 = vadd.f32 %v1063_v41, %v1062_v35  ;;  %v1127_v43 = vpop.f32.mrb[9].mxu1  ;;  %v1065_v44 = vpop.f32.mrb[10].mxu0 }
 0x109   :  { %1027 = vst [vmem:[%s1486_s2 + $0x8] sm:$0xff] %v995_v37   ;;  %v863_v45 = vadd.f32 %v862_v36, %v848_v39  ;;  %v1128_v46 = vadd.f32 %v1127_v43, %v1126_v40  ;;  %v1129_v47 = vpop.f32.mrb[10].mxu1  ;;  %v1066_v48 = vpop.f32.mrb[11].mxu0 }
 0x10a   :  { %v1067_v49 = vadd.f32 %v1066_v48, %v1065_v44  ;;  %v1130_v50 = vpop.f32.mrb[11].mxu1 }
 0x10b   :  { %v646_v51 = vadd.f32 %v1128_v46, %v1064_v42  ;;  %v1131_v52 = vadd.f32 %v1130_v50, %v1129_v47 }
 0x10d   :  { %v826_v53 = vadd.f32 %v825_v38, %v646_v51  ;;  %v849_v54 = vmul.f32 %v646_v51, %v646_v51  ;;  %v649_v55 = vadd.f32 %v1131_v52, %v1067_v49 }
 0x10e   :  { %v1068_v56 = vpop.f32.mrb[12].mxu0 }
 0x10f   :  { %v864_v57 = vadd.f32 %v863_v45, %v849_v54  ;;  %v1000_v58 = vpack.c.bf16 %v649_v55, %v646_v51  ;;  %v827_v59 = vadd.f32 %v826_v53, %v649_v55  ;;  %v850_v60 = vmul.f32 %v649_v55, %v649_v55  ;;  %v1132_v61 = vpop.f32.mrb[12].mxu1  ;;  %v1069_v62 = vpop.f32.mrb[13].mxu0 }
 0x110   :  { %v1070_v63 = vadd.f32 %v1069_v62, %v1068_v56  ;;  %v1133_v0 = vpop.f32.mrb[13].mxu1  ;;  %v1071_v1 = vpop.f32.mrb[14].mxu0 }
 0x111   :  { %1028 = vst [vmem:[%s1486_s2 + $0x10] sm:$0xff] %v1000_v58   ;;  %v865_v2 = vadd.f32 %v864_v57, %v850_v60  ;;  %v1134_v3 = vadd.f32 %v1133_v0, %v1132_v61  ;;  %v1135_v4 = vpop.f32.mrb[14].mxu1  ;;  %v1072_v5 = vpop.f32.mrb[15].mxu0 }
 0x112   :  { %v1073_v6 = vadd.f32 %v1072_v5, %v1071_v1  ;;  %v1136_v7 = vpop.f32.mrb[15].mxu1 }
 0x113   :  { %v654_v8 = vadd.f32 %v1134_v3, %v1070_v63  ;;  %v1137_v9 = vadd.f32 %v1136_v7, %v1135_v4 }
 0x115   :  { %v828_v10 = vadd.f32 %v827_v59, %v654_v8  ;;  %v851_v11 = vmul.f32 %v654_v8, %v654_v8  ;;  %v657_v12 = vadd.f32 %v1137_v9, %v1073_v6 }
 0x116   :  { %v1074_v13 = vpop.f32.mrb[16].mxu0 }
 0x117   :  { %v866_v14 = vadd.f32 %v865_v2, %v851_v11  ;;  %v1005_v15 = vpack.c.bf16 %v657_v12, %v654_v8  ;;  %v829_v16 = vadd.f32 %v828_v10, %v657_v12  ;;  %v852_v17 = vmul.f32 %v657_v12, %v657_v12  ;;  %v1138_v18 = vpop.f32.mrb[16].mxu1  ;;  %v1075_v19 = vpop.f32.mrb[17].mxu0 }
 0x118   :  { %v1076_v20 = vadd.f32 %v1075_v19, %v1074_v13  ;;  %v1139_v21 = vpop.f32.mrb[17].mxu1  ;;  %v1077_v22 = vpop.f32.mrb[18].mxu0 }
 0x119   :  { %1029 = vst [vmem:[%s1486_s2 + $0x18] sm:$0xff] %v1005_v15   ;;  %v867_v23 = vadd.f32 %v866_v14, %v852_v17  ;;  %v1140_v24 = vadd.f32 %v1139_v21, %v1138_v18  ;;  %v1141_v25 = vpop.f32.mrb[18].mxu1  ;;  %v1078_v26 = vpop.f32.mrb[19].mxu0 }
 0x11a   :  { %v1079_v27 = vadd.f32 %v1078_v26, %v1077_v22  ;;  %v1142_v28 = vpop.f32.mrb[19].mxu1 }
 0x11b   :  { %v662_v29 = vadd.f32 %v1140_v24, %v1076_v20  ;;  %v1143_v30 = vadd.f32 %v1142_v28, %v1141_v25 }
 0x11d   :  { %v830_v31 = vadd.f32 %v829_v16, %v662_v29  ;;  %v853_v32 = vmul.f32 %v662_v29, %v662_v29  ;;  %v665_v33 = vadd.f32 %v1143_v30, %v1079_v27 }
 0x11e   :  { %v1080_v34 = vpop.f32.mrb[20].mxu0 }
 0x11f   :  { %v868_v35 = vadd.f32 %v867_v23, %v853_v32  ;;  %v1010_v36 = vpack.c.bf16 %v665_v33, %v662_v29  ;;  %v831_v37 = vadd.f32 %v830_v31, %v665_v33  ;;  %v854_v38 = vmul.f32 %v665_v33, %v665_v33  ;;  %v1144_v39 = vpop.f32.mrb[20].mxu1  ;;  %v1081_v40 = vpop.f32.mrb[21].mxu0 }
 0x120   :  { %v1082_v41 = vadd.f32 %v1081_v40, %v1080_v34  ;;  %v1145_v42 = vpop.f32.mrb[21].mxu1  ;;  %v1083_v43 = vpop.f32.mrb[22].mxu0 }
 0x121   :  { %1030 = vst [vmem:[%s1486_s2 + $0x20] sm:$0xff] %v1010_v36   ;;  %v869_v44 = vadd.f32 %v868_v35, %v854_v38  ;;  %v1146_v45 = vadd.f32 %v1145_v42, %v1144_v39  ;;  %v1147_v46 = vpop.f32.mrb[22].mxu1  ;;  %v1084_v47 = vpop.f32.mrb[23].mxu0 }
 0x122   :  { %v1085_v48 = vadd.f32 %v1084_v47, %v1083_v43  ;;  %v1148_v49 = vpop.f32.mrb[23].mxu1 }
 0x123   :  { %v670_v50 = vadd.f32 %v1146_v45, %v1082_v41  ;;  %v1149_v51 = vadd.f32 %v1148_v49, %v1147_v46 }
 0x125   :  { %v832_v52 = vadd.f32 %v831_v37, %v670_v50  ;;  %v855_v53 = vmul.f32 %v670_v50, %v670_v50  ;;  %v673_v54 = vadd.f32 %v1149_v51, %v1085_v48 }
 0x126   :  { %v1086_v55 = vpop.f32.mrb[24].mxu0 }
 0x127   :  { %v870_v56 = vadd.f32 %v869_v44, %v855_v53  ;;  %v1015_v57 = vpack.c.bf16 %v673_v54, %v670_v50  ;;  %v833_v58 = vadd.f32 %v832_v52, %v673_v54  ;;  %v856_v59 = vmul.f32 %v673_v54, %v673_v54  ;;  %v1150_v60 = vpop.f32.mrb[24].mxu1  ;;  %v1087_v61 = vpop.f32.mrb[25].mxu0 }
 0x128   :  { %v1088_v62 = vadd.f32 %v1087_v61, %v1086_v55  ;;  %v1151_v63 = vpop.f32.mrb[25].mxu1  ;;  %v1089_v0 = vpop.f32.mrb[26].mxu0 }
 0x129   :  { %1031 = vst [vmem:[%s1486_s2 + $0x28] sm:$0xff] %v1015_v57   ;;  %v871_v1 = vadd.f32 %v870_v56, %v856_v59  ;;  %v1152_v2 = vadd.f32 %v1151_v63, %v1150_v60  ;;  %v1153_v3 = vpop.f32.mrb[26].mxu1  ;;  %v1090_v4 = vpop.f32.mrb[27].mxu0 }
 0x12a   :  { %v1091_v5 = vadd.f32 %v1090_v4, %v1089_v0  ;;  %v1154_v6 = vpop.f32.mrb[27].mxu1 }
 0x12b   :  { %v678_v7 = vadd.f32 %v1152_v2, %v1088_v62  ;;  %v1155_v8 = vadd.f32 %v1154_v6, %v1153_v3 }
 0x12d   :  { %v834_v9 = vadd.f32 %v833_v58, %v678_v7  ;;  %v857_v10 = vmul.f32 %v678_v7, %v678_v7  ;;  %v681_v11 = vadd.f32 %v1155_v8, %v1091_v5 }
 0x12e   :  { %v1092_v12 = vpop.f32.mrb[28].mxu0 }
 0x12f   :  { %v872_v13 = vadd.f32 %v871_v1, %v857_v10  ;;  %v1020_v14 = vpack.c.bf16 %v681_v11, %v678_v7  ;;  %v835_v15 = vadd.f32 %v834_v9, %v681_v11  ;;  %v858_v16 = vmul.f32 %v681_v11, %v681_v11  ;;  %v1156_v17 = vpop.f32.mrb[28].mxu1  ;;  %v1093_v18 = vpop.f32.mrb[29].mxu0 }
 0x130   :  { %v1094_v19 = vadd.f32 %v1093_v18, %v1092_v12  ;;  %v1157_v20 = vpop.f32.mrb[29].mxu1  ;;  %v1095_v21 = vpop.f32.mrb[30].mxu0 }
 0x131   :  { %1032 = vst [vmem:[%s1486_s2 + $0x30] sm:$0xff] %v1020_v14   ;;  %v873_v22 = vadd.f32 %v872_v13, %v858_v16  ;;  %v1158_v23 = vadd.f32 %v1157_v20, %v1156_v17  ;;  %v1159_v24 = vpop.f32.mrb[30].mxu1  ;;  %v1096_v25 = vpop.f32.mrb[31].mxu0 }
 0x132   :  { %v1097_v26 = vadd.f32 %v1096_v25, %v1095_v21  ;;  %v1160_v27 = vpop.f32.mrb[31].mxu1 }
 0x133   :  { %v686_v28 = vadd.f32 %v1158_v23, %v1094_v19  ;;  %v1161_v29 = vadd.f32 %v1160_v27, %v1159_v24 }
 0x135   :  { %v836_v30 = vadd.f32 %v835_v15, %v686_v28  ;;  %v859_v31 = vmul.f32 %v686_v28, %v686_v28  ;;  %v689_v32 = vadd.f32 %v1161_v29, %v1097_v26 }
 0x137   :  { %v874_v33 = vadd.f32 %v873_v22, %v859_v31  ;;  %v1025_v34 = vpack.c.bf16 %v689_v32, %v686_v28  ;;  %v837_v35 = vadd.f32 %v836_v30, %v689_v32  ;;  %v860_v36 = vmul.f32 %v689_v32, %v689_v32 }
 0x139   :  { %1033 = vst [vmem:[%s1486_s2 + $0x38] sm:$0xff] %v1025_v34   ;;  %v838_v37 = vrot.slane %v837_v35, 4  ;;  %v875_v38 = vadd.f32 %v874_v33, %v860_v36 }
 0x13b   :  { %v839_v39 = vadd.f32 %v838_v37, %v837_v35  ;;  %v876_v40 = vrot.slane %v875_v38, 4 }
 0x13d   :  { %v840_v41 = vrot.slane %v839_v39, 2  ;;  %v877_v42 = vadd.f32 %v876_v40, %v875_v38 }
 0x13f   :  { %v841_v43 = vadd.f32 %v840_v41, %v839_v39  ;;  %v878_v44 = vrot.slane %v877_v42, 2 }
 0x141   :  { %v842_v45 = vrot.slane %v841_v43, 1  ;;  %v879_v46 = vadd.f32 %v878_v44, %v877_v42 }
 0x143   :  { %v843_v47 = vadd.f32 %v842_v45, %v841_v43  ;;  %v880_v48 = vrot.slane %v879_v46, 1 }
 0x145   :  { %844 = vst [vmem:[%s1487_s3] sm:$0x1] %v843_v47  ;;  %v881_v49 = vadd.f32 %v880_v48, %v879_v46 }
 0x147   :  { %882 = vst [vmem:[%s1487_s3 + $0x1] sm:$0x1] %v881_v49 }

// kernel: discriminator_forward.7
= control target key start
LH: loop header
LB: loop body
LE: loop exit
PB: predicated region body
PF: predicated region fallthrough
CT: control target
= control target key end

     0   :  { %s1346_s1 = inlined_call_operand.vmem [shape: bf16[896,128], index: 1, kind: input, shape index: {}]   ;;  %s1347_s0 = inlined_call_operand.vmem [shape: bf16[32,896], index: 0, kind: input, shape index: {}]   ;;  %s1348_s2 = inlined_call_operand.vmem [shape: bf16[32,128], index: 2, kind: output, shape index: {0}]   ;;  %s1349_s3 = inlined_call_operand.vmem [shape: f32[1,2,128], index: 3, kind: output, shape index: {1}]  }
   0x1   :  { %v1028_v0 = vld [vmem:[%s1346_s1 + $0x40] sm:$0xff]   ;;  %v1032_v4 = vld [vmem:[%s1346_s1 + $0x48] sm:$0xff]   ;;  %v1036_v8 = vld [vmem:[%s1346_s1 + $0x50] sm:$0xff]  }
   0x2   :  { %v1029_v1 = vld [vmem:[%s1346_s1 + $0xc0] sm:$0xff]   ;;  %914 = vmatprep.subr.bf16.mxu0 %v1028_v0  ;;  %v1033_v5 = vld [vmem:[%s1346_s1 + $0xc8] sm:$0xff]   ;;  %v1037_v9 = vld [vmem:[%s1346_s1 + $0xd0] sm:$0xff]  }
   0x3   :  { %v1030_v2 = vld [vmem:[%s1346_s1] sm:$0xff]   ;;  %942 = vmatprep.subr.bf16.mxu1 %v1029_v1  ;;  %v1034_v6 = vld [vmem:[%s1346_s1 + $0x8] sm:$0xff]   ;;  %v1038_v10 = vld [vmem:[%s1346_s1 + $0x10] sm:$0xff]  }
   0x4   :  { %v1031_v3 = vld [vmem:[%s1346_s1 + $0x80] sm:$0xff]   ;;  %915 = vmatpush3.bf16.msra.mxu0 %v1030_v2  ;;  %v1035_v7 = vld [vmem:[%s1346_s1 + $0x88] sm:$0xff]   ;;  %v1039_v11 = vld [vmem:[%s1346_s1 + $0x90] sm:$0xff]  }
   0x5   :  { %943 = vmatpush3.bf16.msra.mxu1 %v1031_v3  ;;  %916 = vmatprep.subr.bf16.mxu0 %v1032_v4  ;;  %v1040_v12 = vld [vmem:[%s1346_s1 + $0x58] sm:$0xff]   ;;  %v1044_v16 = vld [vmem:[%s1346_s1 + $0x60] sm:$0xff]   ;;  %v1048_v20 = vld [vmem:[%s1346_s1 + $0x68] sm:$0xff]  }
   0x6   :  { %944 = vmatprep.subr.bf16.mxu1 %v1033_v5  ;;  %v1041_v13 = vld [vmem:[%s1346_s1 + $0xd8] sm:$0xff]   ;;  %v1045_v17 = vld [vmem:[%s1346_s1 + $0xe0] sm:$0xff]   ;;  %v1049_v21 = vld [vmem:[%s1346_s1 + $0xe8] sm:$0xff]  }
   0x7   :  { %v1042_v14 = vld [vmem:[%s1346_s1 + $0x18] sm:$0xff]   ;;  %v1046_v18 = vld [vmem:[%s1346_s1 + $0x20] sm:$0xff]   ;;  %v1050_v22 = vld [vmem:[%s1346_s1 + $0x28] sm:$0xff]  }
   0x8   :  { %917 = vmatpush3.bf16.msra.mxu0 %v1034_v6  ;;  %v1043_v15 = vld [vmem:[%s1346_s1 + $0x98] sm:$0xff]   ;;  %v1047_v19 = vld [vmem:[%s1346_s1 + $0xa0] sm:$0xff]   ;;  %v1051_v23 = vld [vmem:[%s1346_s1 + $0xa8] sm:$0xff]  }
   0x9   :  { %945 = vmatpush3.bf16.msra.mxu1 %v1035_v7  ;;  %918 = vmatprep.subr.bf16.mxu0 %v1036_v8  ;;  %v1052_v24 = vld [vmem:[%s1346_s1 + $0x70] sm:$0xff]   ;;  %v1056_v28 = vld [vmem:[%s1346_s1 + $0x78] sm:$0xff]   ;;  %v1062_v33 = vld [vmem:[%s1347_s0 + $0x4] ss:$28 sps:$4 sm:$0xff]  }
   0xa   :  { %946 = vmatprep.subr.bf16.mxu1 %v1037_v9  ;;  %v1053_v25 = vld [vmem:[%s1346_s1 + $0xf0] sm:$0xff]   ;;  %v1057_v29 = vld [vmem:[%s1346_s1 + $0xf8] sm:$0xff]   ;;  %v1063_v34 = vld [vmem:[%s1347_s0 + $0x8] ss:$28 sps:$4 sm:$0xff]   ;;  %594 = vmatprep.mubr.bf16.mxu0 %v1062_v33 }
   0xb   :  { %v1054_v26 = vld [vmem:[%s1346_s1 + $0x30] sm:$0xff]   ;;  %v1058_v30 = vld [vmem:[%s1346_s1 + $0x38] sm:$0xff]   ;;  %v1065_v35 = vld [vmem:[%s1347_s0 + $0xc] ss:$28 sps:$4 sm:$0xff]  }
   0xc   :  { %919 = vmatpush3.bf16.msra.mxu0 %v1038_v10  ;;  %v1055_v27 = vld [vmem:[%s1346_s1 + $0xb0] sm:$0xff]   ;;  %v1059_v31 = vld [vmem:[%s1346_s1 + $0xb8] sm:$0xff]   ;;  %v1066_v36 = vld [vmem:[%s1346_s1 + $0x140] sm:$0xff]   ;;  %643 = vmatprep.mubr.bf16.mxu1 %v1065_v35 }
   0xd   :  { %947 = vmatpush3.bf16.msra.mxu1 %v1039_v11  ;;  %920 = vmatprep.subr.bf16.mxu0 %v1040_v12  ;;  %v1060_v32 = vld [vmem:[%s1347_s0] ss:$28 sps:$4 sm:$0xff]   ;;  %v1068_v38 = vld [vmem:[%s1346_s1 + $0x148] sm:$0xff]   ;;  %v1071_v41 = vld [vmem:[%s1346_s1 + $0x150] sm:$0xff]  }
   0xe   :  { %948 = vmatprep.subr.bf16.mxu1 %v1041_v13  ;;  %v1067_v37 = vld [vmem:[%s1346_s1 + $0x100] sm:$0xff]   ;;  %v1070_v40 = vld [vmem:[%s1346_s1 + $0x108] sm:$0xff]   ;;  %v1073_v43 = vld [vmem:[%s1346_s1 + $0x110] sm:$0xff]  }
   0xf   :  { %v1069_v39 = vld [vmem:[%s1346_s1 + $0x180] sm:$0xff]   ;;  %v1072_v42 = vld [vmem:[%s1346_s1 + $0x188] sm:$0xff]   ;;  %v1074_v44 = vld [vmem:[%s1346_s1 + $0x158] sm:$0xff]  }
  0x10   :  { %921 = vmatpush3.bf16.msra.mxu0 %v1042_v14  ;;  %v1075_v45 = vld [vmem:[%s1346_s1 + $0x190] sm:$0xff]   ;;  %v1076_v46 = vld [vmem:[%s1346_s1 + $0x118] sm:$0xff]   ;;  %v1077_v47 = vld [vmem:[%s1346_s1 + $0x160] sm:$0xff]  }
  0x11   :  { %949 = vmatpush3.bf16.msra.mxu1 %v1043_v15  ;;  %922 = vmatprep.subr.bf16.mxu0 %v1044_v16  ;;  %v1078_v48 = vld [vmem:[%s1346_s1 + $0x198] sm:$0xff]   ;;  %v1079_v49 = vld [vmem:[%s1346_s1 + $0x120] sm:$0xff]   ;;  %v1084_v52 = vld [vmem:[%s1346_s1 + $0x168] sm:$0xff]  }
  0x12   :  { %950 = vmatprep.subr.bf16.mxu1 %v1045_v17  ;;  %v1080_v50 = vld [vmem:[%s1347_s0 + $0x3c] ss:$28 sps:$4 sm:$0xff]   ;;  %v1082_v51 = vld [vmem:[%s1347_s0 + $0x44] ss:$28 sps:$4 sm:$0xff]   ;;  %v1088_v56 = vld [vmem:[%s1346_s1 + $0x128] sm:$0xff]  }
  0x13   :  { %v1085_v53 = vld [vmem:[%s1346_s1 + $0x1a0] sm:$0xff]   ;;  %v1086_v54 = vld [vmem:[%s1347_s0 + $0x38] ss:$28 sps:$4 sm:$0xff]   ;;  %v1090_v58 = vld [vmem:[%s1346_s1 + $0x1a8] sm:$0xff]  }
  0x14   :  { %923 = vmatpush3.bf16.msra.mxu0 %v1046_v18  ;;  %v1087_v55 = vld [vmem:[%s1347_s0 + $0x40] ss:$28 sps:$4 sm:$0xff]   ;;  %v1089_v57 = vld [vmem:[%s1346_s1 + $0x170] sm:$0xff]   ;;  %v1101_v3 = vld [vmem:[%s1347_s0 + $0x4c] ss:$28 sps:$4 sm:$0xff]  }
  0x15   :  { %951 = vmatpush3.bf16.msra.mxu1 %v1047_v19  ;;  %924 = vmatprep.subr.bf16.mxu0 %v1048_v20  ;;  %v1091_v59 = vld [vmem:[%s1346_s1 + $0x130] sm:$0xff]   ;;  %v1092_v60 = vld [vmem:[%s1346_s1 + $0x178] sm:$0xff]   ;;  %v1103_v5 = vld [vmem:[%s1347_s0 + $0x48] ss:$28 sps:$4 sm:$0xff]  }
  0x16   :  { %952 = vmatprep.subr.bf16.mxu1 %v1049_v21  ;;  %v1093_v61 = vld [vmem:[%s1346_s1 + $0x1b0] sm:$0xff]   ;;  %v1094_v62 = vld [vmem:[%s1346_s1 + $0x138] sm:$0xff]  }
  0x17   :  { %v1097_v63 = vld [vmem:[%s1347_s0 + $0x14] ss:$28 sps:$4 sm:$0xff]   ;;  %v1098_v0 = vld [vmem:[%s1346_s1 + $0x1b8] sm:$0xff]  }
  0x18   :  { %925 = vmatpush3.bf16.msra.mxu0 %v1050_v22  ;;  %v1099_v1 = vld [vmem:[%s1347_s0 + $0x18] ss:$28 sps:$4 sm:$0xff]   ;;  %v1095_v2 = vld [vmem:[%s1347_s0 + $0x10] ss:$28 sps:$4 sm:$0xff]  }
  0x19   :  { %953 = vmatpush3.bf16.msra.mxu1 %v1051_v23  ;;  %926 = vmatprep.subr.bf16.mxu0 %v1052_v24  ;;  %v1100_v4 = vld [vmem:[%s1347_s0 + $0x50] ss:$28 sps:$4 sm:$0xff]  }
  0x1a   :  { %954 = vmatprep.subr.bf16.mxu1 %v1053_v25 }
  0x1c   :  { %927 = vmatpush3.bf16.msra.mxu0 %v1054_v26 }
  0x1d   :  { %955 = vmatpush3.bf16.msra.mxu1 %v1055_v27  ;;  %928 = vmatprep.subr.bf16.mxu0 %v1056_v28 }
  0x1e   :  { %956 = vmatprep.subr.bf16.mxu1 %v1057_v29 }
  0x20   :  { %929 = vmatpush3.bf16.msra.mxu0 %v1058_v30 }
  0x21   :  { %957 = vmatpush3.bf16.msra.mxu1 %v1059_v31  ;;  %970 = vmatprep.subr.bf16.mxu0 %v1066_v36 }
  0x22   :  { %1008 = vmatprep.subr.bf16.mxu1 %v1069_v39 }
  0x23   :  { %595 = vmatmul.mubr.bf16.vlgmr.msra.gmra.mrb[0].mxu0 %v1060_v32 }
  0x24   :  { %644 = vmatmul.mubr.bf16.vlgmr.msra.gmra.mrb[0].mxu1 %v1063_v34  ;;  %971 = vmatpush3.bf16.msra.mxu0 %v1067_v37 }
  0x25   :  { %972 = vmatprep.subr.bf16.mxu0 %v1068_v38  ;;  %1009 = vmatpush3.bf16.msra.mxu1 %v1069_v39 }
  0x26   :  { %1010 = vmatprep.subr.bf16.mxu1 %v1072_v42  ;;  %602 = vmatprep.mubr.bf16.mxu0 %v1080_v50 }
  0x27   :  { %651 = vmatprep.mubr.bf16.mxu1 %v1082_v51 }
  0x28   :  { %973 = vmatpush3.bf16.msra.mxu0 %v1070_v40 }
  0x29   :  { %974 = vmatprep.subr.bf16.mxu0 %v1071_v41  ;;  %1011 = vmatpush3.bf16.msra.mxu1 %v1072_v42 }
  0x2a   :  { %1012 = vmatprep.subr.bf16.mxu1 %v1075_v45 }
  0x2b   :  { %603 = vmatmul.mubr.bf16.gmra.mrb[4].mxu0 %v1086_v54 }
  0x2c   :  { %975 = vmatpush3.bf16.msra.mxu0 %v1073_v43  ;;  %652 = vmatmul.mubr.bf16.gmra.mrb[4].mxu1 %v1087_v55 }
  0x2d   :  { %976 = vmatprep.subr.bf16.mxu0 %v1074_v44  ;;  %1013 = vmatpush3.bf16.msra.mxu1 %v1075_v45 }
  0x2e   :  { %1014 = vmatprep.subr.bf16.mxu1 %v1078_v48  ;;  %692 = vmatprep.mubr.bf16.mxu0 %v1097_v63 }
  0x2f   :  { %1024 = vmatprep.mubr.bf16.mxu1 %v1099_v1 }
  0x30   :  { %977 = vmatpush3.bf16.msra.mxu0 %v1076_v46 }
  0x31   :  { %978 = vmatprep.subr.bf16.mxu0 %v1077_v47  ;;  %1015 = vmatpush3.bf16.msra.mxu1 %v1078_v48 }
  0x32   :  { %1016 = vmatprep.subr.bf16.mxu1 %v1085_v53 }
  0x34   :  { %979 = vmatpush3.bf16.msra.mxu0 %v1079_v49 }
  0x35   :  { %980 = vmatprep.subr.bf16.mxu0 %v1084_v52  ;;  %1017 = vmatpush3.bf16.msra.mxu1 %v1085_v53 }
  0x36   :  { %1018 = vmatprep.subr.bf16.mxu1 %v1090_v58 }
  0x38   :  { %981 = vmatpush3.bf16.msra.mxu0 %v1088_v56 }
  0x39   :  { %982 = vmatprep.subr.bf16.mxu0 %v1089_v57  ;;  %1019 = vmatpush3.bf16.msra.mxu1 %v1090_v58 }
  0x3a   :  { %1020 = vmatprep.subr.bf16.mxu1 %v1093_v61 }
  0x3c   :  { %983 = vmatpush3.bf16.msra.mxu0 %v1091_v59 }
  0x3d   :  { %984 = vmatprep.subr.bf16.mxu0 %v1092_v60  ;;  %1021 = vmatpush3.bf16.msra.mxu1 %v1093_v61 }
  0x3e   :  { %1022 = vmatprep.subr.bf16.mxu1 %v1098_v0 }
  0x40   :  { %985 = vmatpush3.bf16.msra.mxu0 %v1094_v62 }
  0x41   :  { %1023 = vmatpush3.bf16.msra.mxu1 %v1098_v0 }
  0x43   :  { %693 = vmatmul.mubr.bf16.vlgmr.msra.gmra.mrb[8].mxu0 %v1095_v2 }
  0x44   :  { %700 = vmatprep.mubr.bf16.mxu0 %v1101_v3  ;;  %1025 = vmatmul.mubr.bf16.vlgmr.msra.gmra.mrb[8].mxu1 %v1100_v4 }
  0x4b   :  { %701 = vmatmul.mubr.bf16.gmra.mrb[12].mxu0 %v1103_v5 }
  0xf6   :  { %v930_v6 = vpop.f32.mrb[0].mxu0 }
  0xf7   :  { %v958_v7 = vpop.f32.mrb[0].mxu1  ;;  %v931_v8 = vpop.f32.mrb[1].mxu0 }
  0xf8   :  { %v932_v9 = vadd.f32 %v931_v8, %v930_v6  ;;  %v959_v10 = vpop.f32.mrb[1].mxu1  ;;  %v933_v11 = vpop.f32.mrb[2].mxu0 }
  0xf9   :  { %v960_v12 = vadd.f32 %v959_v10, %v958_v7  ;;  %v961_v13 = vpop.f32.mrb[2].mxu1  ;;  %v934_v14 = vpop.f32.mrb[3].mxu0 }
  0xfa   :  { %v935_v15 = vadd.f32 %v934_v14, %v933_v11  ;;  %v962_v16 = vpop.f32.mrb[3].mxu1 }
  0xfb   :  { %v646_v17 = vadd.f32 %v960_v12, %v932_v9  ;;  %v963_v18 = vadd.f32 %v962_v16, %v961_v13 }
  0xfd   :  { %v649_v19 = vadd.f32 %v963_v18, %v935_v15 }
  0xfe   :  { %v936_v20 = vpop.f32.mrb[4].mxu0 }
  0xff   :  { %v964_v21 = vpop.f32.mrb[4].mxu1  ;;  %v937_v22 = vpop.f32.mrb[5].mxu0 }
 0x100   :  { %v938_v23 = vadd.f32 %v937_v22, %v936_v20  ;;  %v965_v24 = vpop.f32.mrb[5].mxu1  ;;  %v939_v25 = vpop.f32.mrb[6].mxu0 }
 0x101   :  { %v966_v26 = vadd.f32 %v965_v24, %v964_v21  ;;  %v967_v27 = vpop.f32.mrb[6].mxu1  ;;  %v940_v28 = vpop.f32.mrb[7].mxu0 }
 0x102   :  { %v941_v29 = vadd.f32 %v940_v28, %v939_v25  ;;  %v968_v30 = vpop.f32.mrb[7].mxu1 }
 0x103   :  { %v654_v31 = vadd.f32 %v966_v26, %v938_v23  ;;  %v969_v32 = vadd.f32 %v968_v30, %v967_v27 }
 0x105   :  { %v657_v33 = vadd.f32 %v969_v32, %v941_v29 }
 0x116   :  { %v986_v34 = vpop.f32.mrb[8].mxu0 }
 0x117   :  { %v987_v35 = vpop.f32.mrb[9].mxu0  ;;  %v1026_v39 = vpop.f32.mrb[8].mxu1 }
 0x118   :  { %v988_v36 = vadd.f32 %v987_v35, %v986_v34  ;;  %v989_v37 = vpop.f32.mrb[10].mxu0  ;;  %v743_v42 = vpop.f32.mrb[9].mxu1 }
 0x119   :  { %v990_v38 = vpop.f32.mrb[11].mxu0  ;;  %v1027_v43 = vpop.f32.mrb[10].mxu1 }
 0x11a   :  { %v991_v40 = vadd.f32 %v990_v38, %v989_v37  ;;  %v695_v41 = vadd.f32 %v988_v36, %v646_v17  ;;  %v746_v46 = vpop.f32.mrb[11].mxu1 }
 0x11c   :  { %v744_v44 = vadd.f32 %v743_v42, %v695_v41  ;;  %v698_v45 = vadd.f32 %v991_v40, %v649_v19 }
 0x11e   :  { %v747_v47 = vadd.f32 %v746_v46, %v698_v45  ;;  %v992_v48 = vpop.f32.mrb[12].mxu0  ;;  %v803_v49 = vmul.f32 %v744_v44, %v744_v44 }
 0x11f   :  { %v993_v50 = vpop.f32.mrb[13].mxu0 }
 0x120   :  { %v906_v51 = vpack.c.bf16 %v747_v47, %v744_v44  ;;  %v793_v52 = vadd.f32 %v747_v47, %v744_v44  ;;  %v804_v53 = vmul.f32 %v747_v47, %v747_v47  ;;  %v994_v54 = vadd.f32 %v993_v50, %v992_v48  ;;  %v995_v55 = vpop.f32.mrb[14].mxu0 }
 0x121   :  { %v996_v56 = vpop.f32.mrb[15].mxu0 }
 0x122   :  { %907 = vst [vmem:[%s1348_s2] sm:$0xff] %v906_v51   ;;  %v807_v57 = vadd.f32 %v804_v53, %v803_v49  ;;  %v703_v58 = vadd.f32 %v994_v54, %v654_v31  ;;  %v997_v59 = vadd.f32 %v996_v56, %v995_v55 }
 0x124   :  { %v752_v60 = vadd.f32 %v1026_v39, %v703_v58  ;;  %v706_v61 = vadd.f32 %v997_v59, %v657_v33 }
 0x126   :  { %v794_v62 = vadd.f32 %v793_v52, %v752_v60  ;;  %v805_v63 = vmul.f32 %v752_v60, %v752_v60  ;;  %v755_v0 = vadd.f32 %v1027_v43, %v706_v61 }
 0x128   :  { %v808_v1 = vadd.f32 %v807_v57, %v805_v63  ;;  %v911_v2 = vpack.c.bf16 %v755_v0, %v752_v60  ;;  %v795_v3 = vadd.f32 %v794_v62, %v755_v0  ;;  %v806_v4 = vmul.f32 %v755_v0, %v755_v0 }
 0x12a   :  { %913 = vst [vmem:[%s1348_s2 + $0x8] sm:$0xff] %v911_v2   ;;  %v796_v5 = vrot.slane %v795_v3, 4  ;;  %v809_v6 = vadd.f32 %v808_v1, %v806_v4 }
 0x12c   :  { %v797_v7 = vadd.f32 %v796_v5, %v795_v3  ;;  %v810_v8 = vrot.slane %v809_v6, 4 }
 0x12e   :  { %v798_v9 = vrot.slane %v797_v7, 2  ;;  %v811_v10 = vadd.f32 %v810_v8, %v809_v6 }
 0x130   :  { %v799_v11 = vadd.f32 %v798_v9, %v797_v7  ;;  %v812_v12 = vrot.slane %v811_v10, 2 }
 0x132   :  { %v800_v13 = vrot.slane %v799_v11, 1  ;;  %v813_v14 = vadd.f32 %v812_v12, %v811_v10 }
 0x134   :  { %v801_v15 = vadd.f32 %v800_v13, %v799_v11  ;;  %v814_v16 = vrot.slane %v813_v14, 1 }
 0x136   :  { %802 = vst [vmem:[%s1349_s3] sm:$0x1] %v801_v15  ;;  %v815_v17 = vadd.f32 %v814_v16, %v813_v14 }
 0x138   :  { %816 = vst [vmem:[%s1349_s3 + $0x1] sm:$0x1] %v815_v17 }

</bundles_post_ra>
